<compile_context>
chip_gen: v7x
topology: tpu7x:2x2x1
jax: 0.10.0
libtpu: 0.0.40
codegen_flags: <defaults>
</compile_context>

<pallas_src>
import jax
import jax.numpy as jnp
from jax.experimental import pallas as pl
from jax.experimental.pallas import tpu as pltpu

# ----------------------------- model / problem sizes ------------------------------
DEPTH = 4
HEADS = 2
HIDDEN = 64
IN_FEATS = 3 + 24          # use_normal = False
HID1 = 48
HID1_PAD = 64              # 48 -> 64 (lane-friendly)
MID_HID = 128
MID_OUT = 512
OUT_HID = 128
OUT_CLASSES = 24
OUT_PAD = 128              # 24 -> 128 (lane-dense final store, sliced in wrapper)
N_NODES = 64
N_GRAPHS = 2
PER_GRAPH = N_NODES // N_GRAPHS
NEG_SLOPE = 0.2            # GATConv default
NEG_INF = -1e30

# rows inside the f32 bias slab (16, 512)
_B_IN1, _B_IN2, _B_MID1, _B_MID2, _B_OUT1, _B_OUT2, _B_GAT0 = 0, 1, 2, 3, 4, 5, 8
# planes inside the (10, 64, 128) main weight slab: 0..7 = GAT convs, then midMLP-1, outMLP-1a
_W_MID1, _W_OUT1A = 2 * DEPTH, 2 * DEPTH + 1


# --------------------------------- fused kernel -----------------------------------
def fused_skinnet_kernel(x_ref, adj_ref, w_in, w_main, gat_att, mid_w2, out_w1b,
                         out_w2, b_ref, o_ref):
    f32, bf16 = jnp.float32, jnp.bfloat16

    x = x_ref[...]            # (P, 64) f32, cols >= 27 are zero
    adj_bias = adj_ref[...]   # (P, P)  f32, 0 on edges/self-loops, -1e30 elsewhere

    def bias_row(row, width):
        return b_ref[row:row + 1, 0:width]          # (1, width) f32, static slice

    # ---- inMLP: Linear(27->48) -> ReLU -> Linear(48->64)   (padded to 64/64)
    h = jnp.dot(x.astype(bf16), w_in[0], preferred_element_type=f32) \
        + bias_row(_B_IN1, HID1_PAD)
    h = jnp.maximum(h, 0.0)
    fs = jnp.dot(h.astype(bf16), w_in[1], preferred_element_type=f32) \
        + bias_row(_B_IN2, HIDDEN)                   # (P, 64) f32

    # ---- dense GATConv(64, 64, heads=2, concat=False); attention vectors are folded
    #      into projection-side weights, so logits come from two tiny matmuls on xin.
    def gat(xin, ci):
        xin_b = xin.astype(bf16)
        hh = jnp.dot(xin_b, w_main[ci], preferred_element_type=f32)     # (P, 128)
        hhb = hh.astype(bf16)
        att_w = gat_att[ci]                                             # (4, 64) bf16
        # src logits, both heads, directly as rows: (2, P)
        a_src = jax.lax.dot_general(att_w[0:2], xin_b, (((1,), (1,)), ((), ())),
                                    preferred_element_type=f32)
        # dst logits, both heads, directly as columns: (P, 2)
        a_dst = jax.lax.dot_general(xin_b, att_w[2:4], (((1,), (1,)), ((), ())),
                                    preferred_element_type=f32)
        acc = None
        for hd in range(HEADS):                                         # static unroll
            lo = hd * HIDDEN
            e = a_dst[:, hd:hd + 1] + a_src[hd:hd + 1, :]               # e[i, j]
            e = jnp.where(e > 0, e, NEG_SLOPE * e)                      # LeakyReLU
            e = e + adj_bias                                            # additive mask
            e = e - jnp.max(e, axis=-1, keepdims=True)
            p = jnp.exp(e)                                              # f32 (v5e-safe)
            # normalize AFTER the aggregation matmul; fold the 1/HEADS head-mean in
            inv = pl.reciprocal(jnp.sum(p, axis=-1, keepdims=True),
                                approx=True) * (1.0 / HEADS)
            contrib = jnp.dot(p.astype(bf16), hhb[:, lo:lo + HIDDEN],
                              preferred_element_type=f32) * inv
            acc = contrib if acc is None else acc + contrib
        return acc + bias_row(_B_GAT0 + ci, HIDDEN)

    # ---- residual GAT stack
    mid = fs
    for layer in range(DEPTH):                                          # static unroll
        y = jnp.maximum(gat(fs, 2 * layer), 0.0)                        # ReLU(conv1(fs))
        fs = jnp.maximum(fs + gat(y, 2 * layer + 1), 0.0)               # ReLU(fs + conv2(y))
        if layer == 0:
            mid = fs

    # ---- midMLP: Linear(64->128) -> ReLU -> Linear(128->512)
    m = jnp.dot(mid.astype(bf16), w_main[_W_MID1], preferred_element_type=f32) \
        + bias_row(_B_MID1, MID_HID)
    m = jnp.maximum(m, 0.0)
    mid_feat = jnp.dot(m.astype(bf16), mid_w2[...], preferred_element_type=f32) \
        + bias_row(_B_MID2, MID_OUT)                                    # (P, 512)

    # ---- global_max_pool: this program IS one graph, so pooling is a plain column max;
    #      gl is never materialized -- project the (1,512) max and broadcast-add.
    gmax = jnp.max(mid_feat, axis=0, keepdims=True)                     # (1, 512)
    gl_row = jnp.dot(gmax.astype(bf16), out_w1b[...],
                     preferred_element_type=f32)                        # (1, 128)

    # ---- outMLP on concat(fs, gl) without materializing the concat
    h2 = (jnp.dot(fs.astype(bf16), w_main[_W_OUT1A], preferred_element_type=f32)
          + gl_row + bias_row(_B_OUT1, OUT_HID))
    h2 = jnp.maximum(h2, 0.0)
    # logits padded 24 -> 128; padded columns carry a -1e30 bias so exp() -> 0 exactly
    z = jnp.dot(h2.astype(bf16), out_w2[...], preferred_element_type=f32) \
        + bias_row(_B_OUT2, OUT_PAD)
    z = z - jnp.max(z, axis=-1, keepdims=True)
    ez = jnp.exp(z)
    o_ref[...] = ez * (1.0 / jnp.sum(ez, axis=-1, keepdims=True))       # lane-dense store


# -------------------------------- pallas_call glue --------------------------------
def _const_index_map(ndim):
    return lambda g: (0,) * ndim


@jax.jit
def skin_weight_net_forward(packed, x, adj_bias_blocks):
    n = x.shape[0]
    x_pad = jnp.zeros((n, HIDDEN), jnp.float32).at[:, :IN_FEATS].set(x)

    in_specs = [
        pl.BlockSpec((PER_GRAPH, HIDDEN), lambda g: (g, 0)),                 # x slice
        pl.BlockSpec((None, PER_GRAPH, PER_GRAPH), lambda g: (g, 0, 0)),     # adj block
    ] + [pl.BlockSpec(a.shape, _const_index_map(a.ndim)) for a in packed]    # weights (fetched once)

    out_pad = pl.pallas_call(
        fused_skinnet_kernel,
        out_shape=jax.ShapeDtypeStruct((n, OUT_PAD), jnp.float32),
        grid=(N_GRAPHS,),
        in_specs=in_specs,
        out_specs=pl.BlockSpec((PER_GRAPH, OUT_PAD), lambda g: (g, 0)),
        compiler_params=pltpu.CompilerParams(dimension_semantics=("parallel",)),
    )(x_pad, adj_bias_blocks, *packed)
    return out_pad[:, :OUT_CLASSES]


# ------------------------------ parameter construction ----------------------------
def init_params(key):
    keys = jax.random.split(key, 64)
    it = iter(range(64))

    def nk():
        return keys[next(it)]

    def linear(fan_in, fan_out):
        w = jax.random.normal(nk(), (fan_in, fan_out), jnp.float32) / jnp.sqrt(float(fan_in))
        b = jax.random.normal(nk(), (1, fan_out), jnp.float32) * 0.01
        return w, b

    def mlp2(d0, d1, d2):
        w1, b1 = linear(d0, d1)
        w2, b2 = linear(d1, d2)
        return (w1, b1, w2, b2)

    def gat(c):
        w = jax.random.normal(nk(), (HEADS, c, c), jnp.float32) / jnp.sqrt(float(c))
        att_src = jax.random.normal(nk(), (HEADS, c), jnp.float32) / jnp.sqrt(float(c))
        att_dst = jax.random.normal(nk(), (HEADS, c), jnp.float32) / jnp.sqrt(float(c))
        bias = jnp.zeros((1, c), jnp.float32)
        return (w, att_src, att_dst, bias)

    return {
        "inMLP": mlp2(IN_FEATS, HID1, HIDDEN),
        "ress": [(gat(HIDDEN), gat(HIDDEN)) for _ in range(DEPTH)],
        "midMLP": mlp2(HIDDEN, MID_HID, MID_OUT),
        "outMLP": mlp2(HIDDEN + MID_OUT, OUT_HID, OUT_CLASSES),
    }


def pack_params(params):
    """Pad to lane-friendly shapes, fold attention vectors into projection-side
    weights, and pack everything into 7 dtype-homogeneous slabs (few DMAs)."""
    def b16(a):
        return a.astype(jnp.bfloat16)

    # inMLP: input padded 27->64 and hidden 48->64 with zeros (exactly equivalent).
    w1, b1, w2, b2 = params["inMLP"]
    in_w1 = jnp.zeros((HIDDEN, HID1_PAD), jnp.float32).at[:IN_FEATS, :HID1].set(w1)
    in_w2 = jnp.zeros((HID1_PAD, HIDDEN), jnp.float32).at[:HID1, :].set(w2)
    w_in = b16(jnp.stack([in_w1, in_w2]))                               # (2, 64, 64)

    # 8 GAT convs (layer-major, conv1 then conv2): heads concatenated on lanes for
    # the projection; attention vectors folded: fold_h = W_h @ att_h  (64,).
    proj, att_folds, gat_biases = [], [], []
    for (p1, p2) in params["ress"]:
        for (w, att_src, att_dst, bias) in (p1, p2):
            proj.append(jnp.concatenate([w[0], w[1]], axis=1))          # (64, 128)
            att_folds.append(jnp.stack([w[0] @ att_src[0], w[1] @ att_src[1],
                                        w[0] @ att_dst[0], w[1] @ att_dst[1]]))  # (4, 64)
            gat_biases.append(bias[0])                                   # (64,)

    mw1, mb1, mw2, mb2 = params["midMLP"]
    ow1, ob1, ow2, ob2 = params["outMLP"]
    out_w1a = ow1[:HIDDEN, :]                                            # multiplies fs  (64, 128)
    out_w1b = ow1[HIDDEN:, :]                                            # multiplies gl  (512, 128)
    out_w2 = jnp.zeros((OUT_HID, OUT_PAD), jnp.float32).at[:, :OUT_CLASSES].set(ow2)

    w_main = b16(jnp.stack(proj + [mw1, out_w1a]))                       # (10, 64, 128)
    gat_att = b16(jnp.stack(att_folds))                                  # (8, 4, 64)

    # One f32 bias slab; out_b2 padding carries -1e30 so the padded softmax is exact.
    biases = jnp.zeros((16, 512), jnp.float32)
    biases = biases.at[_B_IN1, :HID1].set(b1[0])
    biases = biases.at[_B_IN2, :HIDDEN].set(b2[0])
    biases = biases.at[_B_MID1, :MID_HID].set(mb1[0])
    biases = biases.at[_B_MID2, :MID_OUT].set(mb2[0])
    biases = biases.at[_B_OUT1, :OUT_HID].set(ob1[0])
    out_b2 = jnp.full((OUT_PAD,), NEG_INF, jnp.float32).at[:OUT_CLASSES].set(ob2[0])
    biases = biases.at[_B_OUT2, :OUT_PAD].set(out_b2)
    for i, gb in enumerate(gat_biases):
        biases = biases.at[_B_GAT0 + i, :HIDDEN].set(gb)

    return (w_in, w_main, gat_att, b16(mw2), b16(out_w1b), b16(out_w2), biases)


# ------------------------------------- main ----------------------------------------
if __name__ == "__main__":
    key = jax.random.PRNGKey(0)
    k_x, k_p = jax.random.split(key)

    # Node features: (N, 3 + 24)
    x = jax.random.normal(k_x, (N_NODES, IN_FEATS), jnp.float32)

    # Two graphs of 32 nodes each (batch = [0]*32 + [1]*32); ring edges within each
    # graph, both directions.  A batched PyG graph is block-diagonal, so adjacency is
    # stored as per-graph (P, P) blocks, already converted to the additive attention
    # bias (0 on edges incl. self loops, -1e30 elsewhere).
    idx = jnp.arange(PER_GRAPH)
    ring = jnp.zeros((PER_GRAPH, PER_GRAPH), jnp.float32)
    ring = ring.at[(idx + 1) % PER_GRAPH, idx].set(1.0)   # A[dst, src]: i -> i+1
    ring = ring.at[idx, (idx + 1) % PER_GRAPH].set(1.0)   # i+1 -> i
    adj = jnp.maximum(ring, jnp.eye(PER_GRAPH, dtype=jnp.float32))      # + self loops
    adj_bias = jnp.where(adj > 0, 0.0, NEG_INF).astype(jnp.float32)
    adj_bias_blocks = jnp.stack([adj_bias] * N_GRAPHS)                  # (G, P, P)

    params = init_params(k_p)
    packed = pack_params(params)

    out = skin_weight_net_forward(packed, x, adj_bias_blocks)
    out = jax.block_until_ready(out)

    assert out.shape == (N_NODES, OUT_CLASSES)
    assert bool(jnp.all(jnp.isfinite(out)))
    print("KERNEL_OK")
</pallas_src>

<mosaic_0001>
module attributes {stable_mosaic.version = 11 : i64} {
  func.func @fused_skinnet_kernel(%arg0: i32, %arg1: memref<32x64xf32, #tpu.memory_space<vmem>>, %arg2: memref<1x32x32xf32, #tpu.memory_space<vmem>>, %arg3: memref<2x64x64xbf16, #tpu.memory_space<vmem>>, %arg4: memref<10x64x128xbf16, #tpu.memory_space<vmem>>, %arg5: memref<8x4x64xbf16, #tpu.memory_space<vmem>>, %arg6: memref<128x512xbf16, #tpu.memory_space<vmem>>, %arg7: memref<512x128xbf16, #tpu.memory_space<vmem>>, %arg8: memref<128x128xbf16, #tpu.memory_space<vmem>>, %arg9: memref<16x512xf32, #tpu.memory_space<vmem>>, %arg10: memref<32x128xf32, #tpu.memory_space<vmem>>) attributes {dimension_semantics = [#tpu.dimension_semantics<parallel>], iteration_bounds = array<i64: 2>, scalar_prefetch = 0 : i64, scratch_operands = 0 : i64, tpu.core_type = #tpu.core_type<tc>, window_params = [{transform_indices = @transform_0, window_bounds = array<i64: 32, 64>}, {transform_indices = @transform_1, window_bounds = array<i64: 1, 32, 32>}, {pipeline_mode = #tpu.pipeline_mode<synchronous>, transform_indices = @transform_2, window_bounds = array<i64: 2, 64, 64>}, {pipeline_mode = #tpu.pipeline_mode<synchronous>, transform_indices = @transform_3, window_bounds = array<i64: 10, 64, 128>}, {pipeline_mode = #tpu.pipeline_mode<synchronous>, transform_indices = @transform_4, window_bounds = array<i64: 8, 4, 64>}, {pipeline_mode = #tpu.pipeline_mode<synchronous>, transform_indices = @transform_5, window_bounds = array<i64: 128, 512>}, {pipeline_mode = #tpu.pipeline_mode<synchronous>, transform_indices = @transform_6, window_bounds = array<i64: 512, 128>}, {pipeline_mode = #tpu.pipeline_mode<synchronous>, transform_indices = @transform_7, window_bounds = array<i64: 128, 128>}, {pipeline_mode = #tpu.pipeline_mode<synchronous>, transform_indices = @transform_8, window_bounds = array<i64: 16, 512>}, {transform_indices = @transform_9, window_bounds = array<i64: 32, 128>}]} {
    %c0 = arith.constant 0 : index
    %c0_0 = arith.constant 0 : index
    %0 = vector.load %arg1[%c0, %c0_0] : memref<32x64xf32, #tpu.memory_space<vmem>>, vector<32x64xf32>
    %c0_1 = arith.constant 0 : index
    %c0_2 = arith.constant 0 : index
    %c0_3 = arith.constant 0 : index
    %1 = vector.load %arg2[%c0_1, %c0_2, %c0_3] : memref<1x32x32xf32, #tpu.memory_space<vmem>>, vector<1x32x32xf32>
    %2 = vector.shape_cast %1 : vector<1x32x32xf32> to vector<32x32xf32>
    %3 = arith.truncf %0 : vector<32x64xf32> to vector<32x64xbf16>
    %c0_4 = arith.constant 0 : index
    %c0_5 = arith.constant 0 : index
    %c0_6 = arith.constant 0 : index
    %4 = vector.load %arg3[%c0_4, %c0_5, %c0_6] : memref<2x64x64xbf16, #tpu.memory_space<vmem>>, vector<1x64x64xbf16>
    %5 = vector.shape_cast %4 : vector<1x64x64xbf16> to vector<64x64xbf16>
    %cst = arith.constant dense<0.000000e+00> : vector<32x64xf32>
    %6 = tpu.matmul %3, %5, %cst {dimension_numbers = #tpu.dot_dimension_numbers<[1], [0], [0], [1], [0, 0, 1, 1], [], []>} : vector<32x64xbf16>, vector<64x64xbf16>, vector<32x64xf32> -> vector<32x64xf32>
    %c0_7 = arith.constant 0 : index
    %c0_8 = arith.constant 0 : index
    %7 = vector.load %arg9[%c0_7, %c0_8] : memref<16x512xf32, #tpu.memory_space<vmem>>, vector<1x64xf32>
    %8 = vector.broadcast %7 : vector<1x64xf32> to vector<32x64xf32>
    %9 = arith.addf %6, %8 : vector<32x64xf32>
    %cst_9 = arith.constant 0.000000e+00 : f32
    %10 = vector.broadcast %cst_9 : f32 to vector<32x64xf32>
    %11 = arith.maximumf %9, %10 : vector<32x64xf32>
    %12 = arith.truncf %11 : vector<32x64xf32> to vector<32x64xbf16>
    %c1 = arith.constant 1 : index
    %c0_10 = arith.constant 0 : index
    %c0_11 = arith.constant 0 : index
    %13 = vector.load %arg3[%c1, %c0_10, %c0_11] : memref<2x64x64xbf16, #tpu.memory_space<vmem>>, vector<1x64x64xbf16>
    %14 = vector.shape_cast %13 : vector<1x64x64xbf16> to vector<64x64xbf16>
    %cst_12 = arith.constant dense<0.000000e+00> : vector<32x64xf32>
    %15 = tpu.matmul %12, %14, %cst_12 {dimension_numbers = #tpu.dot_dimension_numbers<[1], [0], [0], [1], [0, 0, 1, 1], [], []>} : vector<32x64xbf16>, vector<64x64xbf16>, vector<32x64xf32> -> vector<32x64xf32>
    %c1_13 = arith.constant 1 : index
    %c0_14 = arith.constant 0 : index
    %16 = vector.load %arg9[%c1_13, %c0_14] : memref<16x512xf32, #tpu.memory_space<vmem>>, vector<1x64xf32>
    %17 = vector.broadcast %16 : vector<1x64xf32> to vector<32x64xf32>
    %18 = arith.addf %15, %17 : vector<32x64xf32>
    %19 = arith.truncf %18 : vector<32x64xf32> to vector<32x64xbf16>
    %c0_15 = arith.constant 0 : index
    %c0_16 = arith.constant 0 : index
    %c0_17 = arith.constant 0 : index
    %20 = vector.load %arg4[%c0_15, %c0_16, %c0_17] : memref<10x64x128xbf16, #tpu.memory_space<vmem>>, vector<1x64x128xbf16>
    %21 = vector.shape_cast %20 : vector<1x64x128xbf16> to vector<64x128xbf16>
    %cst_18 = arith.constant dense<0.000000e+00> : vector<32x128xf32>
    %22 = tpu.matmul %19, %21, %cst_18 {dimension_numbers = #tpu.dot_dimension_numbers<[1], [0], [0], [1], [0, 0, 1, 1], [], []>} : vector<32x64xbf16>, vector<64x128xbf16>, vector<32x128xf32> -> vector<32x128xf32>
    %23 = arith.truncf %22 : vector<32x128xf32> to vector<32x128xbf16>
    %c0_19 = arith.constant 0 : index
    %c0_20 = arith.constant 0 : index
    %c0_21 = arith.constant 0 : index
    %24 = vector.load %arg5[%c0_19, %c0_20, %c0_21] : memref<8x4x64xbf16, #tpu.memory_space<vmem>>, vector<1x4x64xbf16>
    %25 = vector.shape_cast %24 : vector<1x4x64xbf16> to vector<4x64xbf16>
    %26 = vector.extract_strided_slice %25 {offsets = [0, 0], sizes = [2, 64], strides = [1, 1]} : vector<4x64xbf16> to vector<2x64xbf16>
    %cst_22 = arith.constant dense<0.000000e+00> : vector<2x32xf32>
    %27 = tpu.matmul %26, %19, %cst_22 {dimension_numbers = #tpu.dot_dimension_numbers<[1], [1], [0], [0], [0, 0, 1, 0], [], []>} : vector<2x64xbf16>, vector<32x64xbf16>, vector<2x32xf32> -> vector<2x32xf32>
    %28 = vector.extract_strided_slice %25 {offsets = [2, 0], sizes = [2, 64], strides = [1, 1]} : vector<4x64xbf16> to vector<2x64xbf16>
    %cst_23 = arith.constant dense<0.000000e+00> : vector<32x2xf32>
    %29 = tpu.matmul %19, %28, %cst_23 {dimension_numbers = #tpu.dot_dimension_numbers<[1], [1], [0], [0], [0, 0, 1, 0], [], []>} : vector<32x64xbf16>, vector<2x64xbf16>, vector<32x2xf32> -> vector<32x2xf32>
    %30 = vector.extract_strided_slice %29 {offsets = [0, 0], sizes = [32, 1], strides = [1, 1]} : vector<32x2xf32> to vector<32x1xf32>
    %31 = vector.extract_strided_slice %27 {offsets = [0, 0], sizes = [1, 32], strides = [1, 1]} : vector<2x32xf32> to vector<1x32xf32>
    %32 = vector.broadcast %30 : vector<32x1xf32> to vector<32x32xf32>
    %33 = vector.broadcast %31 : vector<1x32xf32> to vector<32x32xf32>
    %34 = arith.addf %32, %33 : vector<32x32xf32>
    %cst_24 = arith.constant 0.000000e+00 : f32
    %35 = vector.broadcast %cst_24 : f32 to vector<32x32xf32>
    %36 = arith.cmpf ogt, %34, %35 : vector<32x32xf32>
    %cst_25 = arith.constant 2.000000e-01 : f32
    %37 = vector.broadcast %cst_25 : f32 to vector<32x32xf32>
    %38 = arith.mulf %37, %34 : vector<32x32xf32>
    %39 = arith.select %36, %34, %38 : vector<32x32xi1>, vector<32x32xf32>
    %40 = arith.addf %39, %2 : vector<32x32xf32>
    %cst_26 = arith.constant dense<0xFF800000> : vector<32xf32>
    %41 = vector.multi_reduction <maximumf>, %40, %cst_26 [1] : vector<32x32xf32> to vector<32xf32>
    %42 = vector.shape_cast %41 : vector<32xf32> to vector<32x1xf32>
    %43 = vector.broadcast %42 : vector<32x1xf32> to vector<32x32xf32>
    %44 = arith.subf %40, %43 : vector<32x32xf32>
    %45 = math.exp %44 : vector<32x32xf32>
    %cst_27 = arith.constant dense<0.000000e+00> : vector<32xf32>
    %46 = vector.multi_reduction <add>, %45, %cst_27 [1] : vector<32x32xf32> to vector<32xf32>
    %47 = vector.shape_cast %46 : vector<32xf32> to vector<32x1xf32>
    %48 = tpu.reciprocal %47 {approx = true} : vector<32x1xf32> -> vector<32x1xf32>
    %cst_28 = arith.constant 5.000000e-01 : f32
    %49 = vector.broadcast %cst_28 : f32 to vector<32x1xf32>
    %50 = arith.mulf %48, %49 : vector<32x1xf32>
    %51 = arith.truncf %45 : vector<32x32xf32> to vector<32x32xbf16>
    %52 = vector.extract_strided_slice %23 {offsets = [0, 0], sizes = [32, 64], strides = [1, 1]} : vector<32x128xbf16> to vector<32x64xbf16>
    %cst_29 = arith.constant dense<0.000000e+00> : vector<32x64xf32>
    %53 = tpu.matmul %51, %52, %cst_29 {dimension_numbers = #tpu.dot_dimension_numbers<[1], [0], [0], [1], [0, 0, 1, 1], [], []>} : vector<32x32xbf16>, vector<32x64xbf16>, vector<32x64xf32> -> vector<32x64xf32>
    %54 = vector.broadcast %50 : vector<32x1xf32> to vector<32x64xf32>
    %55 = arith.mulf %53, %54 : vector<32x64xf32>
    %56 = vector.extract_strided_slice %29 {offsets = [0, 1], sizes = [32, 1], strides = [1, 1]} : vector<32x2xf32> to vector<32x1xf32>
    %57 = vector.extract_strided_slice %27 {offsets = [1, 0], sizes = [1, 32], strides = [1, 1]} : vector<2x32xf32> to vector<1x32xf32>
    %58 = vector.broadcast %56 : vector<32x1xf32> to vector<32x32xf32>
    %59 = vector.broadcast %57 : vector<1x32xf32> to vector<32x32xf32>
    %60 = arith.addf %58, %59 : vector<32x32xf32>
    %cst_30 = arith.constant 0.000000e+00 : f32
    %61 = vector.broadcast %cst_30 : f32 to vector<32x32xf32>
    %62 = arith.cmpf ogt, %60, %61 : vector<32x32xf32>
    %cst_31 = arith.constant 2.000000e-01 : f32
    %63 = vector.broadcast %cst_31 : f32 to vector<32x32xf32>
    %64 = arith.mulf %63, %60 : vector<32x32xf32>
    %65 = arith.select %62, %60, %64 : vector<32x32xi1>, vector<32x32xf32>
    %66 = arith.addf %65, %2 : vector<32x32xf32>
    %cst_32 = arith.constant dense<0xFF800000> : vector<32xf32>
    %67 = vector.multi_reduction <maximumf>, %66, %cst_32 [1] : vector<32x32xf32> to vector<32xf32>
    %68 = vector.shape_cast %67 : vector<32xf32> to vector<32x1xf32>
    %69 = vector.broadcast %68 : vector<32x1xf32> to vector<32x32xf32>
    %70 = arith.subf %66, %69 : vector<32x32xf32>
    %71 = math.exp %70 : vector<32x32xf32>
    %cst_33 = arith.constant dense<0.000000e+00> : vector<32xf32>
    %72 = vector.multi_reduction <add>, %71, %cst_33 [1] : vector<32x32xf32> to vector<32xf32>
    %73 = vector.shape_cast %72 : vector<32xf32> to vector<32x1xf32>
    %74 = tpu.reciprocal %73 {approx = true} : vector<32x1xf32> -> vector<32x1xf32>
    %cst_34 = arith.constant 5.000000e-01 : f32
    %75 = vector.broadcast %cst_34 : f32 to vector<32x1xf32>
    %76 = arith.mulf %74, %75 : vector<32x1xf32>
    %77 = arith.truncf %71 : vector<32x32xf32> to vector<32x32xbf16>
    %78 = vector.extract_strided_slice %23 {offsets = [0, 64], sizes = [32, 64], strides = [1, 1]} : vector<32x128xbf16> to vector<32x64xbf16>
    %cst_35 = arith.constant dense<0.000000e+00> : vector<32x64xf32>
    %79 = tpu.matmul %77, %78, %cst_35 {dimension_numbers = #tpu.dot_dimension_numbers<[1], [0], [0], [1], [0, 0, 1, 1], [], []>} : vector<32x32xbf16>, vector<32x64xbf16>, vector<32x64xf32> -> vector<32x64xf32>
    %80 = vector.broadcast %76 : vector<32x1xf32> to vector<32x64xf32>
    %81 = arith.mulf %79, %80 : vector<32x64xf32>
    %82 = arith.addf %55, %81 : vector<32x64xf32>
    %c8 = arith.constant 8 : index
    %c0_36 = arith.constant 0 : index
    %83 = vector.load %arg9[%c8, %c0_36] : memref<16x512xf32, #tpu.memory_space<vmem>>, vector<1x64xf32>
    %84 = vector.broadcast %83 : vector<1x64xf32> to vector<32x64xf32>
    %85 = arith.addf %82, %84 : vector<32x64xf32>
    %cst_37 = arith.constant 0.000000e+00 : f32
    %86 = vector.broadcast %cst_37 : f32 to vector<32x64xf32>
    %87 = arith.maximumf %85, %86 : vector<32x64xf32>
    %88 = arith.truncf %87 : vector<32x64xf32> to vector<32x64xbf16>
    %c1_38 = arith.constant 1 : index
    %c0_39 = arith.constant 0 : index
    %c0_40 = arith.constant 0 : index
    %89 = vector.load %arg4[%c1_38, %c0_39, %c0_40] : memref<10x64x128xbf16, #tpu.memory_space<vmem>>, vector<1x64x128xbf16>
    %90 = vector.shape_cast %89 : vector<1x64x128xbf16> to vector<64x128xbf16>
    %cst_41 = arith.constant dense<0.000000e+00> : vector<32x128xf32>
    %91 = tpu.matmul %88, %90, %cst_41 {dimension_numbers = #tpu.dot_dimension_numbers<[1], [0], [0], [1], [0, 0, 1, 1], [], []>} : vector<32x64xbf16>, vector<64x128xbf16>, vector<32x128xf32> -> vector<32x128xf32>
    %92 = arith.truncf %91 : vector<32x128xf32> to vector<32x128xbf16>
    %c1_42 = arith.constant 1 : index
    %c0_43 = arith.constant 0 : index
    %c0_44 = arith.constant 0 : index
    %93 = vector.load %arg5[%c1_42, %c0_43, %c0_44] : memref<8x4x64xbf16, #tpu.memory_space<vmem>>, vector<1x4x64xbf16>
    %94 = vector.shape_cast %93 : vector<1x4x64xbf16> to vector<4x64xbf16>
    %95 = vector.extract_strided_slice %94 {offsets = [0, 0], sizes = [2, 64], strides = [1, 1]} : vector<4x64xbf16> to vector<2x64xbf16>
    %cst_45 = arith.constant dense<0.000000e+00> : vector<2x32xf32>
    %96 = tpu.matmul %95, %88, %cst_45 {dimension_numbers = #tpu.dot_dimension_numbers<[1], [1], [0], [0], [0, 0, 1, 0], [], []>} : vector<2x64xbf16>, vector<32x64xbf16>, vector<2x32xf32> -> vector<2x32xf32>
    %97 = vector.extract_strided_slice %94 {offsets = [2, 0], sizes = [2, 64], strides = [1, 1]} : vector<4x64xbf16> to vector<2x64xbf16>
    %cst_46 = arith.constant dense<0.000000e+00> : vector<32x2xf32>
    %98 = tpu.matmul %88, %97, %cst_46 {dimension_numbers = #tpu.dot_dimension_numbers<[1], [1], [0], [0], [0, 0, 1, 0], [], []>} : vector<32x64xbf16>, vector<2x64xbf16>, vector<32x2xf32> -> vector<32x2xf32>
    %99 = vector.extract_strided_slice %98 {offsets = [0, 0], sizes = [32, 1], strides = [1, 1]} : vector<32x2xf32> to vector<32x1xf32>
    %100 = vector.extract_strided_slice %96 {offsets = [0, 0], sizes = [1, 32], strides = [1, 1]} : vector<2x32xf32> to vector<1x32xf32>
    %101 = vector.broadcast %99 : vector<32x1xf32> to vector<32x32xf32>
    %102 = vector.broadcast %100 : vector<1x32xf32> to vector<32x32xf32>
    %103 = arith.addf %101, %102 : vector<32x32xf32>
    %cst_47 = arith.constant 0.000000e+00 : f32
    %104 = vector.broadcast %cst_47 : f32 to vector<32x32xf32>
    %105 = arith.cmpf ogt, %103, %104 : vector<32x32xf32>
    %cst_48 = arith.constant 2.000000e-01 : f32
    %106 = vector.broadcast %cst_48 : f32 to vector<32x32xf32>
    %107 = arith.mulf %106, %103 : vector<32x32xf32>
    %108 = arith.select %105, %103, %107 : vector<32x32xi1>, vector<32x32xf32>
    %109 = arith.addf %108, %2 : vector<32x32xf32>
    %cst_49 = arith.constant dense<0xFF800000> : vector<32xf32>
    %110 = vector.multi_reduction <maximumf>, %109, %cst_49 [1] : vector<32x32xf32> to vector<32xf32>
    %111 = vector.shape_cast %110 : vector<32xf32> to vector<32x1xf32>
    %112 = vector.broadcast %111 : vector<32x1xf32> to vector<32x32xf32>
    %113 = arith.subf %109, %112 : vector<32x32xf32>
    %114 = math.exp %113 : vector<32x32xf32>
    %cst_50 = arith.constant dense<0.000000e+00> : vector<32xf32>
    %115 = vector.multi_reduction <add>, %114, %cst_50 [1] : vector<32x32xf32> to vector<32xf32>
    %116 = vector.shape_cast %115 : vector<32xf32> to vector<32x1xf32>
    %117 = tpu.reciprocal %116 {approx = true} : vector<32x1xf32> -> vector<32x1xf32>
    %cst_51 = arith.constant 5.000000e-01 : f32
    %118 = vector.broadcast %cst_51 : f32 to vector<32x1xf32>
    %119 = arith.mulf %117, %118 : vector<32x1xf32>
    %120 = arith.truncf %114 : vector<32x32xf32> to vector<32x32xbf16>
    %121 = vector.extract_strided_slice %92 {offsets = [0, 0], sizes = [32, 64], strides = [1, 1]} : vector<32x128xbf16> to vector<32x64xbf16>
    %cst_52 = arith.constant dense<0.000000e+00> : vector<32x64xf32>
    %122 = tpu.matmul %120, %121, %cst_52 {dimension_numbers = #tpu.dot_dimension_numbers<[1], [0], [0], [1], [0, 0, 1, 1], [], []>} : vector<32x32xbf16>, vector<32x64xbf16>, vector<32x64xf32> -> vector<32x64xf32>
    %123 = vector.broadcast %119 : vector<32x1xf32> to vector<32x64xf32>
    %124 = arith.mulf %122, %123 : vector<32x64xf32>
    %125 = vector.extract_strided_slice %98 {offsets = [0, 1], sizes = [32, 1], strides = [1, 1]} : vector<32x2xf32> to vector<32x1xf32>
    %126 = vector.extract_strided_slice %96 {offsets = [1, 0], sizes = [1, 32], strides = [1, 1]} : vector<2x32xf32> to vector<1x32xf32>
    %127 = vector.broadcast %125 : vector<32x1xf32> to vector<32x32xf32>
    %128 = vector.broadcast %126 : vector<1x32xf32> to vector<32x32xf32>
    %129 = arith.addf %127, %128 : vector<32x32xf32>
    %cst_53 = arith.constant 0.000000e+00 : f32
    %130 = vector.broadcast %cst_53 : f32 to vector<32x32xf32>
    %131 = arith.cmpf ogt, %129, %130 : vector<32x32xf32>
    %cst_54 = arith.constant 2.000000e-01 : f32
    %132 = vector.broadcast %cst_54 : f32 to vector<32x32xf32>
    %133 = arith.mulf %132, %129 : vector<32x32xf32>
    %134 = arith.select %131, %129, %133 : vector<32x32xi1>, vector<32x32xf32>
    %135 = arith.addf %134, %2 : vector<32x32xf32>
    %cst_55 = arith.constant dense<0xFF800000> : vector<32xf32>
    %136 = vector.multi_reduction <maximumf>, %135, %cst_55 [1] : vector<32x32xf32> to vector<32xf32>
    %137 = vector.shape_cast %136 : vector<32xf32> to vector<32x1xf32>
    %138 = vector.broadcast %137 : vector<32x1xf32> to vector<32x32xf32>
    %139 = arith.subf %135, %138 : vector<32x32xf32>
    %140 = math.exp %139 : vector<32x32xf32>
    %cst_56 = arith.constant dense<0.000000e+00> : vector<32xf32>
    %141 = vector.multi_reduction <add>, %140, %cst_56 [1] : vector<32x32xf32> to vector<32xf32>
    %142 = vector.shape_cast %141 : vector<32xf32> to vector<32x1xf32>
    %143 = tpu.reciprocal %142 {approx = true} : vector<32x1xf32> -> vector<32x1xf32>
    %cst_57 = arith.constant 5.000000e-01 : f32
    %144 = vector.broadcast %cst_57 : f32 to vector<32x1xf32>
    %145 = arith.mulf %143, %144 : vector<32x1xf32>
    %146 = arith.truncf %140 : vector<32x32xf32> to vector<32x32xbf16>
    %147 = vector.extract_strided_slice %92 {offsets = [0, 64], sizes = [32, 64], strides = [1, 1]} : vector<32x128xbf16> to vector<32x64xbf16>
    %cst_58 = arith.constant dense<0.000000e+00> : vector<32x64xf32>
    %148 = tpu.matmul %146, %147, %cst_58 {dimension_numbers = #tpu.dot_dimension_numbers<[1], [0], [0], [1], [0, 0, 1, 1], [], []>} : vector<32x32xbf16>, vector<32x64xbf16>, vector<32x64xf32> -> vector<32x64xf32>
    %149 = vector.broadcast %145 : vector<32x1xf32> to vector<32x64xf32>
    %150 = arith.mulf %148, %149 : vector<32x64xf32>
    %151 = arith.addf %124, %150 : vector<32x64xf32>
    %c9 = arith.constant 9 : index
    %c0_59 = arith.constant 0 : index
    %152 = vector.load %arg9[%c9, %c0_59] : memref<16x512xf32, #tpu.memory_space<vmem>>, vector<1x64xf32>
    %153 = vector.broadcast %152 : vector<1x64xf32> to vector<32x64xf32>
    %154 = arith.addf %151, %153 : vector<32x64xf32>
    %155 = arith.addf %18, %154 : vector<32x64xf32>
    %cst_60 = arith.constant 0.000000e+00 : f32
    %156 = vector.broadcast %cst_60 : f32 to vector<32x64xf32>
    %157 = arith.maximumf %155, %156 : vector<32x64xf32>
    %158 = arith.truncf %157 : vector<32x64xf32> to vector<32x64xbf16>
    %c2 = arith.constant 2 : index
    %c0_61 = arith.constant 0 : index
    %c0_62 = arith.constant 0 : index
    %159 = vector.load %arg4[%c2, %c0_61, %c0_62] : memref<10x64x128xbf16, #tpu.memory_space<vmem>>, vector<1x64x128xbf16>
    %160 = vector.shape_cast %159 : vector<1x64x128xbf16> to vector<64x128xbf16>
    %cst_63 = arith.constant dense<0.000000e+00> : vector<32x128xf32>
    %161 = tpu.matmul %158, %160, %cst_63 {dimension_numbers = #tpu.dot_dimension_numbers<[1], [0], [0], [1], [0, 0, 1, 1], [], []>} : vector<32x64xbf16>, vector<64x128xbf16>, vector<32x128xf32> -> vector<32x128xf32>
    %162 = arith.truncf %161 : vector<32x128xf32> to vector<32x128xbf16>
    %c2_64 = arith.constant 2 : index
    %c0_65 = arith.constant 0 : index
    %c0_66 = arith.constant 0 : index
    %163 = vector.load %arg5[%c2_64, %c0_65, %c0_66] : memref<8x4x64xbf16, #tpu.memory_space<vmem>>, vector<1x4x64xbf16>
    %164 = vector.shape_cast %163 : vector<1x4x64xbf16> to vector<4x64xbf16>
    %165 = vector.extract_strided_slice %164 {offsets = [0, 0], sizes = [2, 64], strides = [1, 1]} : vector<4x64xbf16> to vector<2x64xbf16>
    %cst_67 = arith.constant dense<0.000000e+00> : vector<2x32xf32>
    %166 = tpu.matmul %165, %158, %cst_67 {dimension_numbers = #tpu.dot_dimension_numbers<[1], [1], [0], [0], [0, 0, 1, 0], [], []>} : vector<2x64xbf16>, vector<32x64xbf16>, vector<2x32xf32> -> vector<2x32xf32>
    %167 = vector.extract_strided_slice %164 {offsets = [2, 0], sizes = [2, 64], strides = [1, 1]} : vector<4x64xbf16> to vector<2x64xbf16>
    %cst_68 = arith.constant dense<0.000000e+00> : vector<32x2xf32>
    %168 = tpu.matmul %158, %167, %cst_68 {dimension_numbers = #tpu.dot_dimension_numbers<[1], [1], [0], [0], [0, 0, 1, 0], [], []>} : vector<32x64xbf16>, vector<2x64xbf16>, vector<32x2xf32> -> vector<32x2xf32>
    %169 = vector.extract_strided_slice %168 {offsets = [0, 0], sizes = [32, 1], strides = [1, 1]} : vector<32x2xf32> to vector<32x1xf32>
    %170 = vector.extract_strided_slice %166 {offsets = [0, 0], sizes = [1, 32], strides = [1, 1]} : vector<2x32xf32> to vector<1x32xf32>
    %171 = vector.broadcast %169 : vector<32x1xf32> to vector<32x32xf32>
    %172 = vector.broadcast %170 : vector<1x32xf32> to vector<32x32xf32>
    %173 = arith.addf %171, %172 : vector<32x32xf32>
    %cst_69 = arith.constant 0.000000e+00 : f32
    %174 = vector.broadcast %cst_69 : f32 to vector<32x32xf32>
    %175 = arith.cmpf ogt, %173, %174 : vector<32x32xf32>
    %cst_70 = arith.constant 2.000000e-01 : f32
    %176 = vector.broadcast %cst_70 : f32 to vector<32x32xf32>
    %177 = arith.mulf %176, %173 : vector<32x32xf32>
    %178 = arith.select %175, %173, %177 : vector<32x32xi1>, vector<32x32xf32>
    %179 = arith.addf %178, %2 : vector<32x32xf32>
    %cst_71 = arith.constant dense<0xFF800000> : vector<32xf32>
    %180 = vector.multi_reduction <maximumf>, %179, %cst_71 [1] : vector<32x32xf32> to vector<32xf32>
    %181 = vector.shape_cast %180 : vector<32xf32> to vector<32x1xf32>
    %182 = vector.broadcast %181 : vector<32x1xf32> to vector<32x32xf32>
    %183 = arith.subf %179, %182 : vector<32x32xf32>
    %184 = math.exp %183 : vector<32x32xf32>
    %cst_72 = arith.constant dense<0.000000e+00> : vector<32xf32>
    %185 = vector.multi_reduction <add>, %184, %cst_72 [1] : vector<32x32xf32> to vector<32xf32>
    %186 = vector.shape_cast %185 : vector<32xf32> to vector<32x1xf32>
    %187 = tpu.reciprocal %186 {approx = true} : vector<32x1xf32> -> vector<32x1xf32>
    %cst_73 = arith.constant 5.000000e-01 : f32
    %188 = vector.broadcast %cst_73 : f32 to vector<32x1xf32>
    %189 = arith.mulf %187, %188 : vector<32x1xf32>
    %190 = arith.truncf %184 : vector<32x32xf32> to vector<32x32xbf16>
    %191 = vector.extract_strided_slice %162 {offsets = [0, 0], sizes = [32, 64], strides = [1, 1]} : vector<32x128xbf16> to vector<32x64xbf16>
    %cst_74 = arith.constant dense<0.000000e+00> : vector<32x64xf32>
    %192 = tpu.matmul %190, %191, %cst_74 {dimension_numbers = #tpu.dot_dimension_numbers<[1], [0], [0], [1], [0, 0, 1, 1], [], []>} : vector<32x32xbf16>, vector<32x64xbf16>, vector<32x64xf32> -> vector<32x64xf32>
    %193 = vector.broadcast %189 : vector<32x1xf32> to vector<32x64xf32>
    %194 = arith.mulf %192, %193 : vector<32x64xf32>
    %195 = vector.extract_strided_slice %168 {offsets = [0, 1], sizes = [32, 1], strides = [1, 1]} : vector<32x2xf32> to vector<32x1xf32>
    %196 = vector.extract_strided_slice %166 {offsets = [1, 0], sizes = [1, 32], strides = [1, 1]} : vector<2x32xf32> to vector<1x32xf32>
    %197 = vector.broadcast %195 : vector<32x1xf32> to vector<32x32xf32>
    %198 = vector.broadcast %196 : vector<1x32xf32> to vector<32x32xf32>
    %199 = arith.addf %197, %198 : vector<32x32xf32>
    %cst_75 = arith.constant 0.000000e+00 : f32
    %200 = vector.broadcast %cst_75 : f32 to vector<32x32xf32>
    %201 = arith.cmpf ogt, %199, %200 : vector<32x32xf32>
    %cst_76 = arith.constant 2.000000e-01 : f32
    %202 = vector.broadcast %cst_76 : f32 to vector<32x32xf32>
    %203 = arith.mulf %202, %199 : vector<32x32xf32>
    %204 = arith.select %201, %199, %203 : vector<32x32xi1>, vector<32x32xf32>
    %205 = arith.addf %204, %2 : vector<32x32xf32>
    %cst_77 = arith.constant dense<0xFF800000> : vector<32xf32>
    %206 = vector.multi_reduction <maximumf>, %205, %cst_77 [1] : vector<32x32xf32> to vector<32xf32>
    %207 = vector.shape_cast %206 : vector<32xf32> to vector<32x1xf32>
    %208 = vector.broadcast %207 : vector<32x1xf32> to vector<32x32xf32>
    %209 = arith.subf %205, %208 : vector<32x32xf32>
    %210 = math.exp %209 : vector<32x32xf32>
    %cst_78 = arith.constant dense<0.000000e+00> : vector<32xf32>
    %211 = vector.multi_reduction <add>, %210, %cst_78 [1] : vector<32x32xf32> to vector<32xf32>
    %212 = vector.shape_cast %211 : vector<32xf32> to vector<32x1xf32>
    %213 = tpu.reciprocal %212 {approx = true} : vector<32x1xf32> -> vector<32x1xf32>
    %cst_79 = arith.constant 5.000000e-01 : f32
    %214 = vector.broadcast %cst_79 : f32 to vector<32x1xf32>
    %215 = arith.mulf %213, %214 : vector<32x1xf32>
    %216 = arith.truncf %210 : vector<32x32xf32> to vector<32x32xbf16>
    %217 = vector.extract_strided_slice %162 {offsets = [0, 64], sizes = [32, 64], strides = [1, 1]} : vector<32x128xbf16> to vector<32x64xbf16>
    %cst_80 = arith.constant dense<0.000000e+00> : vector<32x64xf32>
    %218 = tpu.matmul %216, %217, %cst_80 {dimension_numbers = #tpu.dot_dimension_numbers<[1], [0], [0], [1], [0, 0, 1, 1], [], []>} : vector<32x32xbf16>, vector<32x64xbf16>, vector<32x64xf32> -> vector<32x64xf32>
    %219 = vector.broadcast %215 : vector<32x1xf32> to vector<32x64xf32>
    %220 = arith.mulf %218, %219 : vector<32x64xf32>
    %221 = arith.addf %194, %220 : vector<32x64xf32>
    %c10 = arith.constant 10 : index
    %c0_81 = arith.constant 0 : index
    %222 = vector.load %arg9[%c10, %c0_81] : memref<16x512xf32, #tpu.memory_space<vmem>>, vector<1x64xf32>
    %223 = vector.broadcast %222 : vector<1x64xf32> to vector<32x64xf32>
    %224 = arith.addf %221, %223 : vector<32x64xf32>
    %cst_82 = arith.constant 0.000000e+00 : f32
    %225 = vector.broadcast %cst_82 : f32 to vector<32x64xf32>
    %226 = arith.maximumf %224, %225 : vector<32x64xf32>
    %227 = arith.truncf %226 : vector<32x64xf32> to vector<32x64xbf16>
    %c3 = arith.constant 3 : index
    %c0_83 = arith.constant 0 : index
    %c0_84 = arith.constant 0 : index
    %228 = vector.load %arg4[%c3, %c0_83, %c0_84] : memref<10x64x128xbf16, #tpu.memory_space<vmem>>, vector<1x64x128xbf16>
    %229 = vector.shape_cast %228 : vector<1x64x128xbf16> to vector<64x128xbf16>
    %cst_85 = arith.constant dense<0.000000e+00> : vector<32x128xf32>
    %230 = tpu.matmul %227, %229, %cst_85 {dimension_numbers = #tpu.dot_dimension_numbers<[1], [0], [0], [1], [0, 0, 1, 1], [], []>} : vector<32x64xbf16>, vector<64x128xbf16>, vector<32x128xf32> -> vector<32x128xf32>
    %231 = arith.truncf %230 : vector<32x128xf32> to vector<32x128xbf16>
    %c3_86 = arith.constant 3 : index
    %c0_87 = arith.constant 0 : index
    %c0_88 = arith.constant 0 : index
    %232 = vector.load %arg5[%c3_86, %c0_87, %c0_88] : memref<8x4x64xbf16, #tpu.memory_space<vmem>>, vector<1x4x64xbf16>
    %233 = vector.shape_cast %232 : vector<1x4x64xbf16> to vector<4x64xbf16>
    %234 = vector.extract_strided_slice %233 {offsets = [0, 0], sizes = [2, 64], strides = [1, 1]} : vector<4x64xbf16> to vector<2x64xbf16>
    %cst_89 = arith.constant dense<0.000000e+00> : vector<2x32xf32>
    %235 = tpu.matmul %234, %227, %cst_89 {dimension_numbers = #tpu.dot_dimension_numbers<[1], [1], [0], [0], [0, 0, 1, 0], [], []>} : vector<2x64xbf16>, vector<32x64xbf16>, vector<2x32xf32> -> vector<2x32xf32>
    %236 = vector.extract_strided_slice %233 {offsets = [2, 0], sizes = [2, 64], strides = [1, 1]} : vector<4x64xbf16> to vector<2x64xbf16>
    %cst_90 = arith.constant dense<0.000000e+00> : vector<32x2xf32>
    %237 = tpu.matmul %227, %236, %cst_90 {dimension_numbers = #tpu.dot_dimension_numbers<[1], [1], [0], [0], [0, 0, 1, 0], [], []>} : vector<32x64xbf16>, vector<2x64xbf16>, vector<32x2xf32> -> vector<32x2xf32>
    %238 = vector.extract_strided_slice %237 {offsets = [0, 0], sizes = [32, 1], strides = [1, 1]} : vector<32x2xf32> to vector<32x1xf32>
    %239 = vector.extract_strided_slice %235 {offsets = [0, 0], sizes = [1, 32], strides = [1, 1]} : vector<2x32xf32> to vector<1x32xf32>
    %240 = vector.broadcast %238 : vector<32x1xf32> to vector<32x32xf32>
    %241 = vector.broadcast %239 : vector<1x32xf32> to vector<32x32xf32>
    %242 = arith.addf %240, %241 : vector<32x32xf32>
    %cst_91 = arith.constant 0.000000e+00 : f32
    %243 = vector.broadcast %cst_91 : f32 to vector<32x32xf32>
    %244 = arith.cmpf ogt, %242, %243 : vector<32x32xf32>
    %cst_92 = arith.constant 2.000000e-01 : f32
    %245 = vector.broadcast %cst_92 : f32 to vector<32x32xf32>
    %246 = arith.mulf %245, %242 : vector<32x32xf32>
    %247 = arith.select %244, %242, %246 : vector<32x32xi1>, vector<32x32xf32>
    %248 = arith.addf %247, %2 : vector<32x32xf32>
    %cst_93 = arith.constant dense<0xFF800000> : vector<32xf32>
    %249 = vector.multi_reduction <maximumf>, %248, %cst_93 [1] : vector<32x32xf32> to vector<32xf32>
    %250 = vector.shape_cast %249 : vector<32xf32> to vector<32x1xf32>
    %251 = vector.broadcast %250 : vector<32x1xf32> to vector<32x32xf32>
    %252 = arith.subf %248, %251 : vector<32x32xf32>
    %253 = math.exp %252 : vector<32x32xf32>
    %cst_94 = arith.constant dense<0.000000e+00> : vector<32xf32>
    %254 = vector.multi_reduction <add>, %253, %cst_94 [1] : vector<32x32xf32> to vector<32xf32>
    %255 = vector.shape_cast %254 : vector<32xf32> to vector<32x1xf32>
    %256 = tpu.reciprocal %255 {approx = true} : vector<32x1xf32> -> vector<32x1xf32>
    %cst_95 = arith.constant 5.000000e-01 : f32
    %257 = vector.broadcast %cst_95 : f32 to vector<32x1xf32>
    %258 = arith.mulf %256, %257 : vector<32x1xf32>
    %259 = arith.truncf %253 : vector<32x32xf32> to vector<32x32xbf16>
    %260 = vector.extract_strided_slice %231 {offsets = [0, 0], sizes = [32, 64], strides = [1, 1]} : vector<32x128xbf16> to vector<32x64xbf16>
    %cst_96 = arith.constant dense<0.000000e+00> : vector<32x64xf32>
    %261 = tpu.matmul %259, %260, %cst_96 {dimension_numbers = #tpu.dot_dimension_numbers<[1], [0], [0], [1], [0, 0, 1, 1], [], []>} : vector<32x32xbf16>, vector<32x64xbf16>, vector<32x64xf32> -> vector<32x64xf32>
    %262 = vector.broadcast %258 : vector<32x1xf32> to vector<32x64xf32>
    %263 = arith.mulf %261, %262 : vector<32x64xf32>
    %264 = vector.extract_strided_slice %237 {offsets = [0, 1], sizes = [32, 1], strides = [1, 1]} : vector<32x2xf32> to vector<32x1xf32>
    %265 = vector.extract_strided_slice %235 {offsets = [1, 0], sizes = [1, 32], strides = [1, 1]} : vector<2x32xf32> to vector<1x32xf32>
    %266 = vector.broadcast %264 : vector<32x1xf32> to vector<32x32xf32>
    %267 = vector.broadcast %265 : vector<1x32xf32> to vector<32x32xf32>
    %268 = arith.addf %266, %267 : vector<32x32xf32>
    %cst_97 = arith.constant 0.000000e+00 : f32
    %269 = vector.broadcast %cst_97 : f32 to vector<32x32xf32>
    %270 = arith.cmpf ogt, %268, %269 : vector<32x32xf32>
    %cst_98 = arith.constant 2.000000e-01 : f32
    %271 = vector.broadcast %cst_98 : f32 to vector<32x32xf32>
    %272 = arith.mulf %271, %268 : vector<32x32xf32>
    %273 = arith.select %270, %268, %272 : vector<32x32xi1>, vector<32x32xf32>
    %274 = arith.addf %273, %2 : vector<32x32xf32>
    %cst_99 = arith.constant dense<0xFF800000> : vector<32xf32>
    %275 = vector.multi_reduction <maximumf>, %274, %cst_99 [1] : vector<32x32xf32> to vector<32xf32>
    %276 = vector.shape_cast %275 : vector<32xf32> to vector<32x1xf32>
    %277 = vector.broadcast %276 : vector<32x1xf32> to vector<32x32xf32>
    %278 = arith.subf %274, %277 : vector<32x32xf32>
    %279 = math.exp %278 : vector<32x32xf32>
    %cst_100 = arith.constant dense<0.000000e+00> : vector<32xf32>
    %280 = vector.multi_reduction <add>, %279, %cst_100 [1] : vector<32x32xf32> to vector<32xf32>
    %281 = vector.shape_cast %280 : vector<32xf32> to vector<32x1xf32>
    %282 = tpu.reciprocal %281 {approx = true} : vector<32x1xf32> -> vector<32x1xf32>
    %cst_101 = arith.constant 5.000000e-01 : f32
    %283 = vector.broadcast %cst_101 : f32 to vector<32x1xf32>
    %284 = arith.mulf %282, %283 : vector<32x1xf32>
    %285 = arith.truncf %279 : vector<32x32xf32> to vector<32x32xbf16>
    %286 = vector.extract_strided_slice %231 {offsets = [0, 64], sizes = [32, 64], strides = [1, 1]} : vector<32x128xbf16> to vector<32x64xbf16>
    %cst_102 = arith.constant dense<0.000000e+00> : vector<32x64xf32>
    %287 = tpu.matmul %285, %286, %cst_102 {dimension_numbers = #tpu.dot_dimension_numbers<[1], [0], [0], [1], [0, 0, 1, 1], [], []>} : vector<32x32xbf16>, vector<32x64xbf16>, vector<32x64xf32> -> vector<32x64xf32>
    %288 = vector.broadcast %284 : vector<32x1xf32> to vector<32x64xf32>
    %289 = arith.mulf %287, %288 : vector<32x64xf32>
    %290 = arith.addf %263, %289 : vector<32x64xf32>
    %c11 = arith.constant 11 : index
    %c0_103 = arith.constant 0 : index
    %291 = vector.load %arg9[%c11, %c0_103] : memref<16x512xf32, #tpu.memory_space<vmem>>, vector<1x64xf32>
    %292 = vector.broadcast %291 : vector<1x64xf32> to vector<32x64xf32>
    %293 = arith.addf %290, %292 : vector<32x64xf32>
    %294 = arith.addf %157, %293 : vector<32x64xf32>
    %cst_104 = arith.constant 0.000000e+00 : f32
    %295 = vector.broadcast %cst_104 : f32 to vector<32x64xf32>
    %296 = arith.maximumf %294, %295 : vector<32x64xf32>
    %297 = arith.truncf %296 : vector<32x64xf32> to vector<32x64xbf16>
    %c4 = arith.constant 4 : index
    %c0_105 = arith.constant 0 : index
    %c0_106 = arith.constant 0 : index
    %298 = vector.load %arg4[%c4, %c0_105, %c0_106] : memref<10x64x128xbf16, #tpu.memory_space<vmem>>, vector<1x64x128xbf16>
    %299 = vector.shape_cast %298 : vector<1x64x128xbf16> to vector<64x128xbf16>
    %cst_107 = arith.constant dense<0.000000e+00> : vector<32x128xf32>
    %300 = tpu.matmul %297, %299, %cst_107 {dimension_numbers = #tpu.dot_dimension_numbers<[1], [0], [0], [1], [0, 0, 1, 1], [], []>} : vector<32x64xbf16>, vector<64x128xbf16>, vector<32x128xf32> -> vector<32x128xf32>
    %301 = arith.truncf %300 : vector<32x128xf32> to vector<32x128xbf16>
    %c4_108 = arith.constant 4 : index
    %c0_109 = arith.constant 0 : index
    %c0_110 = arith.constant 0 : index
    %302 = vector.load %arg5[%c4_108, %c0_109, %c0_110] : memref<8x4x64xbf16, #tpu.memory_space<vmem>>, vector<1x4x64xbf16>
    %303 = vector.shape_cast %302 : vector<1x4x64xbf16> to vector<4x64xbf16>
    %304 = vector.extract_strided_slice %303 {offsets = [0, 0], sizes = [2, 64], strides = [1, 1]} : vector<4x64xbf16> to vector<2x64xbf16>
    %cst_111 = arith.constant dense<0.000000e+00> : vector<2x32xf32>
    %305 = tpu.matmul %304, %297, %cst_111 {dimension_numbers = #tpu.dot_dimension_numbers<[1], [1], [0], [0], [0, 0, 1, 0], [], []>} : vector<2x64xbf16>, vector<32x64xbf16>, vector<2x32xf32> -> vector<2x32xf32>
    %306 = vector.extract_strided_slice %303 {offsets = [2, 0], sizes = [2, 64], strides = [1, 1]} : vector<4x64xbf16> to vector<2x64xbf16>
    %cst_112 = arith.constant dense<0.000000e+00> : vector<32x2xf32>
    %307 = tpu.matmul %297, %306, %cst_112 {dimension_numbers = #tpu.dot_dimension_numbers<[1], [1], [0], [0], [0, 0, 1, 0], [], []>} : vector<32x64xbf16>, vector<2x64xbf16>, vector<32x2xf32> -> vector<32x2xf32>
    %308 = vector.extract_strided_slice %307 {offsets = [0, 0], sizes = [32, 1], strides = [1, 1]} : vector<32x2xf32> to vector<32x1xf32>
    %309 = vector.extract_strided_slice %305 {offsets = [0, 0], sizes = [1, 32], strides = [1, 1]} : vector<2x32xf32> to vector<1x32xf32>
    %310 = vector.broadcast %308 : vector<32x1xf32> to vector<32x32xf32>
    %311 = vector.broadcast %309 : vector<1x32xf32> to vector<32x32xf32>
    %312 = arith.addf %310, %311 : vector<32x32xf32>
    %cst_113 = arith.constant 0.000000e+00 : f32
    %313 = vector.broadcast %cst_113 : f32 to vector<32x32xf32>
    %314 = arith.cmpf ogt, %312, %313 : vector<32x32xf32>
    %cst_114 = arith.constant 2.000000e-01 : f32
    %315 = vector.broadcast %cst_114 : f32 to vector<32x32xf32>
    %316 = arith.mulf %315, %312 : vector<32x32xf32>
    %317 = arith.select %314, %312, %316 : vector<32x32xi1>, vector<32x32xf32>
    %318 = arith.addf %317, %2 : vector<32x32xf32>
    %cst_115 = arith.constant dense<0xFF800000> : vector<32xf32>
    %319 = vector.multi_reduction <maximumf>, %318, %cst_115 [1] : vector<32x32xf32> to vector<32xf32>
    %320 = vector.shape_cast %319 : vector<32xf32> to vector<32x1xf32>
    %321 = vector.broadcast %320 : vector<32x1xf32> to vector<32x32xf32>
    %322 = arith.subf %318, %321 : vector<32x32xf32>
    %323 = math.exp %322 : vector<32x32xf32>
    %cst_116 = arith.constant dense<0.000000e+00> : vector<32xf32>
    %324 = vector.multi_reduction <add>, %323, %cst_116 [1] : vector<32x32xf32> to vector<32xf32>
    %325 = vector.shape_cast %324 : vector<32xf32> to vector<32x1xf32>
    %326 = tpu.reciprocal %325 {approx = true} : vector<32x1xf32> -> vector<32x1xf32>
    %cst_117 = arith.constant 5.000000e-01 : f32
    %327 = vector.broadcast %cst_117 : f32 to vector<32x1xf32>
    %328 = arith.mulf %326, %327 : vector<32x1xf32>
    %329 = arith.truncf %323 : vector<32x32xf32> to vector<32x32xbf16>
    %330 = vector.extract_strided_slice %301 {offsets = [0, 0], sizes = [32, 64], strides = [1, 1]} : vector<32x128xbf16> to vector<32x64xbf16>
    %cst_118 = arith.constant dense<0.000000e+00> : vector<32x64xf32>
    %331 = tpu.matmul %329, %330, %cst_118 {dimension_numbers = #tpu.dot_dimension_numbers<[1], [0], [0], [1], [0, 0, 1, 1], [], []>} : vector<32x32xbf16>, vector<32x64xbf16>, vector<32x64xf32> -> vector<32x64xf32>
    %332 = vector.broadcast %328 : vector<32x1xf32> to vector<32x64xf32>
    %333 = arith.mulf %331, %332 : vector<32x64xf32>
    %334 = vector.extract_strided_slice %307 {offsets = [0, 1], sizes = [32, 1], strides = [1, 1]} : vector<32x2xf32> to vector<32x1xf32>
    %335 = vector.extract_strided_slice %305 {offsets = [1, 0], sizes = [1, 32], strides = [1, 1]} : vector<2x32xf32> to vector<1x32xf32>
    %336 = vector.broadcast %334 : vector<32x1xf32> to vector<32x32xf32>
    %337 = vector.broadcast %335 : vector<1x32xf32> to vector<32x32xf32>
    %338 = arith.addf %336, %337 : vector<32x32xf32>
    %cst_119 = arith.constant 0.000000e+00 : f32
    %339 = vector.broadcast %cst_119 : f32 to vector<32x32xf32>
    %340 = arith.cmpf ogt, %338, %339 : vector<32x32xf32>
    %cst_120 = arith.constant 2.000000e-01 : f32
    %341 = vector.broadcast %cst_120 : f32 to vector<32x32xf32>
    %342 = arith.mulf %341, %338 : vector<32x32xf32>
    %343 = arith.select %340, %338, %342 : vector<32x32xi1>, vector<32x32xf32>
    %344 = arith.addf %343, %2 : vector<32x32xf32>
    %cst_121 = arith.constant dense<0xFF800000> : vector<32xf32>
    %345 = vector.multi_reduction <maximumf>, %344, %cst_121 [1] : vector<32x32xf32> to vector<32xf32>
    %346 = vector.shape_cast %345 : vector<32xf32> to vector<32x1xf32>
    %347 = vector.broadcast %346 : vector<32x1xf32> to vector<32x32xf32>
    %348 = arith.subf %344, %347 : vector<32x32xf32>
    %349 = math.exp %348 : vector<32x32xf32>
    %cst_122 = arith.constant dense<0.000000e+00> : vector<32xf32>
    %350 = vector.multi_reduction <add>, %349, %cst_122 [1] : vector<32x32xf32> to vector<32xf32>
    %351 = vector.shape_cast %350 : vector<32xf32> to vector<32x1xf32>
    %352 = tpu.reciprocal %351 {approx = true} : vector<32x1xf32> -> vector<32x1xf32>
    %cst_123 = arith.constant 5.000000e-01 : f32
    %353 = vector.broadcast %cst_123 : f32 to vector<32x1xf32>
    %354 = arith.mulf %352, %353 : vector<32x1xf32>
    %355 = arith.truncf %349 : vector<32x32xf32> to vector<32x32xbf16>
    %356 = vector.extract_strided_slice %301 {offsets = [0, 64], sizes = [32, 64], strides = [1, 1]} : vector<32x128xbf16> to vector<32x64xbf16>
    %cst_124 = arith.constant dense<0.000000e+00> : vector<32x64xf32>
    %357 = tpu.matmul %355, %356, %cst_124 {dimension_numbers = #tpu.dot_dimension_numbers<[1], [0], [0], [1], [0, 0, 1, 1], [], []>} : vector<32x32xbf16>, vector<32x64xbf16>, vector<32x64xf32> -> vector<32x64xf32>
    %358 = vector.broadcast %354 : vector<32x1xf32> to vector<32x64xf32>
    %359 = arith.mulf %357, %358 : vector<32x64xf32>
    %360 = arith.addf %333, %359 : vector<32x64xf32>
    %c12 = arith.constant 12 : index
    %c0_125 = arith.constant 0 : index
    %361 = vector.load %arg9[%c12, %c0_125] : memref<16x512xf32, #tpu.memory_space<vmem>>, vector<1x64xf32>
    %362 = vector.broadcast %361 : vector<1x64xf32> to vector<32x64xf32>
    %363 = arith.addf %360, %362 : vector<32x64xf32>
    %cst_126 = arith.constant 0.000000e+00 : f32
    %364 = vector.broadcast %cst_126 : f32 to vector<32x64xf32>
    %365 = arith.maximumf %363, %364 : vector<32x64xf32>
    %366 = arith.truncf %365 : vector<32x64xf32> to vector<32x64xbf16>
    %c5 = arith.constant 5 : index
    %c0_127 = arith.constant 0 : index
    %c0_128 = arith.constant 0 : index
    %367 = vector.load %arg4[%c5, %c0_127, %c0_128] : memref<10x64x128xbf16, #tpu.memory_space<vmem>>, vector<1x64x128xbf16>
    %368 = vector.shape_cast %367 : vector<1x64x128xbf16> to vector<64x128xbf16>
    %cst_129 = arith.constant dense<0.000000e+00> : vector<32x128xf32>
    %369 = tpu.matmul %366, %368, %cst_129 {dimension_numbers = #tpu.dot_dimension_numbers<[1], [0], [0], [1], [0, 0, 1, 1], [], []>} : vector<32x64xbf16>, vector<64x128xbf16>, vector<32x128xf32> -> vector<32x128xf32>
    %370 = arith.truncf %369 : vector<32x128xf32> to vector<32x128xbf16>
    %c5_130 = arith.constant 5 : index
    %c0_131 = arith.constant 0 : index
    %c0_132 = arith.constant 0 : index
    %371 = vector.load %arg5[%c5_130, %c0_131, %c0_132] : memref<8x4x64xbf16, #tpu.memory_space<vmem>>, vector<1x4x64xbf16>
    %372 = vector.shape_cast %371 : vector<1x4x64xbf16> to vector<4x64xbf16>
    %373 = vector.extract_strided_slice %372 {offsets = [0, 0], sizes = [2, 64], strides = [1, 1]} : vector<4x64xbf16> to vector<2x64xbf16>
    %cst_133 = arith.constant dense<0.000000e+00> : vector<2x32xf32>
    %374 = tpu.matmul %373, %366, %cst_133 {dimension_numbers = #tpu.dot_dimension_numbers<[1], [1], [0], [0], [0, 0, 1, 0], [], []>} : vector<2x64xbf16>, vector<32x64xbf16>, vector<2x32xf32> -> vector<2x32xf32>
    %375 = vector.extract_strided_slice %372 {offsets = [2, 0], sizes = [2, 64], strides = [1, 1]} : vector<4x64xbf16> to vector<2x64xbf16>
    %cst_134 = arith.constant dense<0.000000e+00> : vector<32x2xf32>
    %376 = tpu.matmul %366, %375, %cst_134 {dimension_numbers = #tpu.dot_dimension_numbers<[1], [1], [0], [0], [0, 0, 1, 0], [], []>} : vector<32x64xbf16>, vector<2x64xbf16>, vector<32x2xf32> -> vector<32x2xf32>
    %377 = vector.extract_strided_slice %376 {offsets = [0, 0], sizes = [32, 1], strides = [1, 1]} : vector<32x2xf32> to vector<32x1xf32>
    %378 = vector.extract_strided_slice %374 {offsets = [0, 0], sizes = [1, 32], strides = [1, 1]} : vector<2x32xf32> to vector<1x32xf32>
    %379 = vector.broadcast %377 : vector<32x1xf32> to vector<32x32xf32>
    %380 = vector.broadcast %378 : vector<1x32xf32> to vector<32x32xf32>
    %381 = arith.addf %379, %380 : vector<32x32xf32>
    %cst_135 = arith.constant 0.000000e+00 : f32
    %382 = vector.broadcast %cst_135 : f32 to vector<32x32xf32>
    %383 = arith.cmpf ogt, %381, %382 : vector<32x32xf32>
    %cst_136 = arith.constant 2.000000e-01 : f32
    %384 = vector.broadcast %cst_136 : f32 to vector<32x32xf32>
    %385 = arith.mulf %384, %381 : vector<32x32xf32>
    %386 = arith.select %383, %381, %385 : vector<32x32xi1>, vector<32x32xf32>
    %387 = arith.addf %386, %2 : vector<32x32xf32>
    %cst_137 = arith.constant dense<0xFF800000> : vector<32xf32>
    %388 = vector.multi_reduction <maximumf>, %387, %cst_137 [1] : vector<32x32xf32> to vector<32xf32>
    %389 = vector.shape_cast %388 : vector<32xf32> to vector<32x1xf32>
    %390 = vector.broadcast %389 : vector<32x1xf32> to vector<32x32xf32>
    %391 = arith.subf %387, %390 : vector<32x32xf32>
    %392 = math.exp %391 : vector<32x32xf32>
    %cst_138 = arith.constant dense<0.000000e+00> : vector<32xf32>
    %393 = vector.multi_reduction <add>, %392, %cst_138 [1] : vector<32x32xf32> to vector<32xf32>
    %394 = vector.shape_cast %393 : vector<32xf32> to vector<32x1xf32>
    %395 = tpu.reciprocal %394 {approx = true} : vector<32x1xf32> -> vector<32x1xf32>
    %cst_139 = arith.constant 5.000000e-01 : f32
    %396 = vector.broadcast %cst_139 : f32 to vector<32x1xf32>
    %397 = arith.mulf %395, %396 : vector<32x1xf32>
    %398 = arith.truncf %392 : vector<32x32xf32> to vector<32x32xbf16>
    %399 = vector.extract_strided_slice %370 {offsets = [0, 0], sizes = [32, 64], strides = [1, 1]} : vector<32x128xbf16> to vector<32x64xbf16>
    %cst_140 = arith.constant dense<0.000000e+00> : vector<32x64xf32>
    %400 = tpu.matmul %398, %399, %cst_140 {dimension_numbers = #tpu.dot_dimension_numbers<[1], [0], [0], [1], [0, 0, 1, 1], [], []>} : vector<32x32xbf16>, vector<32x64xbf16>, vector<32x64xf32> -> vector<32x64xf32>
    %401 = vector.broadcast %397 : vector<32x1xf32> to vector<32x64xf32>
    %402 = arith.mulf %400, %401 : vector<32x64xf32>
    %403 = vector.extract_strided_slice %376 {offsets = [0, 1], sizes = [32, 1], strides = [1, 1]} : vector<32x2xf32> to vector<32x1xf32>
    %404 = vector.extract_strided_slice %374 {offsets = [1, 0], sizes = [1, 32], strides = [1, 1]} : vector<2x32xf32> to vector<1x32xf32>
    %405 = vector.broadcast %403 : vector<32x1xf32> to vector<32x32xf32>
    %406 = vector.broadcast %404 : vector<1x32xf32> to vector<32x32xf32>
    %407 = arith.addf %405, %406 : vector<32x32xf32>
    %cst_141 = arith.constant 0.000000e+00 : f32
    %408 = vector.broadcast %cst_141 : f32 to vector<32x32xf32>
    %409 = arith.cmpf ogt, %407, %408 : vector<32x32xf32>
    %cst_142 = arith.constant 2.000000e-01 : f32
    %410 = vector.broadcast %cst_142 : f32 to vector<32x32xf32>
    %411 = arith.mulf %410, %407 : vector<32x32xf32>
    %412 = arith.select %409, %407, %411 : vector<32x32xi1>, vector<32x32xf32>
    %413 = arith.addf %412, %2 : vector<32x32xf32>
    %cst_143 = arith.constant dense<0xFF800000> : vector<32xf32>
    %414 = vector.multi_reduction <maximumf>, %413, %cst_143 [1] : vector<32x32xf32> to vector<32xf32>
    %415 = vector.shape_cast %414 : vector<32xf32> to vector<32x1xf32>
    %416 = vector.broadcast %415 : vector<32x1xf32> to vector<32x32xf32>
    %417 = arith.subf %413, %416 : vector<32x32xf32>
    %418 = math.exp %417 : vector<32x32xf32>
    %cst_144 = arith.constant dense<0.000000e+00> : vector<32xf32>
    %419 = vector.multi_reduction <add>, %418, %cst_144 [1] : vector<32x32xf32> to vector<32xf32>
    %420 = vector.shape_cast %419 : vector<32xf32> to vector<32x1xf32>
    %421 = tpu.reciprocal %420 {approx = true} : vector<32x1xf32> -> vector<32x1xf32>
    %cst_145 = arith.constant 5.000000e-01 : f32
    %422 = vector.broadcast %cst_145 : f32 to vector<32x1xf32>
    %423 = arith.mulf %421, %422 : vector<32x1xf32>
    %424 = arith.truncf %418 : vector<32x32xf32> to vector<32x32xbf16>
    %425 = vector.extract_strided_slice %370 {offsets = [0, 64], sizes = [32, 64], strides = [1, 1]} : vector<32x128xbf16> to vector<32x64xbf16>
    %cst_146 = arith.constant dense<0.000000e+00> : vector<32x64xf32>
    %426 = tpu.matmul %424, %425, %cst_146 {dimension_numbers = #tpu.dot_dimension_numbers<[1], [0], [0], [1], [0, 0, 1, 1], [], []>} : vector<32x32xbf16>, vector<32x64xbf16>, vector<32x64xf32> -> vector<32x64xf32>
    %427 = vector.broadcast %423 : vector<32x1xf32> to vector<32x64xf32>
    %428 = arith.mulf %426, %427 : vector<32x64xf32>
    %429 = arith.addf %402, %428 : vector<32x64xf32>
    %c13 = arith.constant 13 : index
    %c0_147 = arith.constant 0 : index
    %430 = vector.load %arg9[%c13, %c0_147] : memref<16x512xf32, #tpu.memory_space<vmem>>, vector<1x64xf32>
    %431 = vector.broadcast %430 : vector<1x64xf32> to vector<32x64xf32>
    %432 = arith.addf %429, %431 : vector<32x64xf32>
    %433 = arith.addf %296, %432 : vector<32x64xf32>
    %cst_148 = arith.constant 0.000000e+00 : f32
    %434 = vector.broadcast %cst_148 : f32 to vector<32x64xf32>
    %435 = arith.maximumf %433, %434 : vector<32x64xf32>
    %436 = arith.truncf %435 : vector<32x64xf32> to vector<32x64xbf16>
    %c6 = arith.constant 6 : index
    %c0_149 = arith.constant 0 : index
    %c0_150 = arith.constant 0 : index
    %437 = vector.load %arg4[%c6, %c0_149, %c0_150] : memref<10x64x128xbf16, #tpu.memory_space<vmem>>, vector<1x64x128xbf16>
    %438 = vector.shape_cast %437 : vector<1x64x128xbf16> to vector<64x128xbf16>
    %cst_151 = arith.constant dense<0.000000e+00> : vector<32x128xf32>
    %439 = tpu.matmul %436, %438, %cst_151 {dimension_numbers = #tpu.dot_dimension_numbers<[1], [0], [0], [1], [0, 0, 1, 1], [], []>} : vector<32x64xbf16>, vector<64x128xbf16>, vector<32x128xf32> -> vector<32x128xf32>
    %440 = arith.truncf %439 : vector<32x128xf32> to vector<32x128xbf16>
    %c6_152 = arith.constant 6 : index
    %c0_153 = arith.constant 0 : index
    %c0_154 = arith.constant 0 : index
    %441 = vector.load %arg5[%c6_152, %c0_153, %c0_154] : memref<8x4x64xbf16, #tpu.memory_space<vmem>>, vector<1x4x64xbf16>
    %442 = vector.shape_cast %441 : vector<1x4x64xbf16> to vector<4x64xbf16>
    %443 = vector.extract_strided_slice %442 {offsets = [0, 0], sizes = [2, 64], strides = [1, 1]} : vector<4x64xbf16> to vector<2x64xbf16>
    %cst_155 = arith.constant dense<0.000000e+00> : vector<2x32xf32>
    %444 = tpu.matmul %443, %436, %cst_155 {dimension_numbers = #tpu.dot_dimension_numbers<[1], [1], [0], [0], [0, 0, 1, 0], [], []>} : vector<2x64xbf16>, vector<32x64xbf16>, vector<2x32xf32> -> vector<2x32xf32>
    %445 = vector.extract_strided_slice %442 {offsets = [2, 0], sizes = [2, 64], strides = [1, 1]} : vector<4x64xbf16> to vector<2x64xbf16>
    %cst_156 = arith.constant dense<0.000000e+00> : vector<32x2xf32>
    %446 = tpu.matmul %436, %445, %cst_156 {dimension_numbers = #tpu.dot_dimension_numbers<[1], [1], [0], [0], [0, 0, 1, 0], [], []>} : vector<32x64xbf16>, vector<2x64xbf16>, vector<32x2xf32> -> vector<32x2xf32>
    %447 = vector.extract_strided_slice %446 {offsets = [0, 0], sizes = [32, 1], strides = [1, 1]} : vector<32x2xf32> to vector<32x1xf32>
    %448 = vector.extract_strided_slice %444 {offsets = [0, 0], sizes = [1, 32], strides = [1, 1]} : vector<2x32xf32> to vector<1x32xf32>
    %449 = vector.broadcast %447 : vector<32x1xf32> to vector<32x32xf32>
    %450 = vector.broadcast %448 : vector<1x32xf32> to vector<32x32xf32>
    %451 = arith.addf %449, %450 : vector<32x32xf32>
    %cst_157 = arith.constant 0.000000e+00 : f32
    %452 = vector.broadcast %cst_157 : f32 to vector<32x32xf32>
    %453 = arith.cmpf ogt, %451, %452 : vector<32x32xf32>
    %cst_158 = arith.constant 2.000000e-01 : f32
    %454 = vector.broadcast %cst_158 : f32 to vector<32x32xf32>
    %455 = arith.mulf %454, %451 : vector<32x32xf32>
    %456 = arith.select %453, %451, %455 : vector<32x32xi1>, vector<32x32xf32>
    %457 = arith.addf %456, %2 : vector<32x32xf32>
    %cst_159 = arith.constant dense<0xFF800000> : vector<32xf32>
    %458 = vector.multi_reduction <maximumf>, %457, %cst_159 [1] : vector<32x32xf32> to vector<32xf32>
    %459 = vector.shape_cast %458 : vector<32xf32> to vector<32x1xf32>
    %460 = vector.broadcast %459 : vector<32x1xf32> to vector<32x32xf32>
    %461 = arith.subf %457, %460 : vector<32x32xf32>
    %462 = math.exp %461 : vector<32x32xf32>
    %cst_160 = arith.constant dense<0.000000e+00> : vector<32xf32>
    %463 = vector.multi_reduction <add>, %462, %cst_160 [1] : vector<32x32xf32> to vector<32xf32>
    %464 = vector.shape_cast %463 : vector<32xf32> to vector<32x1xf32>
    %465 = tpu.reciprocal %464 {approx = true} : vector<32x1xf32> -> vector<32x1xf32>
    %cst_161 = arith.constant 5.000000e-01 : f32
    %466 = vector.broadcast %cst_161 : f32 to vector<32x1xf32>
    %467 = arith.mulf %465, %466 : vector<32x1xf32>
    %468 = arith.truncf %462 : vector<32x32xf32> to vector<32x32xbf16>
    %469 = vector.extract_strided_slice %440 {offsets = [0, 0], sizes = [32, 64], strides = [1, 1]} : vector<32x128xbf16> to vector<32x64xbf16>
    %cst_162 = arith.constant dense<0.000000e+00> : vector<32x64xf32>
    %470 = tpu.matmul %468, %469, %cst_162 {dimension_numbers = #tpu.dot_dimension_numbers<[1], [0], [0], [1], [0, 0, 1, 1], [], []>} : vector<32x32xbf16>, vector<32x64xbf16>, vector<32x64xf32> -> vector<32x64xf32>
    %471 = vector.broadcast %467 : vector<32x1xf32> to vector<32x64xf32>
    %472 = arith.mulf %470, %471 : vector<32x64xf32>
    %473 = vector.extract_strided_slice %446 {offsets = [0, 1], sizes = [32, 1], strides = [1, 1]} : vector<32x2xf32> to vector<32x1xf32>
    %474 = vector.extract_strided_slice %444 {offsets = [1, 0], sizes = [1, 32], strides = [1, 1]} : vector<2x32xf32> to vector<1x32xf32>
    %475 = vector.broadcast %473 : vector<32x1xf32> to vector<32x32xf32>
    %476 = vector.broadcast %474 : vector<1x32xf32> to vector<32x32xf32>
    %477 = arith.addf %475, %476 : vector<32x32xf32>
    %cst_163 = arith.constant 0.000000e+00 : f32
    %478 = vector.broadcast %cst_163 : f32 to vector<32x32xf32>
    %479 = arith.cmpf ogt, %477, %478 : vector<32x32xf32>
    %cst_164 = arith.constant 2.000000e-01 : f32
    %480 = vector.broadcast %cst_164 : f32 to vector<32x32xf32>
    %481 = arith.mulf %480, %477 : vector<32x32xf32>
    %482 = arith.select %479, %477, %481 : vector<32x32xi1>, vector<32x32xf32>
    %483 = arith.addf %482, %2 : vector<32x32xf32>
    %cst_165 = arith.constant dense<0xFF800000> : vector<32xf32>
    %484 = vector.multi_reduction <maximumf>, %483, %cst_165 [1] : vector<32x32xf32> to vector<32xf32>
    %485 = vector.shape_cast %484 : vector<32xf32> to vector<32x1xf32>
    %486 = vector.broadcast %485 : vector<32x1xf32> to vector<32x32xf32>
    %487 = arith.subf %483, %486 : vector<32x32xf32>
    %488 = math.exp %487 : vector<32x32xf32>
    %cst_166 = arith.constant dense<0.000000e+00> : vector<32xf32>
    %489 = vector.multi_reduction <add>, %488, %cst_166 [1] : vector<32x32xf32> to vector<32xf32>
    %490 = vector.shape_cast %489 : vector<32xf32> to vector<32x1xf32>
    %491 = tpu.reciprocal %490 {approx = true} : vector<32x1xf32> -> vector<32x1xf32>
    %cst_167 = arith.constant 5.000000e-01 : f32
    %492 = vector.broadcast %cst_167 : f32 to vector<32x1xf32>
    %493 = arith.mulf %491, %492 : vector<32x1xf32>
    %494 = arith.truncf %488 : vector<32x32xf32> to vector<32x32xbf16>
    %495 = vector.extract_strided_slice %440 {offsets = [0, 64], sizes = [32, 64], strides = [1, 1]} : vector<32x128xbf16> to vector<32x64xbf16>
    %cst_168 = arith.constant dense<0.000000e+00> : vector<32x64xf32>
    %496 = tpu.matmul %494, %495, %cst_168 {dimension_numbers = #tpu.dot_dimension_numbers<[1], [0], [0], [1], [0, 0, 1, 1], [], []>} : vector<32x32xbf16>, vector<32x64xbf16>, vector<32x64xf32> -> vector<32x64xf32>
    %497 = vector.broadcast %493 : vector<32x1xf32> to vector<32x64xf32>
    %498 = arith.mulf %496, %497 : vector<32x64xf32>
    %499 = arith.addf %472, %498 : vector<32x64xf32>
    %c14 = arith.constant 14 : index
    %c0_169 = arith.constant 0 : index
    %500 = vector.load %arg9[%c14, %c0_169] : memref<16x512xf32, #tpu.memory_space<vmem>>, vector<1x64xf32>
    %501 = vector.broadcast %500 : vector<1x64xf32> to vector<32x64xf32>
    %502 = arith.addf %499, %501 : vector<32x64xf32>
    %cst_170 = arith.constant 0.000000e+00 : f32
    %503 = vector.broadcast %cst_170 : f32 to vector<32x64xf32>
    %504 = arith.maximumf %502, %503 : vector<32x64xf32>
    %505 = arith.truncf %504 : vector<32x64xf32> to vector<32x64xbf16>
    %c7 = arith.constant 7 : index
    %c0_171 = arith.constant 0 : index
    %c0_172 = arith.constant 0 : index
    %506 = vector.load %arg4[%c7, %c0_171, %c0_172] : memref<10x64x128xbf16, #tpu.memory_space<vmem>>, vector<1x64x128xbf16>
    %507 = vector.shape_cast %506 : vector<1x64x128xbf16> to vector<64x128xbf16>
    %cst_173 = arith.constant dense<0.000000e+00> : vector<32x128xf32>
    %508 = tpu.matmul %505, %507, %cst_173 {dimension_numbers = #tpu.dot_dimension_numbers<[1], [0], [0], [1], [0, 0, 1, 1], [], []>} : vector<32x64xbf16>, vector<64x128xbf16>, vector<32x128xf32> -> vector<32x128xf32>
    %509 = arith.truncf %508 : vector<32x128xf32> to vector<32x128xbf16>
    %c7_174 = arith.constant 7 : index
    %c0_175 = arith.constant 0 : index
    %c0_176 = arith.constant 0 : index
    %510 = vector.load %arg5[%c7_174, %c0_175, %c0_176] : memref<8x4x64xbf16, #tpu.memory_space<vmem>>, vector<1x4x64xbf16>
    %511 = vector.shape_cast %510 : vector<1x4x64xbf16> to vector<4x64xbf16>
    %512 = vector.extract_strided_slice %511 {offsets = [0, 0], sizes = [2, 64], strides = [1, 1]} : vector<4x64xbf16> to vector<2x64xbf16>
    %cst_177 = arith.constant dense<0.000000e+00> : vector<2x32xf32>
    %513 = tpu.matmul %512, %505, %cst_177 {dimension_numbers = #tpu.dot_dimension_numbers<[1], [1], [0], [0], [0, 0, 1, 0], [], []>} : vector<2x64xbf16>, vector<32x64xbf16>, vector<2x32xf32> -> vector<2x32xf32>
    %514 = vector.extract_strided_slice %511 {offsets = [2, 0], sizes = [2, 64], strides = [1, 1]} : vector<4x64xbf16> to vector<2x64xbf16>
    %cst_178 = arith.constant dense<0.000000e+00> : vector<32x2xf32>
    %515 = tpu.matmul %505, %514, %cst_178 {dimension_numbers = #tpu.dot_dimension_numbers<[1], [1], [0], [0], [0, 0, 1, 0], [], []>} : vector<32x64xbf16>, vector<2x64xbf16>, vector<32x2xf32> -> vector<32x2xf32>
    %516 = vector.extract_strided_slice %515 {offsets = [0, 0], sizes = [32, 1], strides = [1, 1]} : vector<32x2xf32> to vector<32x1xf32>
    %517 = vector.extract_strided_slice %513 {offsets = [0, 0], sizes = [1, 32], strides = [1, 1]} : vector<2x32xf32> to vector<1x32xf32>
    %518 = vector.broadcast %516 : vector<32x1xf32> to vector<32x32xf32>
    %519 = vector.broadcast %517 : vector<1x32xf32> to vector<32x32xf32>
    %520 = arith.addf %518, %519 : vector<32x32xf32>
    %cst_179 = arith.constant 0.000000e+00 : f32
    %521 = vector.broadcast %cst_179 : f32 to vector<32x32xf32>
    %522 = arith.cmpf ogt, %520, %521 : vector<32x32xf32>
    %cst_180 = arith.constant 2.000000e-01 : f32
    %523 = vector.broadcast %cst_180 : f32 to vector<32x32xf32>
    %524 = arith.mulf %523, %520 : vector<32x32xf32>
    %525 = arith.select %522, %520, %524 : vector<32x32xi1>, vector<32x32xf32>
    %526 = arith.addf %525, %2 : vector<32x32xf32>
    %cst_181 = arith.constant dense<0xFF800000> : vector<32xf32>
    %527 = vector.multi_reduction <maximumf>, %526, %cst_181 [1] : vector<32x32xf32> to vector<32xf32>
    %528 = vector.shape_cast %527 : vector<32xf32> to vector<32x1xf32>
    %529 = vector.broadcast %528 : vector<32x1xf32> to vector<32x32xf32>
    %530 = arith.subf %526, %529 : vector<32x32xf32>
    %531 = math.exp %530 : vector<32x32xf32>
    %cst_182 = arith.constant dense<0.000000e+00> : vector<32xf32>
    %532 = vector.multi_reduction <add>, %531, %cst_182 [1] : vector<32x32xf32> to vector<32xf32>
    %533 = vector.shape_cast %532 : vector<32xf32> to vector<32x1xf32>
    %534 = tpu.reciprocal %533 {approx = true} : vector<32x1xf32> -> vector<32x1xf32>
    %cst_183 = arith.constant 5.000000e-01 : f32
    %535 = vector.broadcast %cst_183 : f32 to vector<32x1xf32>
    %536 = arith.mulf %534, %535 : vector<32x1xf32>
    %537 = arith.truncf %531 : vector<32x32xf32> to vector<32x32xbf16>
    %538 = vector.extract_strided_slice %509 {offsets = [0, 0], sizes = [32, 64], strides = [1, 1]} : vector<32x128xbf16> to vector<32x64xbf16>
    %cst_184 = arith.constant dense<0.000000e+00> : vector<32x64xf32>
    %539 = tpu.matmul %537, %538, %cst_184 {dimension_numbers = #tpu.dot_dimension_numbers<[1], [0], [0], [1], [0, 0, 1, 1], [], []>} : vector<32x32xbf16>, vector<32x64xbf16>, vector<32x64xf32> -> vector<32x64xf32>
    %540 = vector.broadcast %536 : vector<32x1xf32> to vector<32x64xf32>
    %541 = arith.mulf %539, %540 : vector<32x64xf32>
    %542 = vector.extract_strided_slice %515 {offsets = [0, 1], sizes = [32, 1], strides = [1, 1]} : vector<32x2xf32> to vector<32x1xf32>
    %543 = vector.extract_strided_slice %513 {offsets = [1, 0], sizes = [1, 32], strides = [1, 1]} : vector<2x32xf32> to vector<1x32xf32>
    %544 = vector.broadcast %542 : vector<32x1xf32> to vector<32x32xf32>
    %545 = vector.broadcast %543 : vector<1x32xf32> to vector<32x32xf32>
    %546 = arith.addf %544, %545 : vector<32x32xf32>
    %cst_185 = arith.constant 0.000000e+00 : f32
    %547 = vector.broadcast %cst_185 : f32 to vector<32x32xf32>
    %548 = arith.cmpf ogt, %546, %547 : vector<32x32xf32>
    %cst_186 = arith.constant 2.000000e-01 : f32
    %549 = vector.broadcast %cst_186 : f32 to vector<32x32xf32>
    %550 = arith.mulf %549, %546 : vector<32x32xf32>
    %551 = arith.select %548, %546, %550 : vector<32x32xi1>, vector<32x32xf32>
    %552 = arith.addf %551, %2 : vector<32x32xf32>
    %cst_187 = arith.constant dense<0xFF800000> : vector<32xf32>
    %553 = vector.multi_reduction <maximumf>, %552, %cst_187 [1] : vector<32x32xf32> to vector<32xf32>
    %554 = vector.shape_cast %553 : vector<32xf32> to vector<32x1xf32>
    %555 = vector.broadcast %554 : vector<32x1xf32> to vector<32x32xf32>
    %556 = arith.subf %552, %555 : vector<32x32xf32>
    %557 = math.exp %556 : vector<32x32xf32>
    %cst_188 = arith.constant dense<0.000000e+00> : vector<32xf32>
    %558 = vector.multi_reduction <add>, %557, %cst_188 [1] : vector<32x32xf32> to vector<32xf32>
    %559 = vector.shape_cast %558 : vector<32xf32> to vector<32x1xf32>
    %560 = tpu.reciprocal %559 {approx = true} : vector<32x1xf32> -> vector<32x1xf32>
    %cst_189 = arith.constant 5.000000e-01 : f32
    %561 = vector.broadcast %cst_189 : f32 to vector<32x1xf32>
    %562 = arith.mulf %560, %561 : vector<32x1xf32>
    %563 = arith.truncf %557 : vector<32x32xf32> to vector<32x32xbf16>
    %564 = vector.extract_strided_slice %509 {offsets = [0, 64], sizes = [32, 64], strides = [1, 1]} : vector<32x128xbf16> to vector<32x64xbf16>
    %cst_190 = arith.constant dense<0.000000e+00> : vector<32x64xf32>
    %565 = tpu.matmul %563, %564, %cst_190 {dimension_numbers = #tpu.dot_dimension_numbers<[1], [0], [0], [1], [0, 0, 1, 1], [], []>} : vector<32x32xbf16>, vector<32x64xbf16>, vector<32x64xf32> -> vector<32x64xf32>
    %566 = vector.broadcast %562 : vector<32x1xf32> to vector<32x64xf32>
    %567 = arith.mulf %565, %566 : vector<32x64xf32>
    %568 = arith.addf %541, %567 : vector<32x64xf32>
    %c15 = arith.constant 15 : index
    %c0_191 = arith.constant 0 : index
    %569 = vector.load %arg9[%c15, %c0_191] : memref<16x512xf32, #tpu.memory_space<vmem>>, vector<1x64xf32>
    %570 = vector.broadcast %569 : vector<1x64xf32> to vector<32x64xf32>
    %571 = arith.addf %568, %570 : vector<32x64xf32>
    %572 = arith.addf %435, %571 : vector<32x64xf32>
    %cst_192 = arith.constant 0.000000e+00 : f32
    %573 = vector.broadcast %cst_192 : f32 to vector<32x64xf32>
    %574 = arith.maximumf %572, %573 : vector<32x64xf32>
    %575 = arith.truncf %157 : vector<32x64xf32> to vector<32x64xbf16>
    %c8_193 = arith.constant 8 : index
    %c0_194 = arith.constant 0 : index
    %c0_195 = arith.constant 0 : index
    %576 = vector.load %arg4[%c8_193, %c0_194, %c0_195] : memref<10x64x128xbf16, #tpu.memory_space<vmem>>, vector<1x64x128xbf16>
    %577 = vector.shape_cast %576 : vector<1x64x128xbf16> to vector<64x128xbf16>
    %cst_196 = arith.constant dense<0.000000e+00> : vector<32x128xf32>
    %578 = tpu.matmul %575, %577, %cst_196 {dimension_numbers = #tpu.dot_dimension_numbers<[1], [0], [0], [1], [0, 0, 1, 1], [], []>} : vector<32x64xbf16>, vector<64x128xbf16>, vector<32x128xf32> -> vector<32x128xf32>
    %c2_197 = arith.constant 2 : index
    %c0_198 = arith.constant 0 : index
    %579 = vector.load %arg9[%c2_197, %c0_198] : memref<16x512xf32, #tpu.memory_space<vmem>>, vector<1x128xf32>
    %580 = vector.broadcast %579 : vector<1x128xf32> to vector<32x128xf32>
    %581 = arith.addf %578, %580 : vector<32x128xf32>
    %cst_199 = arith.constant 0.000000e+00 : f32
    %582 = vector.broadcast %cst_199 : f32 to vector<32x128xf32>
    %583 = arith.maximumf %581, %582 : vector<32x128xf32>
    %584 = arith.truncf %583 : vector<32x128xf32> to vector<32x128xbf16>
    %c0_200 = arith.constant 0 : index
    %c0_201 = arith.constant 0 : index
    %585 = vector.load %arg6[%c0_200, %c0_201] : memref<128x512xbf16, #tpu.memory_space<vmem>>, vector<128x512xbf16>
    %cst_202 = arith.constant dense<0.000000e+00> : vector<32x512xf32>
    %586 = tpu.matmul %584, %585, %cst_202 {dimension_numbers = #tpu.dot_dimension_numbers<[1], [0], [0], [1], [0, 0, 1, 1], [], []>} : vector<32x128xbf16>, vector<128x512xbf16>, vector<32x512xf32> -> vector<32x512xf32>
    %c3_203 = arith.constant 3 : index
    %c0_204 = arith.constant 0 : index
    %587 = vector.load %arg9[%c3_203, %c0_204] : memref<16x512xf32, #tpu.memory_space<vmem>>, vector<1x512xf32>
    %588 = vector.broadcast %587 : vector<1x512xf32> to vector<32x512xf32>
    %589 = arith.addf %586, %588 : vector<32x512xf32>
    %cst_205 = arith.constant dense<0xFF800000> : vector<512xf32>
    %590 = vector.multi_reduction <maximumf>, %589, %cst_205 [0] : vector<32x512xf32> to vector<512xf32>
    %591 = vector.shape_cast %590 : vector<512xf32> to vector<1x512xf32>
    %592 = arith.truncf %591 : vector<1x512xf32> to vector<1x512xbf16>
    %c0_206 = arith.constant 0 : index
    %c0_207 = arith.constant 0 : index
    %593 = vector.load %arg7[%c0_206, %c0_207] : memref<512x128xbf16, #tpu.memory_space<vmem>>, vector<512x128xbf16>
    %cst_208 = arith.constant dense<0.000000e+00> : vector<1x128xf32>
    %594 = tpu.matmul %592, %593, %cst_208 {dimension_numbers = #tpu.dot_dimension_numbers<[1], [0], [0], [1], [0, 0, 1, 1], [], []>} : vector<1x512xbf16>, vector<512x128xbf16>, vector<1x128xf32> -> vector<1x128xf32>
    %595 = arith.truncf %574 : vector<32x64xf32> to vector<32x64xbf16>
    %c9_209 = arith.constant 9 : index
    %c0_210 = arith.constant 0 : index
    %c0_211 = arith.constant 0 : index
    %596 = vector.load %arg4[%c9_209, %c0_210, %c0_211] : memref<10x64x128xbf16, #tpu.memory_space<vmem>>, vector<1x64x128xbf16>
    %597 = vector.shape_cast %596 : vector<1x64x128xbf16> to vector<64x128xbf16>
    %cst_212 = arith.constant dense<0.000000e+00> : vector<32x128xf32>
    %598 = tpu.matmul %595, %597, %cst_212 {dimension_numbers = #tpu.dot_dimension_numbers<[1], [0], [0], [1], [0, 0, 1, 1], [], []>} : vector<32x64xbf16>, vector<64x128xbf16>, vector<32x128xf32> -> vector<32x128xf32>
    %599 = vector.broadcast %594 : vector<1x128xf32> to vector<32x128xf32>
    %600 = arith.addf %598, %599 : vector<32x128xf32>
    %c4_213 = arith.constant 4 : index
    %c0_214 = arith.constant 0 : index
    %601 = vector.load %arg9[%c4_213, %c0_214] : memref<16x512xf32, #tpu.memory_space<vmem>>, vector<1x128xf32>
    %602 = vector.broadcast %601 : vector<1x128xf32> to vector<32x128xf32>
    %603 = arith.addf %600, %602 : vector<32x128xf32>
    %cst_215 = arith.constant 0.000000e+00 : f32
    %604 = vector.broadcast %cst_215 : f32 to vector<32x128xf32>
    %605 = arith.maximumf %603, %604 : vector<32x128xf32>
    %606 = arith.truncf %605 : vector<32x128xf32> to vector<32x128xbf16>
    %c0_216 = arith.constant 0 : index
    %c0_217 = arith.constant 0 : index
    %607 = vector.load %arg8[%c0_216, %c0_217] : memref<128x128xbf16, #tpu.memory_space<vmem>>, vector<128x128xbf16>
    %cst_218 = arith.constant dense<0.000000e+00> : vector<32x128xf32>
    %608 = tpu.matmul %606, %607, %cst_218 {dimension_numbers = #tpu.dot_dimension_numbers<[1], [0], [0], [1], [0, 0, 1, 1], [], []>} : vector<32x128xbf16>, vector<128x128xbf16>, vector<32x128xf32> -> vector<32x128xf32>
    %c5_219 = arith.constant 5 : index
    %c0_220 = arith.constant 0 : index
    %609 = vector.load %arg9[%c5_219, %c0_220] : memref<16x512xf32, #tpu.memory_space<vmem>>, vector<1x128xf32>
    %610 = vector.broadcast %609 : vector<1x128xf32> to vector<32x128xf32>
    %611 = arith.addf %608, %610 : vector<32x128xf32>
    %cst_221 = arith.constant dense<0xFF800000> : vector<32xf32>
    %612 = vector.multi_reduction <maximumf>, %611, %cst_221 [1] : vector<32x128xf32> to vector<32xf32>
    %613 = vector.shape_cast %612 : vector<32xf32> to vector<32x1xf32>
    %614 = vector.broadcast %613 : vector<32x1xf32> to vector<32x128xf32>
    %615 = arith.subf %611, %614 : vector<32x128xf32>
    %616 = math.exp %615 : vector<32x128xf32>
    %cst_222 = arith.constant dense<0.000000e+00> : vector<32xf32>
    %617 = vector.multi_reduction <add>, %616, %cst_222 [1] : vector<32x128xf32> to vector<32xf32>
    %618 = vector.shape_cast %617 : vector<32xf32> to vector<32x1xf32>
    %cst_223 = arith.constant 1.000000e+00 : f32
    %619 = vector.broadcast %cst_223 : f32 to vector<32x1xf32>
    %620 = arith.divf %619, %618 : vector<32x1xf32>
    %621 = vector.broadcast %620 : vector<32x1xf32> to vector<32x128xf32>
    %622 = arith.mulf %616, %621 : vector<32x128xf32>
    %c0_224 = arith.constant 0 : index
    %c0_225 = arith.constant 0 : index
    %623 = vector.load %arg10[%c0_224, %c0_225] : memref<32x128xf32, #tpu.memory_space<vmem>>, vector<32x128xf32>
    tpu.vector_store %arg10[%c0_224, %c0_225], %622 {strides = array<i32>} : memref<32x128xf32, #tpu.memory_space<vmem>>, vector<32x128xf32>,
    return
  }
  func.func @transform_0(%arg0: i32) -> (i32, i32) {
    %c0_i32 = arith.constant 0 : i32
    %c0_i32_0 = arith.constant 0 : i32
    return %arg0, %c0_i32 : i32, i32
  }
  func.func @transform_1(%arg0: i32) -> (i32, i32, i32) {
    %c0_i32 = arith.constant 0 : i32
    %c0_i32_0 = arith.constant 0 : i32
    %c0_i32_1 = arith.constant 0 : i32
    return %arg0, %c0_i32, %c0_i32_0 : i32, i32, i32
  }
  func.func @transform_2(%arg0: i32) -> (i32, i32, i32) {
    %c0_i32 = arith.constant 0 : i32
    %c0_i32_0 = arith.constant 0 : i32
    %c0_i32_1 = arith.constant 0 : i32
    %c0_i32_2 = arith.constant 0 : i32
    return %c0_i32, %c0_i32_0, %c0_i32_1 : i32, i32, i32
  }
  func.func @transform_3(%arg0: i32) -> (i32, i32, i32) {
    %c0_i32 = arith.constant 0 : i32
    %c0_i32_0 = arith.constant 0 : i32
    %c0_i32_1 = arith.constant 0 : i32
    %c0_i32_2 = arith.constant 0 : i32
    return %c0_i32, %c0_i32_0, %c0_i32_1 : i32, i32, i32
  }
  func.func @transform_4(%arg0: i32) -> (i32, i32, i32) {
    %c0_i32 = arith.constant 0 : i32
    %c0_i32_0 = arith.constant 0 : i32
    %c0_i32_1 = arith.constant 0 : i32
    %c0_i32_2 = arith.constant 0 : i32
    return %c0_i32, %c0_i32_0, %c0_i32_1 : i32, i32, i32
  }
  func.func @transform_5(%arg0: i32) -> (i32, i32) {
    %c0_i32 = arith.constant 0 : i32
    %c0_i32_0 = arith.constant 0 : i32
    %c0_i32_1 = arith.constant 0 : i32
    return %c0_i32, %c0_i32_0 : i32, i32
  }
  func.func @transform_6(%arg0: i32) -> (i32, i32) {
    %c0_i32 = arith.constant 0 : i32
    %c0_i32_0 = arith.constant 0 : i32
    %c0_i32_1 = arith.constant 0 : i32
    return %c0_i32, %c0_i32_0 : i32, i32
  }
  func.func @transform_7(%arg0: i32) -> (i32, i32) {
    %c0_i32 = arith.constant 0 : i32
    %c0_i32_0 = arith.constant 0 : i32
    %c0_i32_1 = arith.constant 0 : i32
    return %c0_i32, %c0_i32_0 : i32, i32
  }
  func.func @transform_8(%arg0: i32) -> (i32, i32) {
    %c0_i32 = arith.constant 0 : i32
    %c0_i32_0 = arith.constant 0 : i32
    %c0_i32_1 = arith.constant 0 : i32
    return %c0_i32, %c0_i32_0 : i32, i32
  }
  func.func @transform_9(%arg0: i32) -> (i32, i32) {
    %c0_i32 = arith.constant 0 : i32
    %c0_i32_0 = arith.constant 0 : i32
    return %arg0, %c0_i32 : i32, i32
  }
}

</mosaic_0001>

<bundles_post_ra>
// kernel: skin_weight_net_forward.1
= control target key start
LH: loop header
LB: loop body
LE: loop exit
PB: predicated region body
PF: predicated region fallthrough
CT: control target
= control target key end

     0   :  { %14 = vsyncpa [#allocation3], 0  ;;  %s8802_s0 = inlined_call_operand.vmem [shape: f32[64,64], index: 0, kind: input, shape index: {}]   ;;  %s8803_s1 = inlined_call_operand.vmem [shape: f32[2,32,32], index: 1, kind: input, shape index: {}]   ;;  %s8804_s2 = inlined_call_operand.hbm [shape: bf16[2,64,64], index: 2, kind: input, shape index: {}]   ;;  %s8805_s3 = inlined_call_operand.vmem [shape: bf16[10,64,128], index: 3, kind: input, shape index: {}]   ;;  %s8806_s4 = inlined_call_operand.hbm [shape: bf16[8,4,64], index: 4, kind: input, shape index: {}]   ;;  %s8807_s5 = inlined_call_operand.hbm [shape: bf16[128,512], index: 5, kind: input, shape index: {}]   ;;  %s8808_s6 = inlined_call_operand.hbm [shape: bf16[512,128], index: 6, kind: input, shape index: {}]   ;;  %s8809_s7 = inlined_call_operand.hbm [shape: bf16[128,128], index: 7, kind: input, shape index: {}]   ;;  %s8810_s8 = inlined_call_operand.hbm [shape: f32[16,512], index: 8, kind: input, shape index: {}]   ;;  %s8811_s9 = inlined_call_operand.vmem [shape: f32[64,128], index: 9, kind: output, shape index: {}]  }
   0x1   :  { %15 = vsyncpa [#allocation5], 0 }
   0x2   :  { %16 = vsyncpa [#allocation8], 0 }
   0x3   :  { %17 = vsyncpa [#allocation11], 0  ;;  %s7685_s30 = smov 0  }
   0x4 LB: > { %s7616_s10 = smov [#allocation4]   ;;  %s7691_s12 = sadd.s32 4294967295, %s7614_s30   ;;  %s7614_s30 = sphi %s7685_s30, %s23_s30  }
   0x5   : > { %s281_s11 = sshll.u32 %s7616_s10, 4  ;;  %p5937_p0 = scmp.ge.s32.totalorder %s7614_s30, 1  ;;  %s7696_s11 = int_to_ptr.vmem [resolvable:$true] %s281_s11 }
   0x6   : > { %p253_p1 = scmp.lt.s32.totalorder %s7614_s30, 3  ;;  %p8812_p2 = scmp.eq.s32.totalorder %s7691_s12, 0 }
   0x7   : > { %s7617_s15 = smov [#allocation7]   ;;  %s7618_s17 = smov [#allocation2]  }
   0x8   : > { %p7698_p3 = pnand %p5937_p0, %p253_p1  ;;  %s307_s16 = sshll.u32 %s7617_s15, 4  ;;  %s7710_s16 = int_to_ptr.vmem [resolvable:$true] %s307_s16 }
   0x9   : > { %s265_s18 = sshll.u32 %s7618_s17, 4  ;;  %s7424_s21 = scalar_lea.hbm %s8806_s4, 256  ;;  %s7712_s18 = int_to_ptr.vmem [resolvable:$true] %s265_s18 }
   0xa   : > { %s8817_s13 = scalar_select %p7698_p3, 1, 0 }
   0xb   : > { %p6907_p4 = pneg %p7698_p3  ;;  %p7425_p6 = scmp.ne.s32.totalorder %s8806_s4, %s7424_s21 }
   0xc   : > { %p7431_p10 = scmp.lt.u32.totalorder %s7424_s21, %s8806_s4 }
   0xd   : > { %p7706_p5 = pnand %p8812_p2, %p6907_p4 }
   0xf   : > { %p7722_p7 = pneg %p7706_p5 }
  0x11   : > { %p7427_p8 = pnand %p7722_p7, %p7425_p6 }
  0x13   : > { %p7428_p9 = pneg %p7427_p8 }
  0x15   : > { %p7433_p11 = pnand %p7431_p10, %p7428_p9 }
  0x17   : > { %7436 = shalt.err (!%p7433_p11)
}
  0x18   : > { %s7437_s27 = scalar_lea.vmem %s7696_s11, 256  ;;  %p7445_p1 = scmp.lt.s32.totalorder %s7696_s11, %s7696_s11 }
  0x19   : > { %p7438_p12 = scmp.ne.s32.totalorder %s7696_s11, %s7437_s27  ;;  %p7446_p4 = scmp.lt.s32.totalorder %s7437_s27, %s7437_s27 }
  0x1b   : > { %p7440_p13 = pnand %p7438_p12, %p7722_p7  ;;  %p7447_p6 = por %p7446_p4, %p7445_p1 }
  0x1d   : > { %p7441_p0 = pneg %p7440_p13 }
  0x1f   : > { %p7448_p8 = pnand %p7447_p6, %p7441_p0 }
  0x21   : > { %7451 = shalt.err (!%p7448_p8)
}
  0x22   : > { %s8814_s28 = smov 32   ;;  %s7620_s29 = smov 2  }
  0x23   : > { %6913 = dma.hbm_to_vmem [thread:$0]  (!%p7706_p5), %s8806_s4, 256, %s7696_s11, [#allocation5], %s8814_s28, %s8814_s28, %s7620_s29  }
  0x24   : > { %s7452_s20 = scalar_lea.hbm %s8808_s6, 4096 }
  0x25   : > { %p7453_p9 = scmp.ne.s32.totalorder %s8808_s6, %s7452_s20  ;;  %p7459_p12 = scmp.lt.u32.totalorder %s7452_s20, %s8808_s6 }
  0x27   : > { %p7455_p10 = pnand %p7453_p9, %p7722_p7 }
  0x29   : > { %p7456_p11 = pneg %p7455_p10 }
  0x2b   : > { %p7461_p13 = pnand %p7459_p12, %p7456_p11 }
  0x2d   : > { %7464 = shalt.err (!%p7461_p13)
}
  0x2e   : > { %s7465_s11 = scalar_lea.vmem %s7710_s16, 4096  ;;  %p7473_p6 = scmp.lt.s32.totalorder %s7710_s16, %s7710_s16 }
  0x2f   : > { %p7466_p0 = scmp.ne.s32.totalorder %s7710_s16, %s7465_s11  ;;  %p7474_p8 = scmp.lt.s32.totalorder %s7465_s11, %s7465_s11 }
  0x31   : > { %p7468_p1 = pnand %p7466_p0, %p7722_p7  ;;  %p7475_p9 = por %p7474_p8, %p7473_p6 }
  0x33   : > { %p7469_p4 = pneg %p7468_p1 }
  0x35   : > { %p7476_p10 = pnand %p7475_p9, %p7469_p4 }
  0x37   : > { %7479 = shalt.err (!%p7476_p10)
}
  0x38   : > { %s8815_s26 = smov 64   ;;  %s8816_s27 = smov 4  }
  0x39   : > { %6919 = dma.hbm_to_vmem [thread:$0]  (!%p7706_p5), %s8808_s6, 4096, %s7710_s16, [#allocation8], %s8815_s26, %s8815_s26, %s8816_s27  }
  0x3a   : > { %s7480_s19 = scalar_lea.hbm %s8804_s2, 1024 }
  0x3b   : > { %p7481_p11 = scmp.ne.s32.totalorder %s8804_s2, %s7480_s19  ;;  %p7487_p0 = scmp.lt.u32.totalorder %s7480_s19, %s8804_s2 }
  0x3d   : > { %p7483_p12 = pnand %p7481_p11, %p7722_p7 }
  0x3f   : > { %p7484_p13 = pneg %p7483_p12 }
  0x41   : > { %p7489_p1 = pnand %p7487_p0, %p7484_p13 }
  0x43   : > { %7492 = shalt.err (!%p7489_p1)
}
  0x44   : > { %s7493_s16 = scalar_lea.vmem %s7712_s18, 1024  ;;  %p7501_p9 = scmp.lt.s32.totalorder %s7712_s18, %s7712_s18 }
  0x45   : > { %p7494_p4 = scmp.ne.s32.totalorder %s7712_s18, %s7493_s16  ;;  %p7502_p10 = scmp.lt.s32.totalorder %s7493_s16, %s7493_s16 }
  0x47   : > { %p7496_p6 = pnand %p7494_p4, %p7722_p7  ;;  %p7503_p11 = por %p7502_p10, %p7501_p9 }
  0x49   : > { %p7497_p8 = pneg %p7496_p6 }
  0x4b   : > { %p7504_p12 = pnand %p7503_p11, %p7497_p8 }
  0x4d   : > { %7507 = shalt.err (!%p7504_p12)
}
  0x4e   : > { %6910 = dma.hbm_to_vmem [thread:$0]  (!%p7706_p5), %s8804_s2, 1024, %s7712_s18, [#allocation3], %s8815_s26, %s8815_s26, %s8816_s27  }
  0x4f   : > { %s7623_s29 = smov [#allocation6]   ;;  %s7508_s19 = scalar_lea.hbm %s8807_s5, 4096 }
  0x50   : > { %s294_s10 = sshll.u32 %s7623_s29, 4  ;;  %p7509_p13 = scmp.ne.s32.totalorder %s8807_s5, %s7508_s19  ;;  %s295_s10 = int_to_ptr.vmem [resolvable:$true] %s294_s10 }
  0x51   : > { %p7515_p4 = scmp.lt.u32.totalorder %s7508_s19, %s8807_s5 }
  0x52   : > { %p7511_p0 = pnand %p7509_p13, %p7722_p7 }
  0x54   : > { %p7512_p1 = pneg %p7511_p0 }
  0x56   : > { %p7517_p6 = pnand %p7515_p4, %p7512_p1 }
  0x58   : > { %7520 = shalt.err (!%p7517_p6)
}
  0x59   : > { %s7521_s18 = scalar_lea.vmem %s295_s10, 4096  ;;  %p7529_p11 = scmp.lt.s32.totalorder %s295_s10, %s295_s10 }
  0x5a   : > { %p7522_p8 = scmp.ne.s32.totalorder %s295_s10, %s7521_s18  ;;  %p7530_p12 = scmp.lt.s32.totalorder %s7521_s18, %s7521_s18 }
  0x5c   : > { %p7524_p9 = pnand %p7522_p8, %p7722_p7  ;;  %p7531_p2 = por %p7530_p12, %p7529_p11 }
  0x5e   : > { %p7525_p10 = pneg %p7524_p9 }
  0x60   : > { %p7532_p3 = pnand %p7531_p2, %p7525_p10 }
  0x62   : > { %7535 = shalt.err (!%p7532_p3)
}
  0x63   : > { %s7624_s16 = smov 256   ;;  %s7625_s25 = smov 16  }
  0x64   : > { %6916 = dma.hbm_to_vmem [thread:$0]  (!%p7706_p5), %s8807_s5, 4096, %s295_s10, [#allocation5], %s7624_s16, %s7624_s16, %s7625_s25  }
  0x65   : > { %s7626_s15 = smov [#allocation9]   ;;  %s7627_s19 = smov [#allocation10]  }
  0x66   : > { %s320_s17 = sshll.u32 %s7626_s15, 4  ;;  %s333_s20 = sshll.u32 %s7627_s19, 4  ;;  %s321_s17 = int_to_ptr.vmem [resolvable:$true] %s320_s17  ;;  %s334_s20 = int_to_ptr.vmem [resolvable:$true] %s333_s20 }
  0x67   : > { %s7536_s23 = scalar_lea.hbm %s8809_s7, 1024 }
  0x68   : > { %p7537_p2 = scmp.ne.s32.totalorder %s8809_s7, %s7536_s23  ;;  %p7543_p0 = scmp.lt.u32.totalorder %s7536_s23, %s8809_s7 }
  0x6a   : > { %p7539_p3 = pnand %p7537_p2, %p7722_p7 }
  0x6c   : > { %p7540_p13 = pneg %p7539_p3 }
  0x6e   : > { %p7545_p1 = pnand %p7543_p0, %p7540_p13 }
  0x70   : > { %7548 = shalt.err (!%p7545_p1)
}
  0x71   : > { %s7549_s10 = scalar_lea.vmem %s321_s17, 1024  ;;  %p7557_p9 = scmp.lt.s32.totalorder %s321_s17, %s321_s17 }
  0x72   : > { %p7550_p4 = scmp.ne.s32.totalorder %s321_s17, %s7549_s10  ;;  %p7558_p10 = scmp.lt.s32.totalorder %s7549_s10, %s7549_s10 }
  0x74   : > { %p7552_p6 = pnand %p7550_p4, %p7722_p7  ;;  %p7559_p11 = por %p7558_p10, %p7557_p9 }
  0x76   : > { %p7553_p8 = pneg %p7552_p6 }
  0x78   : > { %p7560_p12 = pnand %p7559_p11, %p7553_p8 }
  0x7a   : > { %7563 = shalt.err (!%p7560_p12)
}
  0x7b   : > { %s8820_s28 = smov 4   ;;  %s8821_s16 = smov 64  }
  0x7c   : > { %6922 = dma.hbm_to_vmem [thread:$0]  (!%p7706_p5), %s8809_s7, 1024, %s321_s17, [#allocation8], %s8821_s16, %s8821_s16, %s8820_s28  }
  0x7d   : > { %s7564_s29 = scalar_lea.hbm %s8810_s8, 1024 }
  0x7e   : > { %p7565_p2 = scmp.ne.s32.totalorder %s8810_s8, %s7564_s29  ;;  %p7571_p0 = scmp.lt.u32.totalorder %s7564_s29, %s8810_s8 }
  0x80   : > { %p7567_p3 = pnand %p7565_p2, %p7722_p7 }
  0x82   : > { %p7568_p13 = pneg %p7567_p3 }
  0x84   : > { %p7573_p1 = pnand %p7571_p0, %p7568_p13 }
  0x86   : > { %7576 = shalt.err (!%p7573_p1)
}
  0x87   : > { %s7577_s23 = scalar_lea.vmem %s334_s20, 1024  ;;  %p7585_p9 = scmp.lt.s32.totalorder %s334_s20, %s334_s20 }
  0x88   : > { %p7578_p4 = scmp.ne.s32.totalorder %s334_s20, %s7577_s23  ;;  %p7586_p10 = scmp.lt.s32.totalorder %s7577_s23, %s7577_s23 }
  0x8a   : > { %p7580_p6 = pnand %p7578_p4, %p7722_p7  ;;  %p7587_p11 = por %p7586_p10, %p7585_p9 }
  0x8c   : > { %p7581_p8 = pneg %p7580_p6 }
  0x8e   : > { %p7588_p12 = pnand %p7587_p11, %p7581_p8 }
  0x90   : > { %7591 = shalt.err (!%p7588_p12)
}
  0x91   : > { %s7628_s17 = smov 512   ;;  %s8822_s18 = smov 32  }
  0x92   : > { %6925 = dma.hbm_to_vmem [thread:$0]  (!%p7706_p5), %s8810_s8, 1024, %s334_s20, [#allocation11], %s7628_s17, %s7628_s17, %s8822_s18  }
  0x93   : > { %p8823_p2 = scmp.ne.s32.totalorder %s8817_s13, 0 }
  0x94   : > { %p8824_p3 = scmp.eq.s32.totalorder (!%p8823_p2), %s7691_s12, 0 }
  0x95   : > { %366 = sbr.rel (%p8823_p2) target bundleno = 7793 (0x1e71), region = 56 }
  0x9c   : > { %7597 = dma.done.wait (%p8824_p3), [#allocation3], 1024   ;;  %p8825_p7 = pmov %p8824_p3 }
  0x9d   : > { %p8826_p13 = pmov %p8824_p3 }
  0x9e   : > { %7599 = vsyncadd (%p8825_p7), [#allocation3], 4294966272 }
  0x9f   : > { %7601 = dma.done.wait (%p8826_p13), [#allocation5], 4352   ;;  %p8827_p0 = pmov %p8824_p3 }
  0xa1   : > { %7603 = vsyncadd (%p8827_p0), [#allocation5], 4294962944  ;;  %p8828_p1 = pmov %p8827_p0 }
  0xa2   : > { %p8829_p5 = pmov %p8827_p0 }
  0xa3   : > { %7605 = dma.done.wait (%p8828_p1), [#allocation8], 5120  }
  0xa4   : > { %7607 = vsyncadd (%p8829_p5), [#allocation8], 4294962176  ;;  %p8830_p4 = pmov %p8827_p0 }
  0xa5   : > { %p8831_p6 = pmov %p8827_p0 }
  0xa6   : > { %7609 = dma.done.wait (%p8830_p4), [#allocation11], 1024  }
  0xa7   : > { %7611 = vsyncadd (%p8831_p6), [#allocation11], 4294966272  ;;  %s5952_s13 = sshll.u32 %s7691_s12, 2  ;;  %v7004_v0 = vld [vmem:[#allocation2] sm:$0xff]   ;;  %v7005_v1 = vld [vmem:[#allocation2 + $0x8] sm:$0xff]   ;;  %vm488_vm0 = vcmask 523264   ;;  %v778_v35 = vlaneseq }
  0xa8   : > { %p428_p8 = scmp.lt.s32.totalorder %s5952_s13, 7  ;;  %6471 = vmatprep.subr.bf16.mxu1 %v7004_v0  ;;  %v7006_v2 = vld [vmem:[#allocation2 + $0x10] sm:$0xff]   ;;  %v7007_v6 = vld [vmem:[#allocation2 + $0x18] sm:$0xff]   ;;  %v7008_v9 = vld [vmem:[#allocation2 + $0x20] sm:$0xff]   ;;  %v7629_v33 = vmov 1983009808  }
  0xa9   : > { %6472 = vmatpush3.bf16.msra.mxu1 %v7004_v0  ;;  %v7009_v11 = vld [vmem:[#allocation2 + $0x28] sm:$0xff]   ;;  %v7010_v12 = vld [vmem:[#allocation2 + $0x30] sm:$0xff]   ;;  %v7011_v13 = vld [vmem:[#allocation2 + $0x38] sm:$0xff]   ;;  %v776_v34 = vunpack.c.l.s4 %v7629_v33  ;;  %v7898_v37 = vshrl.u32 %v778_v35, 7  ;;  %v7630_v42 = vmov 0.0   ;;  %vm7631_vm1 = vmmov 0  }
  0xaa   : > { %s8833_s13 = smov (!%p428_p8, %s5952_s13), 7  ;;  %6473 = vmatprep.subr.bf16.mxu1 %v7005_v1  ;;  %v7012_v14 = vld [vmem:[%s8805_s3] sm:$0xff]   ;;  %v7013_v15 = vld [vmem:[%s8805_s3 + $0x8] sm:$0xff]   ;;  %v7014_v16 = vld [vmem:[%s8805_s3 + $0x10] sm:$0xff]   ;;  %v7632_v57 = vmov 0   ;;  %v7633_v58 = vmov 1  }
  0xab   : > { %s5953_s14 = sshll.u32 %s8833_s13, 3  ;;  %6495 = vmatprep.subr.bf16.mxu0 %v7012_v14  ;;  %v7015_v17 = vld [vmem:[%s8805_s3 + $0x18] sm:$0xff]   ;;  %v463_v18 = vld [vmem:[#allocation10] ss:$0 sm:$0xff]  ;;  %v777_v36 = vunpack.c.0.s8 %v776_v34  ;;  %v730_v39 = vld [vmem:[#allocation4] sm:$0x3]  ;;  %6965 = vset.pattern.permute.xlu0 %v7632_v57 }
  0xac   : > { %s431_s16 = scalar_lea.vmem %s8802_s0, %s5953_s14  ;;  %6496 = vmatpush3.bf16.msra.mxu0 %v7012_v14  ;;  %v559_v44 = vld [vmem:[#allocation10 + $0x1] ss:$0 sm:$0xff]  ;;  %6966 = vset.pattern.permute.xlu1 %v7633_v58  ;;  %p433_p9 = scmp.lt.s32.totalorder %s7691_s12, 1  ;;  %vm879_vm3 = vcmask 261120  }
  0xad   : > { %v445_v3 = vld [vmem:[%s431_s16] sm:$0xff]  ;;  %v446_v4 = vld [vmem:[%s431_s16 + $0x8] sm:$0xff]  ;;  %6474 = vmatpush3.bf16.msra.mxu1 %v7005_v1  ;;  %v447_v7 = vld [vmem:[%s431_s16 + $0x10] sm:$0xff]  ;;  %6497 = vmatprep.subr.bf16.mxu0 %v7013_v15  ;;  %v7901_v38 = vsub.s32 %v777_v36, %v7898_v37  ;;  %s442_s25 = scalar_lea.vmem %s8811_s9, %s5953_s14 }
  0xae   : > { %v453_v5 = vpack.c.bf16 %v446_v4, %v445_v3  ;;  %6475 = vmatprep.subr.bf16.mxu1 %v7006_v2  ;;  %v448_v8 = vld [vmem:[%s431_s16 + $0x18] sm:$0xff]  ;;  %s8835_s12 = smov (!%p433_p9, %s7691_s12), 1 }
  0xaf   : > { %v454_v10 = vpack.c.bf16 %v448_v8, %v447_v7  ;;  %v781_v40 = vrot.slane %v730_v39, %v7901_v38  ;;  %s6232_s22 = sshll.u32 %s8835_s12, 5  ;;  %s7634_s12 = smov 64  }
  0xb0   : > { %6479 = vmatprep.mubr.msk.bf16.mxu1 %vm488_vm0, %v453_v5  ;;  %6498 = vmatpush3.bf16.msra.mxu0 %v7013_v15  ;;  %s7953_s18 = scalar_lea.vmem %s8803_s1, %s6232_s22 }
  0xb1   : > { %6476 = vmatpush3.bf16.msra.mxu1 %v7006_v2  ;;  %6499 = vmatprep.subr.bf16.mxu0 %v7014_v16  ;;  %v782_v41 = vrot.slane %v781_v40, 1 }
  0xb2   : > { %6477 = vmatprep.subr.bf16.mxu1 %v7007_v6 }
  0xb3   : > { %v784_v54 = vsel %vm488_vm0, %v782_v41, 0 }
  0xb4   : > { %6500 = vmatpush3.bf16.msra.mxu0 %v7014_v16  ;;  %v7959_v16 = vld [vmem:[%s7953_s18 + $0x10] sm:$0xff] }
  0xb5   : > { %6478 = vmatpush3.bf16.msra.mxu1 %v7007_v6  ;;  %6501 = vmatprep.subr.bf16.mxu0 %v7015_v17 }
  0xb6   : > { %6483 = vmatprep.subr.bf16.mxu1 %v7008_v9 }
  0xb8   : > { %6480 = vmatmul.mubr.msk.bf16.vlgmr.msra.gmra.mrb[0].mxu1 %vm488_vm0, %v454_v10  ;;  %6502 = vmatpush3.bf16.msra.mxu0 %v7015_v17 }
  0xb9   : > { %6484 = vmatpush3.bf16.msra.mxu1 %v7008_v9  ;;  %6875 = vmatprep.subr.msk.bf16.mxu0 %vm488_vm0, %v782_v41  ;;  %v7946_v9 = vsub.s32 0, %v7898_v37 }
  0xba   : > { %6485 = vmatprep.subr.bf16.mxu1 %v7009_v11 }
  0xbd   : > { %6486 = vmatpush3.bf16.msra.mxu1 %v7009_v11 }
  0xbe   : > { %6487 = vmatprep.subr.bf16.mxu1 %v7010_v12 }
  0xc1   : > { %6488 = vmatpush3.bf16.msra.mxu1 %v7010_v12  ;;  %v7956_v12 = vsub.s32 1, %v7898_v37 }
  0xc2   : > { %6489 = vmatprep.subr.bf16.mxu1 %v7011_v13 }
  0xc5   : > { %6490 = vmatpush3.bf16.msra.mxu1 %v7011_v13 }
  0xc6   : > { %6507 = vmatprep.subr.bf16.mxu1 %v7630_v42 }
 0x18b   : > { %v6481_v19 = vpop.f32.mrb[0].mxu1 }
 0x18c   : > { %v538_v20 = vadd.f32 %v6481_v19, %v463_v18  ;;  %v529_v21 = vpop.f32.mrb[1].mxu1 }
 0x18d   : > { %v530_v22 = vadd.f32 %v529_v21, %v463_v18  ;;  %v6482_v23 = vpop.f32.mrb[2].mxu1 }
 0x18e   : > { %v541_v24 = vadd.f32 %v6482_v23, %v463_v18  ;;  %v532_v25 = vpop.f32.mrb[3].mxu1  ;;  %v546_v27 = vmax.f32 %v538_v20, 0.0 }
 0x18f   : > { %v533_v26 = vadd.f32 %v532_v25, %v463_v18  ;;  %v544_v29 = vmax.f32 %v530_v22, 0.0 }
 0x190   : > { %v547_v28 = vmax.f32 %v541_v24, 0.0 }
 0x191   : > { %v545_v30 = vmax.f32 %v533_v26, 0.0 }
 0x192   : > { %v549_v31 = vpack.c.bf16 %v547_v28, %v546_v27 }
 0x193   : > { %v548_v32 = vpack.c.bf16 %v545_v30, %v544_v29  ;;  %v7968_v29 = vld [vmem:[%s7953_s18] sm:$0xff] }
 0x195   : > { %6491 = vmatprep.mubr.msk.bf16.mxu1 %vm488_vm0, %v548_v32 }
 0x196   : > { %6492 = vmatmul.mubr.msk.bf16.vlgmr.msra.gmra.mrb[4].mxu1 %vm488_vm0, %v549_v31  ;;  %v7971_v31 = vld [vmem:[%s7953_s18 + $0x18] sm:$0xff] }
 0x197   : > { %6511 = vmatprep.mubr.msk.bf16.mxu1 %vm7631_vm1, %v7630_v42 }
 0x269   : > { %v6493_v43 = vpop.f32.mrb[4].mxu1 }
 0x26a   : > { %v624_v45 = vpop.f32.mrb[5].mxu1  ;;  %v7914_v51 = vadd.f32 %v6493_v43, %v559_v44 }
 0x26b   : > { %v6494_v46 = vpop.f32.mrb[6].mxu1  ;;  %v7910_v49 = vadd.f32 %v624_v45, %v559_v44 }
 0x26c   : > { %v7908_v47 = vadd.f32 %v6494_v46, %v559_v44  ;;  %v627_v48 = vpop.f32.mrb[7].mxu1 }
 0x26d   : > { %v7912_v50 = vadd.f32 %v627_v48, %v559_v44 }
 0x26e   : > { %v640_v53 = vpack.c.bf16 %v7908_v47, %v7914_v51 }
 0x26f   : > { %v639_v52 = vpack.c.bf16 %v7912_v50, %v7910_v49 }
 0x270   : > { %v677_v56 = vsel %vm488_vm0, %v640_v53, 0 }
 0x271   : > { %6503 = vmatprep.mubr.msk.bf16.mxu0 %vm488_vm0, %v639_v52  ;;  %v674_v55 = vsel %vm488_vm0, %v639_v52, 0 }
 0x272   : > { %6504 = vmatmul.mubr.msk.bf16.vlgmr.msra.gmra.mrb[0].mxu0 %vm488_vm0, %v640_v53  ;;  %6508 = vmatpush3.bf16.xpose.msra.mxu1 %v674_v55 }
 0x273   : > { %6516 = vmatpush3.bf16.xpose.msra.mxu0 %v784_v54  ;;  %6517 = vmatprep.mubr.msk.bf16.mxu0 %vm488_vm0, %v639_v52 }
 0x274   : > { %6509 = vmatprep.subr.bf16.mxu1 %v7630_v42 }
 0x27a   : > { %6510 = vmatpush3.bf16.xpose.msra.mxu1 %v677_v56  ;;  %6518 = vmatmul.mubr.msk.bf16.vlgmr.msra.gmra.mrb[4].mxu0 %vm488_vm0, %v640_v53 }
 0x281   : > { %6512 = vmatmul.mubr.msk.bf16.vlgmr.msra.gmra.mrb[8].mxu1 %vm488_vm0, %v730_v39 }
 0x345   : > { %v6505_v59 = vpop.f32.mrb[0].mxu0 }
 0x346   : > { %v713_v60 = vpop.f32.mrb[1].mxu0 }
 0x347   : > { %v6506_v61 = vpop.f32.mrb[2].mxu0 }
 0x348   : > { %v7931_v62 = vpack.c.bf16 %v6506_v61, %v6505_v59  ;;  %v716_v63 = vpop.f32.mrb[3].mxu0 }
 0x349   : > { %v7933_v0 = vpack.c.bf16 %v716_v63, %v713_v60 }
 0x34b   : > { %6521 = vmatprep.subr.bf16.mxu1 %v7933_v0 }
 0x34c   : > { %6522 = vmatpush3.bf16.msra.mxu1 %v7933_v0 }
 0x34d   : > { %v6519_v1 = vpop.f32.mrb[4].mxu0  ;;  %6523 = vmatprep.subr.bf16.mxu1 %v7931_v62 }
 0x34e   : > { %847 = vperm.xlu0 %6965, %v6519_v1   ;;  %v820_v2 = vpop.f32.mrb[5].mxu0 }
 0x34f   : > { %986 = vperm.xlu1 %6966, %v820_v2   ;;  %v6520_v3 = vpop.f32.mrb[6].mxu0 }
 0x350   : > { %v823_v4 = vpop.f32.mrb[7].mxu0  ;;  %6524 = vmatpush3.bf16.msra.mxu1 %v7931_v62 }
 0x352   : > { %837 = vperm.xlu0 %6965, %v820_v2  }
 0x353   : > { %6967 = vset.pattern.permute.xlu1 %v7632_v57 }
 0x354   : > { %852 = vperm.xlu1 %6967, %v6520_v3   ;;  %v768_v5 = vpop.f32.mrb[8].mxu1 }
 0x355   : > { %v6513_v6 = vpop.f32.mrb[9].mxu1  ;;  %v858_v10 = vrot.slane %v768_v5, %v7946_v9  ;;  %v1004_v18 = vrot.slane %v768_v5, %v7956_v12 }
 0x356   : > { %842 = vperm.xlu0 %6965, %v823_v4   ;;  %v771_v7 = vpop.f32.mrb[10].mxu1 }
 0x357   : > { %v6514_v8 = vpop.f32.mrb[11].mxu1 }
 0x358   : > { %6969 = vset.pattern.permute.xlu1 %v7633_v58 }
 0x359   : > { %990 = vperm.xlu1 %6969, %v823_v4   ;;  %v7982_v4 = vld [vmem:[%s7953_s18 + $0x8] sm:$0xff] }
 0x35a   : > { %6968 = vset.pattern.permute.xlu0 %v7633_v58 }
 0x35b   : > { %994 = vperm.xlu0 %6968, %v6519_v1  }
 0x35d   : > { %998 = vperm.xlu1 %6969, %v6520_v3  }
 0x35f   : > { %6970 = vset.pattern.permute.xlu0 %v7632_v57 }
 0x361   : > { %6971 = vset.pattern.permute.xlu1 %v7632_v57 }
 0x3cd   : > { %v848_v11 = vpop.permute.xlu0 %847 }
 0x3ce   : > { %v861_v13 = vadd.f32 %v858_v10, %v848_v11  ;;  %v987_v14 = vpop.permute.xlu1 %986 }
 0x3cf   : > { %v1005_v27 = vadd.f32 %v1004_v18, %v987_v14 }
 0x3d0   : > { %v869_v15 = vmul.f32 0.2, %v861_v13  ;;  %vm865_vm2 = vcmp.gt.f32.partialorder %v861_v13, 0.0 }
 0x3d1   : > { %v838_v17 = vpop.permute.xlu0 %837  ;;  %v1013_v40 = vmul.f32 0.2, %v1005_v27  ;;  %vm1009_vm6 = vcmp.gt.f32.partialorder %v1005_v27, 0.0 }
 0x3d2   : > { %v859_v19 = vadd.f32 %v858_v10, %v838_v17  ;;  %v873_v20 = vsel %vm865_vm2, %v861_v13, %v869_v15 }
 0x3d3   : > { %v853_v21 = vpop.permute.xlu1 %852  ;;  %v7963_v22 = vadd.f32 %v873_v20, %v7959_v16  ;;  %v1017_v54 = vsel %vm1009_vm6, %v1005_v27, %v1013_v40 }
 0x3d4   : > { %v867_v23 = vmul.f32 0.2, %v859_v19  ;;  %v862_v24 = vadd.f32 %v858_v10, %v853_v21  ;;  %vm863_vm4 = vcmp.gt.f32.partialorder %v859_v19, 0.0  ;;  %v1021_v3 = vadd.f32 %v1017_v54, %v7968_v29 }
 0x3d5   : > { %v843_v25 = vpop.permute.xlu0 %842  ;;  %v886_v26 = vsel %vm879_vm3, %v7963_v22, -inf }
 0x3d6   : > { %v870_v28 = vmul.f32 0.2, %v862_v24  ;;  %887 = vmax.xlane.f32.xlu0 %v886_v26  ;;  %v871_v30 = vsel %vm863_vm4, %v859_v19, %v867_v23  ;;  %vm866_vm5 = vcmp.gt.f32.partialorder %v862_v24, 0.0  ;;  %v860_v43 = vadd.f32 %v858_v10, %v843_v25 }
 0x3d7   : > { %v875_v32 = vadd.f32 %v871_v30, %v7968_v29  ;;  %v1025_v8 = vsel %vm879_vm3, %v1021_v3, -inf }
 0x3d8   : > { %v991_v33 = vpop.permute.xlu1 %990  ;;  %v874_v34 = vsel %vm866_vm5, %v862_v24, %v870_v28  ;;  %v868_v55 = vmul.f32 0.2, %v860_v43  ;;  %vm864_vm10 = vcmp.gt.f32.partialorder %v860_v43, 0.0 }
 0x3d9   : > { %v1006_v35 = vadd.f32 %v1004_v18, %v991_v33  ;;  %v880_v36 = vsel %vm879_vm3, %v875_v32, -inf  ;;  %v878_v39 = vadd.f32 %v874_v34, %v7971_v31 }
 0x3da   : > { %v995_v41 = vpop.permute.xlu0 %994  ;;  %881 = vmax.xlane.f32.xlu1 %v880_v36  ;;  %v872_v5 = vsel %vm864_vm10, %v860_v43, %v868_v55 }
 0x3db   : > { %v1007_v44 = vadd.f32 %v1004_v18, %v995_v41  ;;  %v1014_v45 = vmul.f32 0.2, %v1006_v35  ;;  %v889_v53 = vsel %vm879_vm3, %v878_v39, -inf  ;;  %vm1010_vm8 = vcmp.gt.f32.partialorder %v1006_v35, 0.0 }
 0x3dc   : > { %v999_v46 = vpop.permute.xlu1 %998  ;;  %v876_v10 = vadd.f32 %v872_v5, %v7982_v4 }
 0x3dd   : > { %v1015_v48 = vmul.f32 0.2, %v1007_v44  ;;  %v1008_v52 = vadd.f32 %v1004_v18, %v999_v46  ;;  %vm1011_vm7 = vcmp.gt.f32.partialorder %v1007_v44, 0.0  ;;  %v1018_v63 = vsel %vm1010_vm8, %v1006_v35, %v1014_v45 }
 0x3de   : > { %890 = vmax.xlane.f32.xlu1 %v889_v53  ;;  %v1022_v7 = vadd.f32 %v1018_v63, %v7982_v4  ;;  %v883_v13 = vsel %vm879_vm3, %v876_v10, -inf }
 0x3df   : > { %v1016_v56 = vmul.f32 0.2, %v1008_v52  ;;  %v1019_v59 = vsel %vm1011_vm7, %v1007_v44, %v1015_v48  ;;  %vm1012_vm9 = vcmp.gt.f32.partialorder %v1008_v52, 0.0 }
 0x3e0   : > { %v1023_v60 = vadd.f32 %v1019_v59, %v7959_v16  ;;  %v1028_v11 = vsel %vm879_vm3, %v1022_v7, -inf }
 0x3e1   : > { %v1020_v61 = vsel %vm1012_vm9, %v1008_v52, %v1016_v56 }
 0x3e2   : > { %v1031_v1 = vsel %vm879_vm3, %v1023_v60, -inf  ;;  %v1024_v2 = vadd.f32 %v1020_v61, %v7971_v31 }
 0x3e3   : > { %1032 = vmax.xlane.f32.xlu0 %v1031_v1 }
 0x3e4   : > { %v1034_v6 = vsel %vm879_vm3, %v1024_v2, -inf }
 0x3e5   : > { %1035 = vmax.xlane.f32.xlu1 %v1034_v6 }
 0x3e7   : > { %1026 = vmax.xlane.f32.xlu0 %v1025_v8 }
 0x3e9   : > { %1029 = vmax.xlane.f32.xlu1 %v1028_v11  ;;  %v7017_v11 = vld [vmem:[%s8805_s3 + $0x28] sm:$0xff]  }
 0x3eb   : > { %884 = vmax.xlane.f32.xlu0 %v883_v13  ;;  %v7018_v13 = vld [vmem:[%s8805_s3 + $0x30] sm:$0xff]  }
 0x3fa   : > { %1075 = vrot.lane.b32.xlu1 %v7931_v62, %s7634_s12 }
 0x401   : > { %1073 = vrot.lane.b32.xlu0 %v7933_v0, %s7634_s12 }
 0x463   : > { %v888_v14 = vpop.xlane.xlu0 %887 }
 0x464   : > { %v894_v15 = vsub.f32 %v7963_v22, %v888_v14  ;;  %v7019_v14 = vld [vmem:[%s8805_s3 + $0x38] sm:$0xff]  }
 0x466   : > { %v900_v17 = vmul.f32 1.442695, %v894_v15  ;;  %v8022_v15 = vld [vmem:[#allocation4 + $0x2] sm:$0x3] }
 0x467   : > { %v882_v18 = vpop.xlane.xlu1 %881 }
 0x468   : > { %7140 = vpow2.f32 %v900_v17  ;;  %v892_v19 = vsub.f32 %v875_v32, %v882_v18  ;;  %v1295_v17 = vrot.slane %v8022_v15, %v7901_v38 }
 0x46a   : > { %v896_v20 = vmul.f32 1.442695, %v892_v19  ;;  %v8026_v18 = vrot.slane %v1295_v17, 1 }
 0x46b   : > { %v891_v21 = vpop.xlane.xlu1 %890 }
 0x46c   : > { %7142 = vpow2.f32 %v896_v20  ;;  %v895_v23 = vsub.f32 %v878_v39, %v891_v21 }
 0x46e   : > { %v902_v24 = vmul.f32 1.442695, %v895_v23 }
 0x470   : > { %7144 = vpow2.f32 %v902_v24  ;;  %v1033_v25 = vpop.xlane.xlu0 %1032 }
 0x471   : > { %v1039_v0 = vsub.f32 %v1023_v60, %v1033_v25 }
 0x472   : > { %v7141_v26 = vpop.eup %7140  ;;  %v1036_v27 = vpop.xlane.xlu1 %1035 }
 0x473   : > { %v1040_v62 = vsub.f32 %v1024_v2, %v1036_v27  ;;  %v910_v28 = vsel %vm879_vm3, %v7141_v26, 0.0  ;;  %v1045_v39 = vmul.f32 1.442695, %v1039_v0 }
 0x474   : > { %v1027_v30 = vpop.xlane.xlu0 %1026  ;;  %911 = vadd.xlane.f32.xlu0 %v910_v28 }
 0x475   : > { %v1037_v22 = vsub.f32 %v1021_v3, %v1027_v30  ;;  %v1047_v34 = vmul.f32 1.442695, %v1040_v62 }
 0x476   : > { %v7143_v33 = vpop.eup %7142  ;;  %v1030_v35 = vpop.xlane.xlu1 %1029 }
 0x477   : > { %v1041_v32 = vmul.f32 1.442695, %v1037_v22  ;;  %v1038_v36 = vsub.f32 %v1022_v7, %v1030_v35  ;;  %v904_v40 = vsel %vm879_vm3, %v7143_v33, 0.0 }
 0x478   : > { %v885_v41 = vpop.xlane.xlu0 %884  ;;  %905 = vadd.xlane.f32.xlu1 %v904_v40 }
 0x479   : > { %7146 = vpow2.f32 %v1041_v32  ;;  %v1043_v43 = vmul.f32 1.442695, %v1038_v36  ;;  %v893_v44 = vsub.f32 %v876_v10, %v885_v41  ;;  %v7016_v10 = vld [vmem:[%s8805_s3 + $0x20] sm:$0xff]  }
 0x47a   : > { %v7145_v45 = vpop.eup %7144  ;;  %7148 = vpow2.f32 %v1047_v34  ;;  %v1076_v53 = vpop.permute.xlu1 %1075  ;;  %6537 = vmatprep.subr.bf16.mxu1 %v7016_v10 }
 0x47b   : > { %7150 = vpow2.f32 %v1043_v43  ;;  %v898_v46 = vmul.f32 1.442695, %v893_v44  ;;  %v913_v48 = vsel %vm879_vm3, %v7145_v45, 0.0  ;;  %v925_v6 = vpack.c.bf16 %v7145_v45, %v7141_v26 }
 0x47c   : > { %7152 = vpow2.f32 %v1045_v39  ;;  %v1074_v52 = vpop.permute.xlu0 %1073  ;;  %914 = vadd.xlane.f32.xlu1 %v913_v48 }
 0x47d   : > { %7154 = vpow2.f32 %v898_v46  ;;  %6529 = vmatprep.subr.bf16.mxu0 %v1074_v52 }
 0x47e   : > { %6530 = vmatpush3.bf16.msra.mxu0 %v1074_v52 }
 0x47f   : > { %6531 = vmatprep.subr.bf16.mxu0 %v1076_v53 }
 0x482   : > { %6532 = vmatpush3.bf16.msra.mxu0 %v1076_v53 }
 0x483   : > { %v7147_v54 = vpop.eup %7146  ;;  %6549 = vmatprep.subr.bf16.mxu0 %v7630_v42 }
 0x484   : > { %v7149_v55 = vpop.eup %7148  ;;  %v1049_v56 = vsel %vm879_vm3, %v7147_v54, 0.0 }
 0x485   : > { %v7151_v59 = vpop.eup %7150  ;;  %1050 = vadd.xlane.f32.xlu0 %v1049_v56  ;;  %v1058_v7 = vsel %vm879_vm3, %v7149_v55, 0.0 }
 0x486   : > { %v7153_v60 = vpop.eup %7152  ;;  %v1052_v61 = vsel %vm879_vm3, %v7151_v59, 0.0  ;;  %v1069_v63 = vpack.c.bf16 %v7151_v59, %v7147_v54  ;;  %v1142_v59 = vld [vmem:[#allocation10 + $0x20] ss:$0 sm:$0xff] }
 0x487   : > { %v7155_v1 = vpop.eup %7154  ;;  %1053 = vadd.xlane.f32.xlu1 %v1052_v61  ;;  %v1070_v2 = vpack.c.bf16 %v7149_v55, %v7153_v60  ;;  %v1055_v8 = vsel %vm879_vm3, %v7153_v60, 0.0 }
 0x488   : > { %6533 = vmatprep.mubr.msk.bf16.mxu0 %vm879_vm3, %v1069_v63  ;;  %v907_v3 = vsel %vm879_vm3, %v7155_v1, 0.0  ;;  %v924_v5 = vpack.c.bf16 %v7155_v1, %v7143_v33 }
 0x489   : > { %908 = vadd.xlane.f32.xlu0 %v907_v3  ;;  %6534 = vmatmul.mubr.msk.bf16.vlgmr.msra.gmra.mrb[8].mxu0 %vm879_vm3, %v1070_v2 }
 0x48a   : > { %6525 = vmatprep.mubr.msk.bf16.mxu1 %vm879_vm3, %v924_v5  ;;  %6553 = vmatprep.mubr.msk.bf16.mxu0 %vm7631_vm1, %v7630_v42 }
 0x48b   : > { %6526 = vmatmul.mubr.msk.bf16.vlgmr.msra.gmra.mrb[12].mxu1 %vm879_vm3, %v925_v6  ;;  %1059 = vadd.xlane.f32.xlu1 %v1058_v7 }
 0x48c   : > { %6538 = vmatpush3.bf16.msra.mxu1 %v7016_v10 }
 0x48d   : > { %1056 = vadd.xlane.f32.xlu0 %v1055_v8  ;;  %6539 = vmatprep.subr.bf16.mxu1 %v7017_v11 }
 0x490   : > { %6540 = vmatpush3.bf16.msra.mxu1 %v7017_v11 }
 0x491   : > { %6541 = vmatprep.subr.bf16.mxu1 %v7018_v13 }
 0x494   : > { %6542 = vmatpush3.bf16.msra.mxu1 %v7018_v13 }
 0x495   : > { %6543 = vmatprep.subr.bf16.mxu1 %v7019_v14 }
 0x498   : > { %6544 = vmatpush3.bf16.msra.mxu1 %v7019_v14 }
 0x499   : > { %6876 = vmatprep.subr.msk.bf16.mxu1 %vm488_vm0, %v8026_v18 }
 0x501   : > { %v912_v19 = vpop.xlane.xlu0 %911 }
 0x502   : > { %7156 = vrcp.f32 %v912_v19 }
 0x505   : > { %v906_v20 = vpop.xlane.xlu1 %905 }
 0x506   : > { %7158 = vrcp.f32 %v906_v20 }
 0x509   : > { %v915_v23 = vpop.xlane.xlu1 %914 }
 0x50a   : > { %7160 = vrcp.f32 %v915_v23 }
 0x50c   : > { %v7157_v62 = vpop.eup %7156 }
 0x50d   : > { %v922_v39 = vmul.f32 0.5, %v7157_v62  ;;  %v1298_v62 = vsel %vm488_vm0, %v8026_v18, 0 }
 0x510   : > { %v7159_v28 = vpop.eup %7158 }
 0x511   : > { %v920_v45 = vmul.f32 0.5, %v7159_v28 }
 0x512   : > { %v1051_v21 = vpop.xlane.xlu0 %1050 }
 0x513   : > { %7162 = vrcp.f32 %v1051_v21 }
 0x514   : > { %v1054_v25 = vpop.xlane.xlu1 %1053  ;;  %v7161_v0 = vpop.eup %7160 }
 0x515   : > { %v923_v55 = vmul.f32 0.5, %v7161_v0 }
 0x516   : > { %v909_v24 = vpop.xlane.xlu0 %908 }
 0x518   : > { %v1060_v27 = vpop.xlane.xlu1 %1059 }
 0x51a   : > { %v1057_v26 = vpop.xlane.xlu0 %1056 }
 0x51b   : > { %7164 = vrcp.f32 %v1057_v26 }
 0x51c   : > { %7166 = vrcp.f32 %v1054_v25 }
 0x51d   : > { %7168 = vrcp.f32 %v1060_v27  ;;  %v7163_v30 = vpop.eup %7162 }
 0x51e   : > { %7170 = vrcp.f32 %v909_v24  ;;  %v1065_v41 = vmul.f32 0.5, %v7163_v30 }
 0x525   : > { %v7165_v22 = vpop.eup %7164 }
 0x526   : > { %v7167_v33 = vpop.eup %7166  ;;  %v1067_v36 = vmul.f32 0.5, %v7165_v22 }
 0x527   : > { %v7169_v34 = vpop.eup %7168  ;;  %v1066_v61 = vmul.f32 0.5, %v7167_v33 }
 0x528   : > { %v7171_v32 = vpop.eup %7170  ;;  %v1068_v52 = vmul.f32 0.5, %v7169_v34 }
 0x529   : > { %v921_v1 = vmul.f32 0.5, %v7171_v32 }
 0x55c   : > { %v6535_v35 = vpop.f32.mrb[8].mxu0 }
 0x55d   : > { %v1119_v40 = vpop.f32.mrb[9].mxu0  ;;  %v1136_v46 = vmul.f32 %v6535_v35, %v1067_v36 }
 0x55e   : > { %v6527_v43 = vpop.f32.mrb[12].mxu1  ;;  %v6536_v44 = vpop.f32.mrb[10].mxu0  ;;  %v1134_v56 = vmul.f32 %v1119_v40, %v1065_v41 }
 0x55f   : > { %v983_v48 = vmul.f32 %v6527_v43, %v922_v39  ;;  %v966_v53 = vpop.f32.mrb[13].mxu1  ;;  %v1122_v54 = vpop.f32.mrb[11].mxu0  ;;  %v1137_v3 = vmul.f32 %v6536_v44, %v1068_v52 }
 0x560   : > { %v981_v60 = vmul.f32 %v966_v53, %v920_v45  ;;  %v6528_v63 = vpop.f32.mrb[14].mxu1  ;;  %v1135_v8 = vmul.f32 %v1122_v54, %v1066_v61 }
 0x561   : > { %v1140_v2 = vadd.f32 %v1136_v46, %v983_v48  ;;  %v984_v5 = vmul.f32 %v6528_v63, %v923_v55  ;;  %v969_v6 = vpop.f32.mrb[15].mxu1 }
 0x562   : > { %v1138_v7 = vadd.f32 %v1134_v56, %v981_v60  ;;  %v982_v10 = vmul.f32 %v969_v6, %v921_v1 }
 0x563   : > { %v1145_v11 = vadd.f32 %v1142_v59, %v1140_v2  ;;  %v1141_v13 = vadd.f32 %v1137_v3, %v984_v5 }
 0x564   : > { %v1143_v14 = vadd.f32 %v1142_v59, %v1138_v7  ;;  %v1139_v17 = vadd.f32 %v1135_v8, %v982_v10 }
 0x565   : > { %v1146_v19 = vadd.f32 %v1142_v59, %v1141_v13  ;;  %v1149_v21 = vmax.f32 %v1145_v11, 0.0 }
 0x566   : > { %v1144_v20 = vadd.f32 %v1142_v59, %v1139_v17  ;;  %v1147_v24 = vmax.f32 %v1143_v14, 0.0 }
 0x567   : > { %v1150_v23 = vmax.f32 %v1146_v19, 0.0 }
 0x568   : > { %v1148_v25 = vmax.f32 %v1144_v20, 0.0 }
 0x569   : > { %v1152_v26 = vpack.c.bf16 %v1150_v23, %v1149_v21 }
 0x56a   : > { %v1151_v27 = vpack.c.bf16 %v1148_v25, %v1147_v24 }
 0x56b   : > { %v1190_v0 = vsel %vm488_vm0, %v1152_v26, 0 }
 0x56c   : > { %6545 = vmatprep.mubr.msk.bf16.mxu1 %vm488_vm0, %v1151_v27  ;;  %v1187_v28 = vsel %vm488_vm0, %v1151_v27, 0 }
 0x56d   : > { %6546 = vmatmul.mubr.msk.bf16.vlgmr.msra.gmra.mrb[16].mxu1 %vm488_vm0, %v1152_v26  ;;  %6550 = vmatpush3.bf16.xpose.msra.mxu0 %v1187_v28 }
 0x56e   : > { %6558 = vmatpush3.bf16.xpose.msra.mxu1 %v1298_v62  ;;  %6559 = vmatprep.mubr.msk.bf16.mxu1 %vm488_vm0, %v1151_v27 }
 0x56f   : > { %6551 = vmatprep.subr.bf16.mxu0 %v7630_v42 }
 0x575   : > { %6552 = vmatpush3.bf16.xpose.msra.mxu0 %v1190_v0  ;;  %6560 = vmatmul.mubr.msk.bf16.vlgmr.msra.gmra.mrb[20].mxu1 %vm488_vm0, %v1152_v26 }
 0x57c   : > { %6554 = vmatmul.mubr.msk.bf16.vlgmr.msra.gmra.mrb[12].mxu0 %vm488_vm0, %v8022_v15 }
 0x640   : > { %v6547_v18 = vpop.f32.mrb[16].mxu1 }
 0x641   : > { %v1226_v30 = vpop.f32.mrb[17].mxu1 }
 0x642   : > { %v6548_v22 = vpop.f32.mrb[18].mxu1 }
 0x643   : > { %v8041_v33 = vpack.c.bf16 %v6548_v22, %v6547_v18  ;;  %v1229_v34 = vpop.f32.mrb[19].mxu1 }
 0x644   : > { %v8043_v35 = vpack.c.bf16 %v1229_v34, %v1226_v30 }
 0x646   : > { %6563 = vmatprep.subr.bf16.mxu0 %v8043_v35 }
 0x647   : > { %6564 = vmatpush3.bf16.msra.mxu0 %v8043_v35 }
 0x648   : > { %v6561_v32 = vpop.f32.mrb[20].mxu1  ;;  %6565 = vmatprep.subr.bf16.mxu0 %v8041_v33 }
 0x649   : > { %1361 = vperm.xlu1 %6971, %v6561_v32   ;;  %v1334_v36 = vpop.f32.mrb[21].mxu1 }
 0x64a   : > { %1351 = vperm.xlu0 %6970, %v1334_v36   ;;  %v6562_v40 = vpop.f32.mrb[22].mxu1 }
 0x64b   : > { %v1337_v15 = vpop.f32.mrb[23].mxu1  ;;  %6566 = vmatpush3.bf16.msra.mxu0 %v8041_v33 }
 0x64d   : > { %6972 = vset.pattern.permute.xlu1 %v7633_v58 }
 0x64e   : > { %1507 = vperm.xlu1 %6972, %v6561_v32  }
 0x64f   : > { %v1282_v39 = vpop.f32.mrb[12].mxu0 }
 0x650   : > { %v6555_v41 = vpop.f32.mrb[13].mxu0  ;;  %v1372_v45 = vrot.slane %v1282_v39, %v7946_v9  ;;  %v1517_v53 = vrot.slane %v1282_v39, %v7956_v12 }
 0x651   : > { %v1285_v43 = vpop.f32.mrb[14].mxu0 }
 0x652   : > { %1499 = vperm.xlu1 %6972, %v1334_v36   ;;  %v6556_v44 = vpop.f32.mrb[15].mxu0 }
 0x656   : > { %6973 = vset.pattern.permute.xlu1 %v7632_v57 }
 0x657   : > { %1366 = vperm.xlu1 %6973, %v6562_v40  }
 0x65b   : > { %1356 = vperm.xlu1 %6973, %v1337_v15  }
 0x65f   : > { %6974 = vset.pattern.permute.xlu1 %v7633_v58 }
 0x660   : > { %1503 = vperm.xlu1 %6974, %v1337_v15  }
 0x664   : > { %1511 = vperm.xlu1 %6974, %v6562_v40  }
 0x668   : > { %6975 = vset.pattern.permute.xlu1 %v7632_v57 }
 0x6c8   : > { %v1362_v46 = vpop.permute.xlu1 %1361 }
 0x6c9   : > { %v1375_v48 = vadd.f32 %v1372_v45, %v1362_v46  ;;  %v1352_v52 = vpop.permute.xlu0 %1351 }
 0x6ca   : > { %v1373_v54 = vadd.f32 %v1372_v45, %v1352_v52 }
 0x6cb   : > { %v1383_v55 = vmul.f32 0.2, %v1375_v48  ;;  %vm1379_vm11 = vcmp.gt.f32.partialorder %v1375_v48, 0.0 }
 0x6cc   : > { %v1381_v56 = vmul.f32 0.2, %v1373_v54  ;;  %vm1377_vm12 = vcmp.gt.f32.partialorder %v1373_v54, 0.0 }
 0x6cd   : > { %v1508_v59 = vpop.permute.xlu1 %1507  ;;  %v1387_v60 = vsel %vm1379_vm11, %v1375_v48, %v1383_v55 }
 0x6ce   : > { %v1520_v61 = vadd.f32 %v1517_v53, %v1508_v59  ;;  %v1391_v63 = vadd.f32 %v1387_v60, %v7959_v16  ;;  %v1385_v1 = vsel %vm1377_vm12, %v1373_v54, %v1381_v56 }
 0x6cf   : > { %v1389_v2 = vadd.f32 %v1385_v1, %v7968_v29 }
 0x6d0   : > { %v1528_v3 = vmul.f32 0.2, %v1520_v61  ;;  %v1399_v5 = vsel %vm879_vm3, %v1391_v63, -inf  ;;  %vm1524_vm13 = vcmp.gt.f32.partialorder %v1520_v61, 0.0 }
 0x6d1   : > { %v1500_v6 = vpop.permute.xlu1 %1499  ;;  %1400 = vmax.xlane.f32.xlu0 %v1399_v5  ;;  %v1393_v7 = vsel %vm879_vm3, %v1389_v2, -inf }
 0x6d2   : > { %v1518_v8 = vadd.f32 %v1517_v53, %v1500_v6  ;;  %1394 = vmax.xlane.f32.xlu1 %v1393_v7  ;;  %v1532_v10 = vsel %vm1524_vm13, %v1520_v61, %v1528_v3 }
 0x6d3   : > { %v8060_v11 = vadd.f32 %v1532_v10, %v7959_v16 }
 0x6d4   : > { %v1526_v13 = vmul.f32 0.2, %v1518_v8  ;;  %vm1522_vm14 = vcmp.gt.f32.partialorder %v1518_v8, 0.0 }
 0x6d5   : > { %v1544_v14 = vsel %vm879_vm3, %v8060_v11, -inf }
 0x6d6   : > { %v1367_v17 = vpop.permute.xlu1 %1366  ;;  %1545 = vmax.xlane.f32.xlu0 %v1544_v14  ;;  %v1530_v19 = vsel %vm1522_vm14, %v1518_v8, %v1526_v13 }
 0x6d7   : > { %v1376_v20 = vadd.f32 %v1372_v45, %v1367_v17  ;;  %v1534_v21 = vadd.f32 %v1530_v19, %v7968_v29 }
 0x6d9   : > { %v1384_v23 = vmul.f32 0.2, %v1376_v20  ;;  %v1538_v24 = vsel %vm879_vm3, %v1534_v21, -inf  ;;  %vm1380_vm15 = vcmp.gt.f32.partialorder %v1376_v20, 0.0 }
 0x6da   : > { %v1357_v25 = vpop.permute.xlu1 %1356  ;;  %1539 = vmax.xlane.f32.xlu0 %v1538_v24 }
 0x6db   : > { %v1374_v26 = vadd.f32 %v1372_v45, %v1357_v25  ;;  %v1388_v16 = vsel %vm1380_vm15, %v1376_v20, %v1384_v23 }
 0x6dc   : > { %v1392_v27 = vadd.f32 %v1388_v16, %v7971_v31 }
 0x6dd   : > { %v1382_v62 = vmul.f32 0.2, %v1374_v26  ;;  %vm1378_vm2 = vcmp.gt.f32.partialorder %v1374_v26, 0.0 }
 0x6de   : > { %v1402_v28 = vsel %vm879_vm3, %v1392_v27, -inf }
 0x6df   : > { %v1504_v0 = vpop.permute.xlu1 %1503  ;;  %1403 = vmax.xlane.f32.xlu1 %v1402_v28  ;;  %v1386_v18 = vsel %vm1378_vm2, %v1374_v26, %v1382_v62 }
 0x6e0   : > { %v1519_v30 = vadd.f32 %v1517_v53, %v1504_v0  ;;  %v1390_v29 = vadd.f32 %v1386_v18, %v7982_v4 }
 0x6e2   : > { %v1396_v22 = vsel %vm879_vm3, %v1390_v29, -inf  ;;  %v1527_v32 = vmul.f32 0.2, %v1519_v30  ;;  %vm1523_vm4 = vcmp.gt.f32.partialorder %v1519_v30, 0.0 }
 0x6e3   : > { %v1512_v34 = vpop.permute.xlu1 %1511  ;;  %1397 = vmax.xlane.f32.xlu0 %v1396_v22 }
 0x6e4   : > { %v1521_v36 = vadd.f32 %v1517_v53, %v1512_v34  ;;  %v1531_v39 = vsel %vm1523_vm4, %v1519_v30, %v1527_v32 }
 0x6e5   : > { %v1535_v44 = vadd.f32 %v1531_v39, %v7982_v4  ;;  %v7022_v39 = vld [vmem:[%s8805_s3 + $0x50] sm:$0xff]  }
 0x6e6   : > { %v1529_v40 = vmul.f32 0.2, %v1521_v36  ;;  %vm1525_vm5 = vcmp.gt.f32.partialorder %v1521_v36, 0.0 }
 0x6e7   : > { %v1541_v45 = vsel %vm879_vm3, %v1535_v44, -inf }
 0x6e8   : > { %v1533_v15 = vsel %vm1525_vm5, %v1521_v36, %v1529_v40  ;;  %v7020_v40 = vld [vmem:[%s8805_s3 + $0x40] sm:$0xff]  }
 0x6e9   : > { %v1537_v41 = vadd.f32 %v1533_v15, %v7971_v31  ;;  %v7021_v15 = vld [vmem:[%s8805_s3 + $0x48] sm:$0xff]   ;;  %6579 = vmatprep.subr.bf16.mxu0 %v7020_v40 }
 0x6eb   : > { %v1547_v43 = vsel %vm879_vm3, %v1537_v41, -inf }
 0x6ec   : > { %1548 = vmax.xlane.f32.xlu1 %v1547_v43  ;;  %v8106_v43 = vld [vmem:[#allocation4 + $0x4] sm:$0x3] }
 0x6f0   : > { %1542 = vmax.xlane.f32.xlu1 %v1541_v45 }
 0x6f9   : > { %1586 = vrot.lane.b32.xlu0 %v8043_v35, %s7634_s12 }
 0x701   : > { %1588 = vrot.lane.b32.xlu1 %v8041_v33, %s7634_s12 }
 0x75e   : > { %v1401_v46 = vpop.xlane.xlu0 %1400 }
 0x75f   : > { %v1407_v48 = vsub.f32 %v1391_v63, %v1401_v46  ;;  %v1395_v52 = vpop.xlane.xlu1 %1394 }
 0x760   : > { %v1405_v53 = vsub.f32 %v1389_v2, %v1395_v52 }
 0x761   : > { %v1413_v54 = vmul.f32 1.442695, %v1407_v48 }
 0x762   : > { %v1409_v31 = vmul.f32 1.442695, %v1405_v53 }
 0x763   : > { %7172 = vpow2.f32 %v1413_v54  ;;  %v1546_v55 = vpop.xlane.xlu0 %1545 }
 0x764   : > { %7174 = vpow2.f32 %v1409_v31  ;;  %v1552_v33 = vsub.f32 %v8060_v11, %v1546_v55 }
 0x766   : > { %v1558_v7 = vmul.f32 1.442695, %v1552_v33 }
 0x767   : > { %v1540_v4 = vpop.xlane.xlu0 %1539 }
 0x768   : > { %v1550_v56 = vsub.f32 %v1534_v21, %v1540_v4 }
 0x76a   : > { %v1554_v59 = vmul.f32 1.442695, %v1550_v56 }
 0x76c   : > { %7176 = vpow2.f32 %v1554_v59  ;;  %v1404_v60 = vpop.xlane.xlu1 %1403 }
 0x76d   : > { %v7173_v61 = vpop.eup %7172  ;;  %v1408_v1 = vsub.f32 %v1392_v27, %v1404_v60 }
 0x76e   : > { %v7175_v35 = vpop.eup %7174  ;;  %v1423_v3 = vsel %vm879_vm3, %v7173_v61, 0.0 }
 0x76f   : > { %v1415_v63 = vmul.f32 1.442695, %v1408_v1  ;;  %1424 = vadd.xlane.f32.xlu0 %v1423_v3  ;;  %v1417_v2 = vsel %vm879_vm3, %v7175_v35, 0.0 }
 0x770   : > { %v1398_v5 = vpop.xlane.xlu0 %1397  ;;  %1418 = vadd.xlane.f32.xlu1 %v1417_v2 }
 0x771   : > { %7178 = vpow2.f32 %v1415_v63  ;;  %v1406_v6 = vsub.f32 %v1390_v29, %v1398_v5 }
 0x773   : > { %v1411_v8 = vmul.f32 1.442695, %v1406_v6 }
 0x774   : > { %v1587_v10 = vpop.permute.xlu0 %1586 }
 0x775   : > { %7180 = vpow2.f32 %v1411_v8  ;;  %6571 = vmatprep.subr.bf16.mxu1 %v1587_v10 }
 0x776   : > { %v7177_v13 = vpop.eup %7176  ;;  %6572 = vmatpush3.bf16.msra.mxu1 %v1587_v10  ;;  %7182 = vpow2.f32 %v1558_v7 }
 0x777   : > { %v1562_v14 = vsel %vm879_vm3, %v7177_v13, 0.0 }
 0x778   : > { %1563 = vadd.xlane.f32.xlu0 %v1562_v14 }
 0x779   : > { %v1549_v11 = vpop.xlane.xlu1 %1548 }
 0x77a   : > { %v1553_v17 = vsub.f32 %v1537_v41, %v1549_v11  ;;  %v7023_v41 = vld [vmem:[%s8805_s3 + $0x58] sm:$0xff]  }
 0x77b   : > { %v7179_v19 = vpop.eup %7178 }
 0x77c   : > { %v1426_v20 = vsel %vm879_vm3, %v7179_v19, 0.0  ;;  %v1560_v21 = vmul.f32 1.442695, %v1553_v17  ;;  %v1438_v0 = vpack.c.bf16 %v7179_v19, %v7173_v61 }
 0x77d   : > { %1427 = vadd.xlane.f32.xlu1 %v1426_v20  ;;  %v1543_v23 = vpop.xlane.xlu1 %1542 }
 0x77e   : > { %v1551_v24 = vsub.f32 %v1535_v44, %v1543_v23  ;;  %7184 = vpow2.f32 %v1560_v21  ;;  %v1812_v44 = vrot.slane %v8106_v43, %v7901_v38 }
 0x77f   : > { %v7181_v25 = vpop.eup %7180 }
 0x780   : > { %v1556_v26 = vmul.f32 1.442695, %v1551_v24  ;;  %v1420_v16 = vsel %vm879_vm3, %v7181_v25, 0.0  ;;  %v1437_v27 = vpack.c.bf16 %v7181_v25, %v7175_v35  ;;  %v7183_v62 = vpop.eup %7182  ;;  %v8110_v45 = vrot.slane %v1812_v44, 1  ;;  %v1655_v25 = vld [vmem:[#allocation10 + $0x21] ss:$0 sm:$0xff] }
 0x781   : > { %1421 = vadd.xlane.f32.xlu0 %v1420_v16  ;;  %v1589_v28 = vpop.permute.xlu1 %1588  ;;  %v1568_v18 = vsel %vm879_vm3, %v7183_v62, 0.0 }
 0x782   : > { %7186 = vpow2.f32 %v1556_v26  ;;  %6567 = vmatprep.mubr.msk.bf16.mxu0 %vm879_vm3, %v1437_v27  ;;  %6573 = vmatprep.subr.bf16.mxu1 %v1589_v28 }
 0x783   : > { %6568 = vmatmul.mubr.msk.bf16.vlgmr.msra.gmra.mrb[16].mxu0 %vm879_vm3, %v1438_v0  ;;  %6574 = vmatpush3.bf16.msra.mxu1 %v1589_v28 }
 0x784   : > { %6591 = vmatprep.subr.bf16.mxu1 %v7630_v42  ;;  %6580 = vmatpush3.bf16.msra.mxu0 %v7020_v40 }
 0x785   : > { %1569 = vadd.xlane.f32.xlu0 %v1568_v18  ;;  %6581 = vmatprep.subr.bf16.mxu0 %v7021_v15 }
 0x788   : > { %v7185_v30 = vpop.eup %7184  ;;  %6582 = vmatpush3.bf16.msra.mxu0 %v7021_v15 }
 0x789   : > { %v1583_v32 = vpack.c.bf16 %v7185_v30, %v7183_v62  ;;  %v1571_v36 = vsel %vm879_vm3, %v7185_v30, 0.0  ;;  %6583 = vmatprep.subr.bf16.mxu0 %v7022_v39 }
 0x78c   : > { %v7187_v29 = vpop.eup %7186  ;;  %6584 = vmatpush3.bf16.msra.mxu0 %v7022_v39 }
 0x78d   : > { %v1565_v22 = vsel %vm879_vm3, %v7187_v29, 0.0  ;;  %v1582_v34 = vpack.c.bf16 %v7187_v29, %v7177_v13  ;;  %6585 = vmatprep.subr.bf16.mxu0 %v7023_v41 }
 0x78e   : > { %1566 = vadd.xlane.f32.xlu1 %v1565_v22 }
 0x78f   : > { %6575 = vmatprep.mubr.msk.bf16.mxu1 %vm879_vm3, %v1582_v34 }
 0x790   : > { %6576 = vmatmul.mubr.msk.bf16.vlgmr.msra.gmra.mrb[24].mxu1 %vm879_vm3, %v1583_v32  ;;  %6586 = vmatpush3.bf16.msra.mxu0 %v7023_v41 }
 0x791   : > { %6595 = vmatprep.mubr.msk.bf16.mxu1 %vm7631_vm1, %v7630_v42  ;;  %6877 = vmatprep.subr.msk.bf16.mxu0 %vm488_vm0, %v8110_v45 }
 0x792   : > { %1572 = vadd.xlane.f32.xlu1 %v1571_v36 }
 0x7fc   : > { %v1425_v46 = vpop.xlane.xlu0 %1424 }
 0x7fd   : > { %v1419_v48 = vpop.xlane.xlu1 %1418  ;;  %7188 = vrcp.f32 %v1425_v46 }
 0x7fe   : > { %7190 = vrcp.f32 %v1419_v48 }
 0x805   : > { %v1564_v52 = vpop.xlane.xlu0 %1563 }
 0x806   : > { %7192 = vrcp.f32 %v1564_v52 }
 0x807   : > { %v7189_v1 = vpop.eup %7188 }
 0x808   : > { %v7191_v35 = vpop.eup %7190  ;;  %v1435_v7 = vmul.f32 0.5, %v7189_v1 }
 0x809   : > { %v1433_v10 = vmul.f32 0.5, %v7191_v35 }
 0x80a   : > { %v1428_v53 = vpop.xlane.xlu1 %1427 }
 0x80b   : > { %7194 = vrcp.f32 %v1428_v53 }
 0x80e   : > { %v1422_v54 = vpop.xlane.xlu0 %1421 }
 0x810   : > { %v7193_v3 = vpop.eup %7192 }
 0x811   : > { %v1578_v14 = vmul.f32 0.5, %v7193_v3 }
 0x812   : > { %v1570_v55 = vpop.xlane.xlu0 %1569 }
 0x813   : > { %7196 = vrcp.f32 %v1570_v55 }
 0x814   : > { %7198 = vrcp.f32 %v1422_v54 }
 0x815   : > { %v7195_v33 = vpop.eup %7194 }
 0x816   : > { %v1436_v17 = vmul.f32 0.5, %v7195_v33 }
 0x81b   : > { %v1567_v31 = vpop.xlane.xlu1 %1566 }
 0x81d   : > { %v7197_v63 = vpop.eup %7196 }
 0x81e   : > { %v7199_v2 = vpop.eup %7198  ;;  %v1580_v8 = vmul.f32 0.5, %v7197_v63 }
 0x81f   : > { %v1573_v4 = vpop.xlane.xlu1 %1572  ;;  %v1434_v24 = vmul.f32 0.5, %v7199_v2 }
 0x820   : > { %7200 = vrcp.f32 %v1573_v4 }
 0x821   : > { %7202 = vrcp.f32 %v1567_v31 }
 0x82a   : > { %v7201_v5 = vpop.eup %7200 }
 0x82b   : > { %v7203_v6 = vpop.eup %7202  ;;  %v1581_v21 = vmul.f32 0.5, %v7201_v5 }
 0x82c   : > { %v1579_v27 = vmul.f32 0.5, %v7203_v6 }
 0x856   : > { %v6569_v56 = vpop.f32.mrb[16].mxu0 }
 0x857   : > { %v1479_v59 = vpop.f32.mrb[17].mxu0  ;;  %v1496_v11 = vmul.f32 %v6569_v56, %v1435_v7 }
 0x858   : > { %v6570_v60 = vpop.f32.mrb[18].mxu0  ;;  %v1494_v23 = vmul.f32 %v1479_v59, %v1433_v10 }
 0x859   : > { %v1482_v61 = vpop.f32.mrb[19].mxu0  ;;  %v1497_v62 = vmul.f32 %v6570_v60, %v1436_v17 }
 0x85a   : > { %v1495_v30 = vmul.f32 %v1482_v61, %v1434_v24  ;;  %v8176_v24 = vld [vmem:[%s7953_s18 + $0x10] sm:$0xff] }
 0x863   : > { %v6577_v13 = vpop.f32.mrb[24].mxu1 }
 0x864   : > { %v1649_v19 = vmul.f32 %v6577_v13, %v1580_v8  ;;  %v1632_v20 = vpop.f32.mrb[25].mxu1 }
 0x865   : > { %v1647_v26 = vmul.f32 %v1632_v20, %v1578_v14  ;;  %v6578_v16 = vpop.f32.mrb[26].mxu1 }
 0x866   : > { %v1653_v28 = vadd.f32 %v1649_v19, %v1496_v11  ;;  %v1650_v0 = vmul.f32 %v6578_v16, %v1581_v21  ;;  %v1635_v18 = vpop.f32.mrb[27].mxu1  ;;  %v8180_v16 = vld [vmem:[%s7953_s18] sm:$0xff] }
 0x867   : > { %v1651_v29 = vadd.f32 %v1647_v26, %v1494_v23  ;;  %v1648_v22 = vmul.f32 %v1635_v18, %v1579_v27 }
 0x868   : > { %v1658_v34 = vadd.f32 %v1655_v25, %v1653_v28  ;;  %v1654_v32 = vadd.f32 %v1650_v0, %v1497_v62 }
 0x869   : > { %v1656_v36 = vadd.f32 %v1655_v25, %v1651_v29  ;;  %v1652_v40 = vadd.f32 %v1648_v22, %v1495_v30 }
 0x86a   : > { %v1659_v15 = vadd.f32 %v1655_v25, %v1654_v32  ;;  %v8118_v44 = vadd.f32 %v1658_v34, %v7914_v51 }
 0x86b   : > { %v8115_v39 = vadd.f32 %v1656_v36, %v7910_v49  ;;  %v1657_v41 = vadd.f32 %v1655_v25, %v1652_v40 }
 0x86c   : > { %v8121_v46 = vadd.f32 %v1659_v15, %v7908_v47  ;;  %v1666_v31 = vmax.f32 %v8118_v44, 0.0 }
 0x86d   : > { %v8124_v48 = vadd.f32 %v1657_v41, %v7912_v50  ;;  %v1664_v53 = vmax.f32 %v8115_v39, 0.0  ;;  %v1815_v50 = vsel %vm488_vm0, %v8110_v45, 0 }
 0x86e   : > { %v1667_v52 = vmax.f32 %v8121_v46, 0.0 }
 0x86f   : > { %v1665_v54 = vmax.f32 %v8124_v48, 0.0 }
 0x870   : > { %v8140_v47 = vpack.c.bf16 %v1667_v52, %v1666_v31 }
 0x871   : > { %v8134_v49 = vpack.c.bf16 %v1665_v54, %v1664_v53 }
 0x872   : > { %v1707_v55 = vsel %vm488_vm0, %v8140_v47, 0 }
 0x873   : > { %6587 = vmatprep.mubr.msk.bf16.mxu0 %vm488_vm0, %v8134_v49  ;;  %v1704_v51 = vsel %vm488_vm0, %v8134_v49, 0 }
 0x874   : > { %6588 = vmatmul.mubr.msk.bf16.vlgmr.msra.gmra.mrb[20].mxu0 %vm488_vm0, %v8140_v47  ;;  %6592 = vmatpush3.bf16.xpose.msra.mxu1 %v1704_v51 }
 0x875   : > { %6600 = vmatpush3.bf16.xpose.msra.mxu0 %v1815_v50  ;;  %6601 = vmatprep.mubr.msk.bf16.mxu0 %vm488_vm0, %v8134_v49 }
 0x876   : > { %6593 = vmatprep.subr.bf16.mxu1 %v7630_v42 }
 0x87c   : > { %6594 = vmatpush3.bf16.xpose.msra.mxu1 %v1707_v55  ;;  %6602 = vmatmul.mubr.msk.bf16.vlgmr.msra.gmra.mrb[24].mxu0 %vm488_vm0, %v8140_v47 }
 0x883   : > { %6596 = vmatmul.mubr.msk.bf16.vlgmr.msra.gmra.mrb[28].mxu1 %vm488_vm0, %v8106_v43 }
 0x947   : > { %v6589_v45 = vpop.f32.mrb[20].mxu0 }
 0x948   : > { %v1743_v4 = vpop.f32.mrb[21].mxu0 }
 0x949   : > { %v6590_v56 = vpop.f32.mrb[22].mxu0 }
 0x94a   : > { %v8159_v59 = vpack.c.bf16 %v6590_v56, %v6589_v45  ;;  %v1746_v60 = vpop.f32.mrb[23].mxu0  ;;  %v8189_v56 = vld [vmem:[%s7953_s18 + $0x18] sm:$0xff] }
 0x94b   : > { %v8161_v61 = vpack.c.bf16 %v1746_v60, %v1743_v4 }
 0x94d   : > { %6605 = vmatprep.subr.bf16.mxu1 %v8161_v61 }
 0x94e   : > { %6606 = vmatpush3.bf16.msra.mxu1 %v8161_v61 }
 0x94f   : > { %v6603_v1 = vpop.f32.mrb[24].mxu0  ;;  %6607 = vmatprep.subr.bf16.mxu1 %v8159_v59 }
 0x950   : > { %1878 = vperm.xlu1 %6975, %v6603_v1   ;;  %v1851_v35 = vpop.f32.mrb[25].mxu0 }
 0x951   : > { %1868 = vperm.xlu0 %6970, %v1851_v35   ;;  %v6604_v3 = vpop.f32.mrb[26].mxu0 }
 0x952   : > { %v1854_v43 = vpop.f32.mrb[27].mxu0  ;;  %6608 = vmatpush3.bf16.msra.mxu1 %v8159_v59 }
 0x954   : > { %6976 = vset.pattern.permute.xlu1 %v7633_v58 }
 0x955   : > { %2016 = vperm.xlu1 %6976, %v1851_v35   ;;  %6978 = vset.pattern.permute.xlu0 %v7633_v58 }
 0x956   : > { %2020 = vperm.xlu0 %6978, %v1854_v43   ;;  %v1799_v33 = vpop.f32.mrb[28].mxu1 }
 0x957   : > { %v6597_v63 = vpop.f32.mrb[29].mxu1  ;;  %v1889_v6 = vrot.slane %v1799_v33, %v7946_v9  ;;  %v2034_v13 = vrot.slane %v1799_v33, %v7956_v12 }
 0x958   : > { %v1802_v2 = vpop.f32.mrb[30].mxu1 }
 0x959   : > { %6977 = vset.pattern.permute.xlu1 %v7632_v57  ;;  %v6598_v5 = vpop.f32.mrb[31].mxu1 }
 0x95a   : > { %1883 = vperm.xlu1 %6977, %v6604_v3   ;;  %2024 = vperm.xlu0 %6978, %v6603_v1   ;;  %v8195_v5 = vld [vmem:[%s7953_s18 + $0x8] sm:$0xff] }
 0x95e   : > { %1873 = vperm.xlu1 %6977, %v1854_v43   ;;  %6981 = vset.pattern.permute.xlu0 %v7632_v57 }
 0x962   : > { %6979 = vset.pattern.permute.xlu1 %v7633_v58 }
 0x963   : > { %2028 = vperm.xlu1 %6979, %v6604_v3  }
 0x967   : > { %6980 = vset.pattern.permute.xlu1 %v7632_v57 }
 0x9cf   : > { %v1879_v7 = vpop.permute.xlu1 %1878 }
 0x9d0   : > { %v1892_v8 = vadd.f32 %v1889_v6, %v1879_v7  ;;  %v1869_v10 = vpop.permute.xlu0 %1868 }
 0x9d1   : > { %v1890_v14 = vadd.f32 %v1889_v6, %v1869_v10 }
 0x9d2   : > { %v1900_v11 = vmul.f32 0.2, %v1892_v8  ;;  %vm1896_vm6 = vcmp.gt.f32.partialorder %v1892_v8, 0.0 }
 0x9d3   : > { %v1898_v17 = vmul.f32 0.2, %v1890_v14  ;;  %vm1894_vm7 = vcmp.gt.f32.partialorder %v1890_v14, 0.0 }
 0x9d4   : > { %v2017_v19 = vpop.permute.xlu1 %2016  ;;  %v1904_v20 = vsel %vm1896_vm6, %v1892_v8, %v1900_v11 }
 0x9d5   : > { %v2035_v21 = vadd.f32 %v2034_v13, %v2017_v19  ;;  %v2021_v23 = vpop.permute.xlu0 %2020  ;;  %v1908_v25 = vadd.f32 %v8176_v24, %v1904_v20  ;;  %v1902_v26 = vsel %vm1894_vm7, %v1890_v14, %v1898_v17 }
 0x9d6   : > { %v1906_v27 = vadd.f32 %v8180_v16, %v1902_v26  ;;  %v2036_v45 = vadd.f32 %v2034_v13, %v2021_v23 }
 0x9d7   : > { %v2043_v62 = vmul.f32 0.2, %v2035_v21  ;;  %v1916_v28 = vsel %vm879_vm3, %v1908_v25, -inf  ;;  %vm2039_vm8 = vcmp.gt.f32.partialorder %v2035_v21, 0.0 }
 0x9d8   : > { %1917 = vmax.xlane.f32.xlu1 %v1916_v28  ;;  %v1910_v0 = vsel %vm879_vm3, %v1906_v27, -inf  ;;  %v2044_v63 = vmul.f32 0.2, %v2036_v45  ;;  %vm2040_vm12 = vcmp.gt.f32.partialorder %v2036_v45, 0.0 }
 0x9d9   : > { %v1884_v18 = vpop.permute.xlu1 %1883  ;;  %v2025_v30 = vpop.permute.xlu0 %2024  ;;  %1911 = vmax.xlane.f32.xlu0 %v1910_v0  ;;  %v2047_v29 = vsel %vm2039_vm8, %v2035_v21, %v2043_v62 }
 0x9da   : > { %v1893_v22 = vadd.f32 %v1889_v6, %v1884_v18  ;;  %v2037_v34 = vadd.f32 %v2034_v13, %v2025_v30  ;;  %v2051_v32 = vadd.f32 %v8180_v16, %v2047_v29  ;;  %v2048_v14 = vsel %vm2040_vm12, %v2036_v45, %v2044_v63 }
 0x9db   : > { %v2052_v19 = vadd.f32 %v8195_v5, %v2048_v14 }
 0x9dc   : > { %v1901_v36 = vmul.f32 0.2, %v1893_v22  ;;  %v2045_v40 = vmul.f32 0.2, %v2037_v34  ;;  %v2055_v15 = vsel %vm879_vm3, %v2051_v32, -inf  ;;  %vm2041_vm9 = vcmp.gt.f32.partialorder %v2037_v34, 0.0 }
 0x9dd   : > { %v1874_v41 = vpop.permute.xlu1 %1873  ;;  %2056 = vmax.xlane.f32.xlu0 %v2055_v15  ;;  %vm1897_vm10 = vcmp.gt.f32.partialorder %v1893_v22, 0.0 }
 0x9de   : > { %v1891_v50 = vadd.f32 %v1889_v6, %v1874_v41  ;;  %v2049_v51 = vsel %vm2041_vm9, %v2037_v34, %v2045_v40  ;;  %v1905_v55 = vsel %vm1897_vm10, %v1893_v22, %v1901_v36 }
 0x9df   : > { %v2053_v4 = vadd.f32 %v8176_v24, %v2049_v51  ;;  %v1909_v60 = vadd.f32 %v8189_v56, %v1905_v55 }
 0x9e0   : > { %v1899_v1 = vmul.f32 0.2, %v1891_v50  ;;  %vm1895_vm11 = vcmp.gt.f32.partialorder %v1891_v50, 0.0 }
 0x9e1   : > { %v2061_v35 = vsel %vm879_vm3, %v2053_v4, -inf  ;;  %v1919_v3 = vsel %vm879_vm3, %v1909_v60, -inf }
 0x9e2   : > { %v2029_v43 = vpop.permute.xlu1 %2028  ;;  %2062 = vmax.xlane.f32.xlu1 %v2061_v35  ;;  %1920 = vmax.xlane.f32.xlu0 %v1919_v3  ;;  %v1903_v33 = vsel %vm1895_vm11, %v1891_v50, %v1899_v1 }
 0x9e3   : > { %v2038_v2 = vadd.f32 %v2034_v13, %v2029_v43  ;;  %v1907_v6 = vadd.f32 %v8195_v5, %v1903_v33  ;;  %v2058_v13 = vsel %vm879_vm3, %v2052_v19, -inf }
 0x9e5   : > { %v2046_v7 = vmul.f32 0.2, %v2038_v2  ;;  %v1913_v8 = vsel %vm879_vm3, %v1907_v6, -inf  ;;  %vm2042_vm13 = vcmp.gt.f32.partialorder %v2038_v2, 0.0 }
 0x9e6   : > { %1914 = vmax.xlane.f32.xlu1 %v1913_v8 }
 0x9e7   : > { %v2050_v10 = vsel %vm2042_vm13, %v2038_v2, %v2046_v7 }
 0x9e8   : > { %v2054_v11 = vadd.f32 %v8189_v56, %v2050_v10 }
 0x9ea   : > { %v2064_v17 = vsel %vm879_vm3, %v2054_v11, -inf }
 0x9eb   : > { %2065 = vmax.xlane.f32.xlu0 %v2064_v17 }
 0x9ef   : > { %2059 = vmax.xlane.f32.xlu0 %v2058_v13 }
 0x9f7   : > { %2103 = vrot.lane.b32.xlu1 %v8161_v61, %s7634_s12 }
 0xa05   : > { %2105 = vrot.lane.b32.xlu0 %v8159_v59, %s7634_s12 }
 0xa65   : > { %v1918_v20 = vpop.xlane.xlu1 %1917 }
 0xa66   : > { %v1924_v21 = vsub.f32 %v1908_v25, %v1918_v20  ;;  %v1912_v23 = vpop.xlane.xlu0 %1911 }
 0xa67   : > { %v1922_v26 = vsub.f32 %v1906_v27, %v1912_v23 }
 0xa68   : > { %v1930_v62 = vmul.f32 1.442695, %v1924_v21 }
 0xa69   : > { %v1926_v28 = vmul.f32 1.442695, %v1922_v26  ;;  %v7024_v26 = vld [vmem:[%s8805_s3 + $0x60] sm:$0xff]  }
 0xa6a   : > { %7204 = vpow2.f32 %v1930_v62  ;;  %v2057_v0 = vpop.xlane.xlu0 %2056  ;;  %6621 = vmatprep.subr.bf16.mxu1 %v7024_v26  ;;  %v7025_v62 = vld [vmem:[%s8805_s3 + $0x68] sm:$0xff]  }
 0xa6b   : > { %v2067_v18 = vsub.f32 %v2051_v32, %v2057_v0  ;;  %7206 = vpow2.f32 %v1926_v28  ;;  %v7026_v28 = vld [vmem:[%s8805_s3 + $0x70] sm:$0xff]   ;;  %v7027_v0 = vld [vmem:[%s8805_s3 + $0x78] sm:$0xff]  }
 0xa6d   : > { %v2071_v30 = vmul.f32 1.442695, %v2067_v18  ;;  %v8234_v18 = vld [vmem:[#allocation4 + $0x6] sm:$0x3] }
 0xa6f   : > { %v2063_v29 = vpop.xlane.xlu1 %2062  ;;  %v1921_v22 = vpop.xlane.xlu0 %1920  ;;  %7208 = vpow2.f32 %v2071_v30  ;;  %v2325_v30 = vrot.slane %v8234_v18, %v7901_v38 }
 0xa70   : > { %v2069_v34 = vsub.f32 %v2053_v4, %v2063_v29  ;;  %v1925_v36 = vsub.f32 %v1909_v60, %v1921_v22 }
 0xa71   : > { %v8238_v29 = vrot.slane %v2325_v30, 1 }
 0xa72   : > { %v2075_v61 = vmul.f32 1.442695, %v2069_v34  ;;  %v1932_v40 = vmul.f32 1.442695, %v1925_v36 }
 0xa73   : > { %v1915_v15 = vpop.xlane.xlu1 %1914 }
 0xa74   : > { %v7205_v59 = vpop.eup %7204  ;;  %7210 = vpow2.f32 %v2075_v61  ;;  %v1923_v25 = vsub.f32 %v1907_v6, %v1915_v15 }
 0xa75   : > { %7212 = vpow2.f32 %v1932_v40  ;;  %v1940_v27 = vsel %vm879_vm3, %v7205_v59, 0.0  ;;  %v7207_v41 = vpop.eup %7206 }
 0xa76   : > { %v1928_v50 = vmul.f32 1.442695, %v1923_v25  ;;  %1941 = vadd.xlane.f32.xlu1 %v1940_v27  ;;  %v1934_v45 = vsel %vm879_vm3, %v7207_v41, 0.0 }
 0xa77   : > { %v2104_v32 = vpop.permute.xlu1 %2103 }
 0xa78   : > { %7214 = vpow2.f32 %v1928_v50  ;;  %6613 = vmatprep.subr.bf16.mxu0 %v2104_v32  ;;  %v2066_v51 = vpop.xlane.xlu0 %2065 }
 0xa79   : > { %v2070_v55 = vsub.f32 %v2054_v11, %v2066_v51  ;;  %6614 = vmatpush3.bf16.msra.mxu0 %v2104_v32  ;;  %v7209_v4 = vpop.eup %7208 }
 0xa7a   : > { %1935 = vadd.xlane.f32.xlu1 %v1934_v45  ;;  %v2079_v3 = vsel %vm879_vm3, %v7209_v4, 0.0 }
 0xa7b   : > { %v2077_v60 = vmul.f32 1.442695, %v2070_v55 }
 0xa7c   : > { %v2060_v1 = vpop.xlane.xlu0 %2059 }
 0xa7d   : > { %v2068_v35 = vsub.f32 %v2052_v19, %v2060_v1  ;;  %7216 = vpow2.f32 %v2077_v60 }
 0xa7e   : > { %v7211_v43 = vpop.eup %7210  ;;  %2080 = vadd.xlane.f32.xlu1 %v2079_v3 }
 0xa7f   : > { %v7213_v33 = vpop.eup %7212  ;;  %v2073_v63 = vmul.f32 1.442695, %v2068_v35  ;;  %v2085_v7 = vsel %vm879_vm3, %v7211_v43, 0.0 }
 0xa80   : > { %v1943_v2 = vsel %vm879_vm3, %v7213_v33, 0.0  ;;  %v2106_v6 = vpop.permute.xlu0 %2105  ;;  %v1955_v11 = vpack.c.bf16 %v7213_v33, %v7205_v59 }
 0xa81   : > { %7218 = vpow2.f32 %v2073_v63  ;;  %1944 = vadd.xlane.f32.xlu0 %v1943_v2  ;;  %6615 = vmatprep.subr.bf16.mxu0 %v2106_v6 }
 0xa82   : > { %v7215_v8 = vpop.eup %7214  ;;  %2086 = vadd.xlane.f32.xlu1 %v2085_v7  ;;  %6616 = vmatpush3.bf16.msra.mxu0 %v2106_v6 }
 0xa83   : > { %v1937_v10 = vsel %vm879_vm3, %v7215_v8, 0.0  ;;  %v1954_v14 = vpack.c.bf16 %v7215_v8, %v7207_v41  ;;  %6633 = vmatprep.subr.bf16.mxu0 %v7630_v42 }
 0xa85   : > { %1938 = vadd.xlane.f32.xlu0 %v1937_v10  ;;  %6609 = vmatprep.mubr.msk.bf16.mxu1 %vm879_vm3, %v1954_v14 }
 0xa86   : > { %6610 = vmatmul.mubr.msk.bf16.vlgmr.msra.gmra.mrb[32].mxu1 %vm879_vm3, %v1955_v11 }
 0xa87   : > { %v7217_v17 = vpop.eup %7216  ;;  %6622 = vmatpush3.bf16.msra.mxu1 %v7024_v26 }
 0xa88   : > { %v2100_v21 = vpack.c.bf16 %v7217_v17, %v7211_v43  ;;  %v2088_v23 = vsel %vm879_vm3, %v7217_v17, 0.0  ;;  %6623 = vmatprep.subr.bf16.mxu1 %v7025_v62 }
 0xa8b   : > { %v7219_v19 = vpop.eup %7218  ;;  %6624 = vmatpush3.bf16.msra.mxu1 %v7025_v62 }
 0xa8c   : > { %v2082_v13 = vsel %vm879_vm3, %v7219_v19, 0.0  ;;  %v2099_v20 = vpack.c.bf16 %v7219_v19, %v7209_v4  ;;  %6625 = vmatprep.subr.bf16.mxu1 %v7026_v28 }
 0xa8d   : > { %2083 = vadd.xlane.f32.xlu0 %v2082_v13  ;;  %v2172_v13 = vld [vmem:[#allocation10 + $0x22] ss:$0 sm:$0xff] }
 0xa8e   : > { %6617 = vmatprep.mubr.msk.bf16.mxu0 %vm879_vm3, %v2099_v20 }
 0xa8f   : > { %6618 = vmatmul.mubr.msk.bf16.vlgmr.msra.gmra.mrb[28].mxu0 %vm879_vm3, %v2100_v21  ;;  %6626 = vmatpush3.bf16.msra.mxu1 %v7026_v28 }
 0xa90   : > { %6637 = vmatprep.mubr.msk.bf16.mxu0 %vm7631_vm1, %v7630_v42  ;;  %6627 = vmatprep.subr.bf16.mxu1 %v7027_v0 }
 0xa91   : > { %2089 = vadd.xlane.f32.xlu0 %v2088_v23 }
 0xa93   : > { %6628 = vmatpush3.bf16.msra.mxu1 %v7027_v0 }
 0xa94   : > { %6878 = vmatprep.subr.msk.bf16.mxu1 %vm488_vm0, %v8238_v29 }
 0xb03   : > { %v1942_v22 = vpop.xlane.xlu1 %1941 }
 0xb04   : > { %7220 = vrcp.f32 %v1942_v22 }
 0xb07   : > { %v1936_v36 = vpop.xlane.xlu1 %1935 }
 0xb08   : > { %7222 = vrcp.f32 %v1936_v36 }
 0xb0b   : > { %v2081_v40 = vpop.xlane.xlu1 %2080 }
 0xb0c   : > { %7224 = vrcp.f32 %v2081_v40 }
 0xb0e   : > { %v1945_v34 = vpop.xlane.xlu0 %1944  ;;  %v7221_v41 = vpop.eup %7220 }
 0xb0f   : > { %v2087_v59 = vpop.xlane.xlu1 %2086  ;;  %7226 = vrcp.f32 %v1945_v34  ;;  %v1952_v43 = vmul.f32 0.5, %v7221_v41 }
 0xb10   : > { %7228 = vrcp.f32 %v2087_v59 }
 0xb12   : > { %v1939_v61 = vpop.xlane.xlu0 %1938  ;;  %v7223_v32 = vpop.eup %7222 }
 0xb13   : > { %7230 = vrcp.f32 %v1939_v61  ;;  %v1950_v63 = vmul.f32 0.5, %v7223_v32 }
 0xb16   : > { %v7225_v55 = vpop.eup %7224 }
 0xb17   : > { %v2095_v6 = vmul.f32 0.5, %v7225_v55 }
 0xb19   : > { %v7227_v4 = vpop.eup %7226 }
 0xb1a   : > { %v2084_v15 = vpop.xlane.xlu0 %2083  ;;  %v7229_v60 = vpop.eup %7228  ;;  %v1953_v8 = vmul.f32 0.5, %v7227_v4 }
 0xb1b   : > { %v2097_v33 = vmul.f32 0.5, %v7229_v60 }
 0xb1d   : > { %v7231_v1 = vpop.eup %7230 }
 0xb1e   : > { %v2090_v25 = vpop.xlane.xlu0 %2089  ;;  %v1951_v19 = vmul.f32 0.5, %v7231_v1 }
 0xb1f   : > { %7232 = vrcp.f32 %v2090_v25 }
 0xb20   : > { %7234 = vrcp.f32 %v2084_v15 }
 0xb29   : > { %v7233_v35 = vpop.eup %7232 }
 0xb2a   : > { %v7235_v3 = vpop.eup %7234  ;;  %v2098_v11 = vmul.f32 0.5, %v7233_v35 }
 0xb2b   : > { %v2096_v23 = vmul.f32 0.5, %v7235_v3 }
 0xb59   : > { %v6611_v27 = vpop.f32.mrb[32].mxu1 }
 0xb5a   : > { %v1996_v50 = vpop.f32.mrb[33].mxu1  ;;  %v2013_v7 = vmul.f32 %v6611_v27, %v1952_v43 }
 0xb5b   : > { %v6612_v51 = vpop.f32.mrb[34].mxu1  ;;  %v2011_v17 = vmul.f32 %v1996_v50, %v1950_v63 }
 0xb5c   : > { %v1999_v45 = vpop.f32.mrb[35].mxu1  ;;  %v2014_v26 = vmul.f32 %v6612_v51, %v1953_v8  ;;  %v2328_v51 = vsel %vm488_vm0, %v8238_v29, 0 }
 0xb5d   : > { %v2012_v30 = vmul.f32 %v1999_v45, %v1951_v19 }
 0xb62   : > { %v6619_v2 = vpop.f32.mrb[28].mxu0 }
 0xb63   : > { %v2166_v10 = vmul.f32 %v6619_v2, %v2097_v33  ;;  %v2149_v14 = vpop.f32.mrb[29].mxu0 }
 0xb64   : > { %v2164_v20 = vmul.f32 %v2149_v14, %v2095_v6  ;;  %v6620_v21 = vpop.f32.mrb[30].mxu0 }
 0xb65   : > { %v2170_v62 = vadd.f32 %v2166_v10, %v2013_v7  ;;  %v2167_v28 = vmul.f32 %v6620_v21, %v2098_v11  ;;  %v2152_v0 = vpop.f32.mrb[31].mxu0 }
 0xb66   : > { %v2168_v22 = vadd.f32 %v2164_v20, %v2011_v17  ;;  %v2165_v34 = vmul.f32 %v2152_v0, %v2096_v23 }
 0xb67   : > { %v2175_v36 = vadd.f32 %v2172_v13, %v2170_v62  ;;  %v2171_v61 = vadd.f32 %v2167_v28, %v2014_v26 }
 0xb68   : > { %v2173_v40 = vadd.f32 %v2172_v13, %v2168_v22  ;;  %v2169_v15 = vadd.f32 %v2165_v34, %v2012_v30 }
 0xb69   : > { %v2176_v59 = vadd.f32 %v2172_v13, %v2171_v61  ;;  %v2179_v27 = vmax.f32 %v2175_v36, 0.0 }
 0xb6a   : > { %v2174_v25 = vadd.f32 %v2172_v13, %v2169_v15  ;;  %v2177_v50 = vmax.f32 %v2173_v40, 0.0 }
 0xb6b   : > { %v2180_v41 = vmax.f32 %v2176_v59, 0.0 }
 0xb6c   : > { %v2178_v32 = vmax.f32 %v2174_v25, 0.0 }
 0xb6d   : > { %v2182_v55 = vpack.c.bf16 %v2180_v41, %v2179_v27 }
 0xb6e   : > { %v2181_v4 = vpack.c.bf16 %v2178_v32, %v2177_v50 }
 0xb6f   : > { %v2220_v60 = vsel %vm488_vm0, %v2182_v55, 0 }
 0xb70   : > { %6629 = vmatprep.mubr.msk.bf16.mxu1 %vm488_vm0, %v2181_v4  ;;  %v2217_v45 = vsel %vm488_vm0, %v2181_v4, 0 }
 0xb71   : > { %6630 = vmatmul.mubr.msk.bf16.vlgmr.msra.gmra.mrb[36].mxu1 %vm488_vm0, %v2182_v55  ;;  %6634 = vmatpush3.bf16.xpose.msra.mxu0 %v2217_v45 }
 0xb72   : > { %6642 = vmatpush3.bf16.xpose.msra.mxu1 %v2328_v51  ;;  %6643 = vmatprep.mubr.msk.bf16.mxu1 %vm488_vm0, %v2181_v4 }
 0xb73   : > { %6635 = vmatprep.subr.bf16.mxu0 %v7630_v42 }
 0xb79   : > { %6636 = vmatpush3.bf16.xpose.msra.mxu0 %v2220_v60  ;;  %6644 = vmatmul.mubr.msk.bf16.vlgmr.msra.gmra.mrb[40].mxu1 %vm488_vm0, %v2182_v55 }
 0xb80   : > { %6638 = vmatmul.mubr.msk.bf16.vlgmr.msra.gmra.mrb[32].mxu0 %vm488_vm0, %v8234_v18 }
 0xc44   : > { %v6631_v29 = vpop.f32.mrb[36].mxu1 }
 0xc45   : > { %v2256_v1 = vpop.f32.mrb[37].mxu1 }
 0xc46   : > { %v6632_v35 = vpop.f32.mrb[38].mxu1 }
 0xc47   : > { %v8253_v3 = vpack.c.bf16 %v6632_v35, %v6631_v29  ;;  %v2259_v43 = vpop.f32.mrb[39].mxu1 }
 0xc48   : > { %v8255_v33 = vpack.c.bf16 %v2259_v43, %v2256_v1 }
 0xc4a   : > { %6647 = vmatprep.subr.bf16.mxu0 %v8255_v33 }
 0xc4b   : > { %6648 = vmatpush3.bf16.msra.mxu0 %v8255_v33 }
 0xc4c   : > { %v6645_v63 = vpop.f32.mrb[40].mxu1  ;;  %6649 = vmatprep.subr.bf16.mxu0 %v8253_v3 }
 0xc4d   : > { %v2364_v2 = vpop.f32.mrb[41].mxu1 }
 0xc4e   : > { %2381 = vperm.xlu1 %6980, %v2364_v2   ;;  %v6646_v6 = vpop.f32.mrb[42].mxu1 }
 0xc4f   : > { %v2367_v7 = vpop.f32.mrb[43].mxu1  ;;  %6650 = vmatpush3.bf16.msra.mxu0 %v8253_v3 }
 0xc50   : > { %2386 = vperm.xlu0 %6981, %v2367_v7  }
 0xc52   : > { %6982 = vset.pattern.permute.xlu1 %v7633_v58 }
 0xc53   : > { %2529 = vperm.xlu1 %6982, %v2364_v2   ;;  %v2312_v18 = vpop.f32.mrb[32].mxu0 }
 0xc54   : > { %v6639_v8 = vpop.f32.mrb[33].mxu0  ;;  %v2402_v11 = vrot.slane %v2312_v18, %v7946_v9  ;;  %v2547_v0 = vrot.slane %v2312_v18, %v7956_v12 }
 0xc55   : > { %v2315_v10 = vpop.f32.mrb[34].mxu0 }
 0xc56   : > { %v6640_v14 = vpop.f32.mrb[35].mxu0 }
 0xc57   : > { %6983 = vset.pattern.permute.xlu1 %v7632_v57 }
 0xc58   : > { %2391 = vperm.xlu1 %6983, %v6645_v63  }
 0xc5c   : > { %2396 = vperm.xlu1 %6983, %v6646_v6  }
 0xc60   : > { %6984 = vset.pattern.permute.xlu1 %v7633_v58 }
 0xc61   : > { %2537 = vperm.xlu1 %6984, %v6645_v63  }
 0xc65   : > { %2533 = vperm.xlu1 %6984, %v2367_v7  }
 0xc69   : > { %2541 = vperm.xlu1 %6984, %v6646_v6  }
 0xc6d   : > { %6985 = vset.pattern.permute.xlu1 %v7632_v57 }
 0xccd   : > { %v2382_v17 = vpop.permute.xlu1 %2381 }
 0xcce   : > { %v2403_v19 = vadd.f32 %v2402_v11, %v2382_v17 }
 0xccf   : > { %v2387_v15 = vpop.permute.xlu0 %2386 }
 0xcd0   : > { %vm2407_vm14 = vcmp.gt.f32.partialorder %v2403_v19, 0.0  ;;  %v2411_v13 = vmul.f32 0.2, %v2403_v19  ;;  %v2404_v50 = vadd.f32 %v2402_v11, %v2387_v15 }
 0xcd2   : > { %v2530_v20 = vpop.permute.xlu1 %2529  ;;  %v2415_v21 = vsel %vm2407_vm14, %v2403_v19, %v2411_v13  ;;  %v2412_v29 = vmul.f32 0.2, %v2404_v50  ;;  %vm2408_vm6 = vcmp.gt.f32.partialorder %v2404_v50, 0.0 }
 0xcd3   : > { %v8267_v23 = vadd.f32 %v8180_v16, %v2415_v21  ;;  %v2548_v61 = vadd.f32 %v2547_v0, %v2530_v20 }
 0xcd4   : > { %v2416_v10 = vsel %vm2408_vm6, %v2404_v50, %v2412_v29 }
 0xcd5   : > { %v2423_v26 = vsel %vm879_vm3, %v8267_v23, -inf  ;;  %v2556_v32 = vmul.f32 0.2, %v2548_v61  ;;  %vm2552_vm4 = vcmp.gt.f32.partialorder %v2548_v61, 0.0  ;;  %v2420_v17 = vadd.f32 %v8195_v5, %v2416_v10 }
 0xcd6   : > { %2424 = vmax.xlane.f32.xlu1 %v2423_v26 }
 0xcd7   : > { %v2392_v62 = vpop.permute.xlu1 %2391  ;;  %v2560_v43 = vsel %vm2552_vm4, %v2548_v61, %v2556_v32  ;;  %v2426_v20 = vsel %vm879_vm3, %v2420_v17, -inf }
 0xcd8   : > { %v2405_v28 = vadd.f32 %v2402_v11, %v2392_v62  ;;  %v2564_v7 = vadd.f32 %v8180_v16, %v2560_v43 }
 0xcda   : > { %v2413_v30 = vmul.f32 0.2, %v2405_v28  ;;  %vm2409_vm15 = vcmp.gt.f32.partialorder %v2405_v28, 0.0 }
 0xcdb   : > { %v2397_v22 = vpop.permute.xlu1 %2396 }
 0xcdc   : > { %v2406_v34 = vadd.f32 %v2402_v11, %v2397_v22  ;;  %v2417_v36 = vsel %vm2409_vm15, %v2405_v28, %v2413_v30  ;;  %v2568_v11 = vsel %vm879_vm3, %v2564_v7, -inf }
 0xcdd   : > { %v2421_v40 = vadd.f32 %v8176_v24, %v2417_v36 }
 0xcde   : > { %vm2410_vm2 = vcmp.gt.f32.partialorder %v2406_v34, 0.0  ;;  %v2414_v59 = vmul.f32 0.2, %v2406_v34 }
 0xcdf   : > { %v2429_v25 = vsel %vm879_vm3, %v2421_v40, -inf }
 0xce0   : > { %v2538_v27 = vpop.permute.xlu1 %2537  ;;  %2430 = vmax.xlane.f32.xlu0 %v2429_v25  ;;  %v2418_v41 = vsel %vm2410_vm2, %v2406_v34, %v2414_v59 }
 0xce1   : > { %v2550_v55 = vadd.f32 %v2547_v0, %v2538_v27  ;;  %v2422_v4 = vadd.f32 %v8189_v56, %v2418_v41 }
 0xce3   : > { %v2558_v51 = vmul.f32 0.2, %v2550_v55  ;;  %v2432_v45 = vsel %vm879_vm3, %v2422_v4, -inf  ;;  %vm2554_vm5 = vcmp.gt.f32.partialorder %v2550_v55, 0.0 }
 0xce4   : > { %v2534_v60 = vpop.permute.xlu1 %2533  ;;  %2433 = vmax.xlane.f32.xlu1 %v2432_v45 }
 0xce5   : > { %v2549_v1 = vadd.f32 %v2547_v0, %v2534_v60  ;;  %v2562_v35 = vsel %vm2554_vm5, %v2550_v55, %v2558_v51 }
 0xce6   : > { %v2566_v63 = vadd.f32 %v8176_v24, %v2562_v35 }
 0xce7   : > { %v2557_v18 = vmul.f32 0.2, %v2549_v1  ;;  %vm2553_vm7 = vcmp.gt.f32.partialorder %v2549_v1, 0.0 }
 0xce8   : > { %v2542_v2 = vpop.permute.xlu1 %2541  ;;  %v2574_v6 = vsel %vm879_vm3, %v2566_v63, -inf }
 0xce9   : > { %v2551_v8 = vadd.f32 %v2547_v0, %v2542_v2  ;;  %2575 = vmax.xlane.f32.xlu0 %v2574_v6  ;;  %v2561_v24 = vsel %vm2553_vm7, %v2549_v1, %v2557_v18 }
 0xcea   : > { %v2565_v21 = vadd.f32 %v8195_v5, %v2561_v24 }
 0xceb   : > { %vm2555_vm8 = vcmp.gt.f32.partialorder %v2551_v8, 0.0  ;;  %v2559_v14 = vmul.f32 0.2, %v2551_v8 }
 0xcec   : > { %v2571_v26 = vsel %vm879_vm3, %v2565_v21, -inf }
 0xced   : > { %2569 = vmax.xlane.f32.xlu0 %v2568_v11  ;;  %v2563_v19 = vsel %vm2555_vm8, %v2551_v8, %v2559_v14 }
 0xcee   : > { %v2567_v13 = vadd.f32 %v8189_v56, %v2563_v19 }
 0xcf0   : > { %v2577_v16 = vsel %vm879_vm3, %v2567_v13, -inf }
 0xcf1   : > { %2427 = vmax.xlane.f32.xlu0 %v2426_v20  ;;  %2578 = vmax.xlane.f32.xlu1 %v2577_v16 }
 0xcf5   : > { %2572 = vmax.xlane.f32.xlu1 %v2571_v26  ;;  %v7028_v26 = vld [vmem:[%s8805_s3 + $0x80] sm:$0xff]  }
 0xcf6   : > { %6663 = vmatprep.subr.bf16.mxu0 %v7028_v26 }
 0xd06   : > { %2618 = vrot.lane.b32.xlu1 %v8253_v3, %s7634_s12 }
 0xd07   : > { %2616 = vrot.lane.b32.xlu0 %v8255_v33, %s7634_s12 }
 0xd63   : > { %v2425_v62 = vpop.xlane.xlu1 %2424 }
 0xd64   : > { %v2435_v56 = vsub.f32 %v8267_v23, %v2425_v62  ;;  %v7029_v62 = vld [vmem:[%s8805_s3 + $0x88] sm:$0xff]  }
 0xd66   : > { %v2439_v28 = vmul.f32 1.442695, %v2435_v56  ;;  %v7030_v56 = vld [vmem:[%s8805_s3 + $0x90] sm:$0xff]  }
 0xd68   : > { %7236 = vpow2.f32 %v2439_v28  ;;  %v7031_v28 = vld [vmem:[%s8805_s3 + $0x98] sm:$0xff]  }
 0xd6d   : > { %v2431_v0 = vpop.xlane.xlu0 %2430 }
 0xd6e   : > { %v2437_v30 = vsub.f32 %v2421_v40, %v2431_v0  ;;  %v8318_v0 = vld [vmem:[#allocation4 + $0x8] sm:$0x3] }
 0xd70   : > { %v2443_v22 = vmul.f32 1.442695, %v2437_v30  ;;  %v2842_v30 = vrot.slane %v8318_v0, %v7901_v38 }
 0xd71   : > { %v2434_v5 = vpop.xlane.xlu1 %2433 }
 0xd72   : > { %v7237_v34 = vpop.eup %7236  ;;  %7238 = vpow2.f32 %v2443_v22  ;;  %v2438_v36 = vsub.f32 %v2422_v4, %v2434_v5  ;;  %v8322_v22 = vrot.slane %v2842_v30, 1 }
 0xd73   : > { %v2447_v61 = vsel %vm879_vm3, %v7237_v34, 0.0 }
 0xd74   : > { %v2445_v15 = vmul.f32 1.442695, %v2438_v36  ;;  %2448 = vadd.xlane.f32.xlu1 %v2447_v61  ;;  %v2845_v48 = vsel %vm488_vm0, %v8322_v22, 0 }
 0xd76   : > { %7240 = vpow2.f32 %v2445_v15  ;;  %v2576_v3 = vpop.xlane.xlu0 %2575 }
 0xd77   : > { %v2582_v27 = vsub.f32 %v2566_v63, %v2576_v3 }
 0xd79   : > { %v2588_v51 = vmul.f32 1.442695, %v2582_v27 }
 0xd7a   : > { %v2570_v59 = vpop.xlane.xlu0 %2569 }
 0xd7b   : > { %v2580_v33 = vsub.f32 %v2564_v7, %v2570_v59 }
 0xd7c   : > { %v7239_v25 = vpop.eup %7238 }
 0xd7d   : > { %v2584_v23 = vmul.f32 1.442695, %v2580_v33  ;;  %v2453_v41 = vsel %vm879_vm3, %v7239_v25, 0.0 }
 0xd7e   : > { %2454 = vadd.xlane.f32.xlu0 %v2453_v41  ;;  %v2428_v40 = vpop.xlane.xlu0 %2427  ;;  %v2579_v50 = vpop.xlane.xlu1 %2578 }
 0xd7f   : > { %7242 = vpow2.f32 %v2584_v23  ;;  %v2436_v32 = vsub.f32 %v2420_v17, %v2428_v40  ;;  %v2583_v55 = vsub.f32 %v2567_v13, %v2579_v50 }
 0xd80   : > { %v7241_v4 = vpop.eup %7240 }
 0xd81   : > { %v2441_v45 = vmul.f32 1.442695, %v2436_v32  ;;  %v2456_v60 = vsel %vm879_vm3, %v7241_v4, 0.0  ;;  %v2590_v29 = vmul.f32 1.442695, %v2583_v55  ;;  %v2468_v11 = vpack.c.bf16 %v7241_v4, %v7239_v25 }
 0xd82   : > { %v2617_v1 = vpop.permute.xlu0 %2616  ;;  %2457 = vadd.xlane.f32.xlu1 %v2456_v60  ;;  %v2573_v35 = vpop.xlane.xlu1 %2572 }
 0xd83   : > { %7244 = vpow2.f32 %v2441_v45  ;;  %v2581_v43 = vsub.f32 %v2565_v21, %v2573_v35  ;;  %6655 = vmatprep.subr.bf16.mxu1 %v2617_v1 }
 0xd84   : > { %6656 = vmatpush3.bf16.msra.mxu1 %v2617_v1  ;;  %7246 = vpow2.f32 %v2588_v51 }
 0xd85   : > { %v2586_v63 = vmul.f32 1.442695, %v2581_v43  ;;  %7248 = vpow2.f32 %v2590_v29 }
 0xd86   : > { %v2619_v2 = vpop.permute.xlu1 %2618 }
 0xd87   : > { %7250 = vpow2.f32 %v2586_v63  ;;  %6657 = vmatprep.subr.bf16.mxu1 %v2619_v2 }
 0xd88   : > { %6658 = vmatpush3.bf16.msra.mxu1 %v2619_v2 }
 0xd89   : > { %v7243_v6 = vpop.eup %7242  ;;  %6675 = vmatprep.subr.bf16.mxu1 %v7630_v42 }
 0xd8a   : > { %v2592_v7 = vsel %vm879_vm3, %v7243_v6, 0.0 }
 0xd8b   : > { %2593 = vadd.xlane.f32.xlu0 %v2592_v7 }
 0xd8d   : > { %v7245_v18 = vpop.eup %7244 }
 0xd8e   : > { %v2450_v8 = vsel %vm879_vm3, %v7245_v18, 0.0  ;;  %v2467_v10 = vpack.c.bf16 %v7245_v18, %v7237_v34  ;;  %v7247_v14 = vpop.eup %7246 }
 0xd8f   : > { %2451 = vadd.xlane.f32.xlu0 %v2450_v8  ;;  %v7249_v17 = vpop.eup %7248  ;;  %v2598_v24 = vsel %vm879_vm3, %v7247_v14, 0.0 }
 0xd90   : > { %6651 = vmatprep.mubr.msk.bf16.mxu0 %vm879_vm3, %v2467_v10  ;;  %v2613_v16 = vpack.c.bf16 %v7249_v17, %v7247_v14  ;;  %v2601_v21 = vsel %vm879_vm3, %v7249_v17, 0.0 }
 0xd91   : > { %v7251_v19 = vpop.eup %7250  ;;  %6652 = vmatmul.mubr.msk.bf16.vlgmr.msra.gmra.mrb[36].mxu0 %vm879_vm3, %v2468_v11  ;;  %v2685_v11 = vld [vmem:[#allocation10 + $0x23] ss:$0 sm:$0xff] }
 0xd92   : > { %v2595_v13 = vsel %vm879_vm3, %v7251_v19, 0.0  ;;  %v2612_v20 = vpack.c.bf16 %v7251_v19, %v7243_v6  ;;  %6664 = vmatpush3.bf16.msra.mxu0 %v7028_v26 }
 0xd93   : > { %2599 = vadd.xlane.f32.xlu0 %v2598_v24  ;;  %2596 = vadd.xlane.f32.xlu1 %v2595_v13 }
 0xd94   : > { %6659 = vmatprep.mubr.msk.bf16.mxu1 %vm879_vm3, %v2612_v20  ;;  %6665 = vmatprep.subr.bf16.mxu0 %v7029_v62 }
 0xd95   : > { %6660 = vmatmul.mubr.msk.bf16.vlgmr.msra.gmra.mrb[44].mxu1 %vm879_vm3, %v2613_v16 }
 0xd96   : > { %6679 = vmatprep.mubr.msk.bf16.mxu1 %vm7631_vm1, %v7630_v42  ;;  %6666 = vmatpush3.bf16.msra.mxu0 %v7029_v62 }
 0xd97   : > { %2602 = vadd.xlane.f32.xlu1 %v2601_v21  ;;  %6667 = vmatprep.subr.bf16.mxu0 %v7030_v56 }
 0xd9a   : > { %6668 = vmatpush3.bf16.msra.mxu0 %v7030_v56 }
 0xd9b   : > { %6669 = vmatprep.subr.bf16.mxu0 %v7031_v28 }
 0xd9e   : > { %6670 = vmatpush3.bf16.msra.mxu0 %v7031_v28 }
 0xd9f   : > { %6879 = vmatprep.subr.msk.bf16.mxu0 %vm488_vm0, %v8322_v22 }
 0xe01   : > { %v2449_v34 = vpop.xlane.xlu1 %2448 }
 0xe02   : > { %7252 = vrcp.f32 %v2449_v34 }
 0xe0b   : > { %v2455_v5 = vpop.xlane.xlu0 %2454 }
 0xe0c   : > { %7254 = vrcp.f32 %v2455_v5  ;;  %v7253_v25 = vpop.eup %7252 }
 0xe0d   : > { %v2463_v35 = vmul.f32 0.5, %v7253_v25 }
 0xe0f   : > { %v2458_v61 = vpop.xlane.xlu1 %2457 }
 0xe10   : > { %7256 = vrcp.f32 %v2458_v61 }
 0xe16   : > { %v7255_v27 = vpop.eup %7254 }
 0xe17   : > { %v2465_v60 = vmul.f32 0.5, %v7255_v27 }
 0xe18   : > { %v2594_v36 = vpop.xlane.xlu0 %2593 }
 0xe19   : > { %7258 = vrcp.f32 %v2594_v36 }
 0xe1a   : > { %v7257_v23 = vpop.eup %7256 }
 0xe1b   : > { %v2466_v6 = vmul.f32 0.5, %v7257_v23 }
 0xe1c   : > { %v2452_v15 = vpop.xlane.xlu0 %2451 }
 0xe20   : > { %v2597_v3 = vpop.xlane.xlu1 %2596  ;;  %v2600_v59 = vpop.xlane.xlu0 %2599 }
 0xe21   : > { %7260 = vrcp.f32 %v2600_v59 }
 0xe22   : > { %7262 = vrcp.f32 %v2452_v15 }
 0xe23   : > { %v7259_v41 = vpop.eup %7258 }
 0xe24   : > { %v2603_v33 = vpop.xlane.xlu1 %2602  ;;  %v2608_v63 = vmul.f32 0.5, %v7259_v41 }
 0xe25   : > { %7264 = vrcp.f32 %v2603_v33 }
 0xe26   : > { %7266 = vrcp.f32 %v2597_v3 }
 0xe2b   : > { %v7261_v40 = vpop.eup %7260 }
 0xe2c   : > { %v7263_v32 = vpop.eup %7262  ;;  %v2610_v1 = vmul.f32 0.5, %v7261_v40 }
 0xe2d   : > { %v2464_v14 = vmul.f32 0.5, %v7263_v32 }
 0xe2f   : > { %v7265_v4 = vpop.eup %7264 }
 0xe30   : > { %v7267_v45 = vpop.eup %7266  ;;  %v2611_v8 = vmul.f32 0.5, %v7265_v4 }
 0xe31   : > { %v2609_v24 = vmul.f32 0.5, %v7267_v45 }
 0xe64   : > { %v6653_v50 = vpop.f32.mrb[36].mxu0 }
 0xe65   : > { %v2509_v55 = vpop.f32.mrb[37].mxu0  ;;  %v2526_v2 = vmul.f32 %v6653_v50, %v2465_v60 }
 0xe66   : > { %v6654_v51 = vpop.f32.mrb[38].mxu0  ;;  %v2524_v10 = vmul.f32 %v2509_v55, %v2463_v35 }
 0xe67   : > { %v2512_v29 = vpop.f32.mrb[39].mxu0  ;;  %v2527_v13 = vmul.f32 %v6654_v51, %v2466_v6 }
 0xe68   : > { %v6661_v43 = vpop.f32.mrb[44].mxu1  ;;  %v2525_v26 = vmul.f32 %v2512_v29, %v2464_v14 }
 0xe69   : > { %v2679_v7 = vmul.f32 %v6661_v43, %v2610_v1  ;;  %v2662_v18 = vpop.f32.mrb[45].mxu1 }
 0xe6a   : > { %v2677_v17 = vmul.f32 %v2662_v18, %v2608_v63  ;;  %v6662_v19 = vpop.f32.mrb[46].mxu1 }
 0xe6b   : > { %v2683_v20 = vadd.f32 %v2679_v7, %v2526_v2  ;;  %v2680_v16 = vmul.f32 %v6662_v19, %v2611_v8  ;;  %v2665_v21 = vpop.f32.mrb[47].mxu1 }
 0xe6c   : > { %v2681_v62 = vadd.f32 %v2677_v17, %v2524_v10  ;;  %v2678_v56 = vmul.f32 %v2665_v21, %v2609_v24  ;;  %v8382_v17 = vld [vmem:[%s7953_s18 + $0x10] sm:$0xff] }
 0xe6d   : > { %v2688_v28 = vadd.f32 %v2685_v11, %v2683_v20  ;;  %v2684_v30 = vadd.f32 %v2680_v16, %v2527_v13  ;;  %v8386_v13 = vld [vmem:[%s7953_s18] sm:$0xff] }
 0xe6e   : > { %v2686_v5 = vadd.f32 %v2685_v11, %v2681_v62  ;;  %v2682_v34 = vadd.f32 %v2678_v56, %v2525_v26 }
 0xe6f   : > { %v2689_v36 = vadd.f32 %v2685_v11, %v2684_v30  ;;  %v8332_v3 = vadd.f32 %v2688_v28, %v1666_v31 }
 0xe70   : > { %v8328_v61 = vadd.f32 %v2686_v5, %v1664_v53  ;;  %v2687_v15 = vadd.f32 %v2685_v11, %v2682_v34 }
 0xe71   : > { %v8336_v59 = vadd.f32 %v2689_v36, %v1667_v52  ;;  %v2696_v53 = vmax.f32 %v8332_v3, 0.0 }
 0xe72   : > { %v8340_v33 = vadd.f32 %v2687_v15, %v1665_v54  ;;  %v2694_v27 = vmax.f32 %v8328_v61, 0.0 }
 0xe73   : > { %v2697_v25 = vmax.f32 %v8336_v59, 0.0 }
 0xe74   : > { %v2695_v39 = vmax.f32 %v8340_v33, 0.0 }
 0xe75   : > { %v2699_v46 = vpack.c.bf16 %v2697_v25, %v2696_v53 }
 0xe76   : > { %v2698_v44 = vpack.c.bf16 %v2695_v39, %v2694_v27 }
 0xe77   : > { %v2737_v54 = vsel %vm488_vm0, %v2699_v46, 0 }
 0xe78   : > { %6671 = vmatprep.mubr.msk.bf16.mxu0 %vm488_vm0, %v2698_v44  ;;  %v2734_v52 = vsel %vm488_vm0, %v2698_v44, 0 }
 0xe79   : > { %6672 = vmatmul.mubr.msk.bf16.vlgmr.msra.gmra.mrb[40].mxu0 %vm488_vm0, %v2699_v46  ;;  %6676 = vmatpush3.bf16.xpose.msra.mxu1 %v2734_v52 }
 0xe7a   : > { %6684 = vmatpush3.bf16.xpose.msra.mxu0 %v2845_v48  ;;  %6685 = vmatprep.mubr.msk.bf16.mxu0 %vm488_vm0, %v2698_v44 }
 0xe7b   : > { %6677 = vmatprep.subr.bf16.mxu1 %v7630_v42 }
 0xe81   : > { %6678 = vmatpush3.bf16.xpose.msra.mxu1 %v2737_v54  ;;  %6686 = vmatmul.mubr.msk.bf16.vlgmr.msra.gmra.mrb[44].mxu0 %vm488_vm0, %v2699_v46 }
 0xe88   : > { %6680 = vmatmul.mubr.msk.bf16.vlgmr.msra.gmra.mrb[48].mxu1 %vm488_vm0, %v8318_v0 }
 0xf4c   : > { %v6673_v31 = vpop.f32.mrb[40].mxu0 }
 0xf4d   : > { %v2773_v22 = vpop.f32.mrb[41].mxu0 }
 0xf4e   : > { %v6674_v23 = vpop.f32.mrb[42].mxu0 }
 0xf4f   : > { %v8365_v41 = vpack.c.bf16 %v6674_v23, %v6673_v31  ;;  %v2776_v40 = vpop.f32.mrb[43].mxu0  ;;  %v8395_v23 = vld [vmem:[%s7953_s18 + $0x18] sm:$0xff] }
 0xf50   : > { %v8367_v50 = vpack.c.bf16 %v2776_v40, %v2773_v22 }
 0xf52   : > { %6689 = vmatprep.subr.bf16.mxu1 %v8367_v50 }
 0xf53   : > { %6690 = vmatpush3.bf16.msra.mxu1 %v8367_v50 }
 0xf54   : > { %v6687_v32 = vpop.f32.mrb[44].mxu0  ;;  %6691 = vmatprep.subr.bf16.mxu1 %v8365_v41 }
 0xf55   : > { %2908 = vperm.xlu1 %6985, %v6687_v32   ;;  %v2881_v55 = vpop.f32.mrb[45].mxu0 }
 0xf56   : > { %2898 = vperm.xlu0 %6981, %v2881_v55   ;;  %v6688_v4 = vpop.f32.mrb[46].mxu0 }
 0xf57   : > { %v2884_v0 = vpop.f32.mrb[47].mxu0  ;;  %6692 = vmatpush3.bf16.msra.mxu1 %v8365_v41 }
 0xf59   : > { %6986 = vset.pattern.permute.xlu1 %v7633_v58 }
 0xf5a   : > { %3046 = vperm.xlu1 %6986, %v2881_v55   ;;  %6988 = vset.pattern.permute.xlu0 %v7633_v58 }
 0xf5b   : > { %3050 = vperm.xlu0 %6988, %v2884_v0   ;;  %v2829_v51 = vpop.f32.mrb[48].mxu1 }
 0xf5c   : > { %v6681_v45 = vpop.f32.mrb[49].mxu1  ;;  %v2919_v1 = vrot.slane %v2829_v51, %v7946_v9  ;;  %v3064_v2 = vrot.slane %v2829_v51, %v7956_v12 }
 0xf5d   : > { %v2832_v60 = vpop.f32.mrb[50].mxu1 }
 0xf5e   : > { %6987 = vset.pattern.permute.xlu1 %v7632_v57  ;;  %v6682_v29 = vpop.f32.mrb[51].mxu1 }
 0xf5f   : > { %2913 = vperm.xlu1 %6987, %v6688_v4   ;;  %3054 = vperm.xlu0 %6988, %v6687_v32   ;;  %v8401_v29 = vld [vmem:[%s7953_s18 + $0x8] sm:$0xff] }
 0xf63   : > { %2903 = vperm.xlu1 %6987, %v2884_v0   ;;  %6991 = vset.pattern.permute.xlu0 %v7632_v57 }
 0xf67   : > { %6989 = vset.pattern.permute.xlu1 %v7633_v58 }
 0xf68   : > { %3058 = vperm.xlu1 %6989, %v6688_v4  }
 0xf6c   : > { %6990 = vset.pattern.permute.xlu1 %v7632_v57 }
 0xfd4   : > { %v2909_v35 = vpop.permute.xlu1 %2908 }
 0xfd5   : > { %v2922_v43 = vadd.f32 %v2919_v1, %v2909_v35  ;;  %v2899_v63 = vpop.permute.xlu0 %2898 }
 0xfd6   : > { %v2920_v6 = vadd.f32 %v2919_v1, %v2899_v63 }
 0xfd7   : > { %vm2926_vm9 = vcmp.gt.f32.partialorder %v2922_v43, 0.0  ;;  %v2930_v7 = vmul.f32 0.2, %v2922_v43 }
 0xfd8   : > { %vm2924_vm10 = vcmp.gt.f32.partialorder %v2920_v6, 0.0  ;;  %v2928_v18 = vmul.f32 0.2, %v2920_v6 }
 0xfd9   : > { %v3047_v8 = vpop.permute.xlu1 %3046  ;;  %v2934_v10 = vsel %vm2926_vm9, %v2922_v43, %v2930_v7 }
 0xfda   : > { %v3065_v14 = vadd.f32 %v3064_v2, %v3047_v8  ;;  %v3051_v11 = vpop.permute.xlu0 %3050  ;;  %v2938_v19 = vadd.f32 %v8382_v17, %v2934_v10  ;;  %v2932_v24 = vsel %vm2924_vm10, %v2920_v6, %v2928_v18 }
 0xfdb   : > { %v2936_v20 = vadd.f32 %v8386_v13, %v2932_v24  ;;  %v3066_v31 = vadd.f32 %v3064_v2, %v3051_v11 }
 0xfdc   : > { %vm3069_vm11 = vcmp.gt.f32.partialorder %v3065_v14, 0.0  ;;  %v3073_v16 = vmul.f32 0.2, %v3065_v14  ;;  %v2946_v21 = vsel %vm879_vm3, %v2938_v19, -inf }
 0xfdd   : > { %2947 = vmax.xlane.f32.xlu1 %v2946_v21  ;;  %v2940_v26 = vsel %vm879_vm3, %v2936_v20, -inf  ;;  %v3074_v45 = vmul.f32 0.2, %v3066_v31  ;;  %vm3070_vm15 = vcmp.gt.f32.partialorder %v3066_v31, 0.0 }
 0xfde   : > { %v2914_v62 = vpop.permute.xlu1 %2913  ;;  %v3055_v56 = vpop.permute.xlu0 %3054  ;;  %2941 = vmax.xlane.f32.xlu0 %v2940_v26  ;;  %v3077_v28 = vsel %vm3069_vm11, %v3065_v14, %v3073_v16 }
 0xfdf   : > { %v2923_v30 = vadd.f32 %v2919_v1, %v2914_v62  ;;  %v3067_v5 = vadd.f32 %v3064_v2, %v3055_v56  ;;  %v3081_v34 = vadd.f32 %v8386_v13, %v3077_v28  ;;  %v3078_v6 = vsel %vm3070_vm15, %v3066_v31, %v3074_v45 }
 0xfe0   : > { %v3082_v8 = vadd.f32 %v8401_v29, %v3078_v6 }
 0xfe1   : > { %vm2927_vm12 = vcmp.gt.f32.partialorder %v2923_v30, 0.0  ;;  %v2931_v36 = vmul.f32 0.2, %v2923_v30  ;;  %vm3071_vm13 = vcmp.gt.f32.partialorder %v3067_v5, 0.0  ;;  %v3075_v15 = vmul.f32 0.2, %v3067_v5 }
 0xfe2   : > { %v2904_v44 = vpop.permute.xlu1 %2903  ;;  %v3085_v46 = vsel %vm879_vm3, %v3081_v34, -inf }
 0xfe3   : > { %v2921_v48 = vadd.f32 %v2919_v1, %v2904_v44  ;;  %3086 = vmax.xlane.f32.xlu0 %v3085_v46  ;;  %v3079_v52 = vsel %vm3071_vm13, %v3067_v5, %v3075_v15  ;;  %v2935_v54 = vsel %vm2927_vm12, %v2923_v30, %v2931_v36 }
 0xfe4   : > { %v3083_v22 = vadd.f32 %v8382_v17, %v3079_v52  ;;  %v2939_v40 = vadd.f32 %v8395_v23, %v2935_v54 }
 0xfe5   : > { %vm2925_vm14 = vcmp.gt.f32.partialorder %v2921_v48, 0.0  ;;  %v2929_v32 = vmul.f32 0.2, %v2921_v48 }
 0xfe6   : > { %v3091_v55 = vsel %vm879_vm3, %v3083_v22, -inf  ;;  %v2949_v4 = vsel %vm879_vm3, %v2939_v40, -inf }
 0xfe7   : > { %v3059_v0 = vpop.permute.xlu1 %3058  ;;  %3092 = vmax.xlane.f32.xlu1 %v3091_v55  ;;  %2950 = vmax.xlane.f32.xlu0 %v2949_v4  ;;  %v2933_v51 = vsel %vm2925_vm14, %v2921_v48, %v2929_v32 }
 0xfe8   : > { %v3068_v60 = vadd.f32 %v3064_v2, %v3059_v0  ;;  %v2937_v1 = vadd.f32 %v8401_v29, %v2933_v51  ;;  %v3088_v2 = vsel %vm879_vm3, %v3082_v8, -inf }
 0xfea   : > { %vm3072_vm2 = vcmp.gt.f32.partialorder %v3068_v60, 0.0  ;;  %v3076_v35 = vmul.f32 0.2, %v3068_v60  ;;  %v2943_v43 = vsel %vm879_vm3, %v2937_v1, -inf }
 0xfeb   : > { %2944 = vmax.xlane.f32.xlu1 %v2943_v43 }
 0xfec   : > { %v3080_v63 = vsel %vm3072_vm2, %v3068_v60, %v3076_v35 }
 0xfed   : > { %v3084_v7 = vadd.f32 %v8395_v23, %v3080_v63 }
 0xfef   : > { %v3094_v18 = vsel %vm879_vm3, %v3084_v7, -inf }
 0xff0   : > { %3095 = vmax.xlane.f32.xlu0 %v3094_v18 }
 0xff4   : > { %3089 = vmax.xlane.f32.xlu0 %v3088_v2 }
 0xffc   : > { %3133 = vrot.lane.b32.xlu1 %v8367_v50, %s7634_s12 }
0x100a   : > { %3135 = vrot.lane.b32.xlu0 %v8365_v41, %s7634_s12 }
0x106a   : > { %v2948_v10 = vpop.xlane.xlu1 %2947 }
0x106b   : > { %v2954_v14 = vsub.f32 %v2938_v19, %v2948_v10  ;;  %v2942_v11 = vpop.xlane.xlu0 %2941 }
0x106c   : > { %v2952_v24 = vsub.f32 %v2936_v20, %v2942_v11 }
0x106d   : > { %v2960_v16 = vmul.f32 1.442695, %v2954_v14 }
0x106e   : > { %v2956_v21 = vmul.f32 1.442695, %v2952_v24  ;;  %v7032_v24 = vld [vmem:[%s8805_s3 + $0xa0] sm:$0xff]  }
0x106f   : > { %7268 = vpow2.f32 %v2960_v16  ;;  %6705 = vmatprep.subr.bf16.mxu1 %v7032_v24  ;;  %v7033_v16 = vld [vmem:[%s8805_s3 + $0xa8] sm:$0xff]  }
0x1070   : > { %v3087_v26 = vpop.xlane.xlu0 %3086  ;;  %7270 = vpow2.f32 %v2956_v21  ;;  %v7034_v21 = vld [vmem:[%s8805_s3 + $0xb0] sm:$0xff]  }
0x1071   : > { %v3097_v62 = vsub.f32 %v3081_v34, %v3087_v26  ;;  %v7035_v26 = vld [vmem:[%s8805_s3 + $0xb8] sm:$0xff]  }
0x1073   : > { %v3101_v56 = vmul.f32 1.442695, %v3097_v62  ;;  %v8440_v62 = vld [vmem:[#allocation4 + $0xa] sm:$0x3] }
0x1074   : > { %v3093_v28 = vpop.xlane.xlu1 %3092  ;;  %v2951_v30 = vpop.xlane.xlu0 %2950 }
0x1075   : > { %7272 = vpow2.f32 %v3101_v56  ;;  %v3099_v5 = vsub.f32 %v3083_v22, %v3093_v28  ;;  %v2955_v36 = vsub.f32 %v2939_v40, %v2951_v30  ;;  %v3355_v56 = vrot.slane %v8440_v62, %v7901_v38 }
0x1077   : > { %v3105_v50 = vmul.f32 1.442695, %v3099_v5  ;;  %v2962_v15 = vmul.f32 1.442695, %v2955_v36  ;;  %v8444_v28 = vrot.slane %v3355_v56, 1 }
0x1078   : > { %v2945_v44 = vpop.xlane.xlu1 %2944 }
0x1079   : > { %v7269_v41 = vpop.eup %7268  ;;  %7274 = vpow2.f32 %v3105_v50  ;;  %v2953_v19 = vsub.f32 %v2937_v1, %v2945_v44 }
0x107a   : > { %7276 = vpow2.f32 %v2962_v15  ;;  %v2970_v20 = vsel %vm879_vm3, %v7269_v41, 0.0  ;;  %v7271_v46 = vpop.eup %7270 }
0x107b   : > { %v2958_v48 = vmul.f32 1.442695, %v2953_v19  ;;  %2971 = vadd.xlane.f32.xlu1 %v2970_v20  ;;  %v2964_v31 = vsel %vm879_vm3, %v7271_v46, 0.0 }
0x107c   : > { %v3134_v52 = vpop.permute.xlu1 %3133 }
0x107d   : > { %7278 = vpow2.f32 %v2958_v48  ;;  %6697 = vmatprep.subr.bf16.mxu0 %v3134_v52  ;;  %v3096_v34 = vpop.xlane.xlu0 %3095 }
0x107e   : > { %v3100_v54 = vsub.f32 %v3084_v7, %v3096_v34  ;;  %6698 = vmatpush3.bf16.msra.mxu0 %v3134_v52 }
0x107f   : > { %v7273_v22 = vpop.eup %7272  ;;  %2965 = vadd.xlane.f32.xlu1 %v2964_v31 }
0x1080   : > { %v3107_v40 = vmul.f32 1.442695, %v3100_v54  ;;  %v3109_v4 = vsel %vm879_vm3, %v7273_v22, 0.0 }
0x1081   : > { %v3090_v32 = vpop.xlane.xlu0 %3089 }
0x1082   : > { %v3098_v55 = vsub.f32 %v3082_v8, %v3090_v32  ;;  %7280 = vpow2.f32 %v3107_v40 }
0x1083   : > { %v7275_v0 = vpop.eup %7274  ;;  %3110 = vadd.xlane.f32.xlu1 %v3109_v4 }
0x1084   : > { %v7277_v51 = vpop.eup %7276  ;;  %v3103_v45 = vmul.f32 1.442695, %v3098_v55  ;;  %v3115_v35 = vsel %vm879_vm3, %v7275_v0, 0.0 }
0x1085   : > { %v2973_v60 = vsel %vm879_vm3, %v7277_v51, 0.0  ;;  %v3136_v1 = vpop.permute.xlu0 %3135  ;;  %v2985_v7 = vpack.c.bf16 %v7277_v51, %v7269_v41 }
0x1086   : > { %7282 = vpow2.f32 %v3103_v45  ;;  %2974 = vadd.xlane.f32.xlu0 %v2973_v60  ;;  %6699 = vmatprep.subr.bf16.mxu0 %v3136_v1 }
0x1087   : > { %v7279_v43 = vpop.eup %7278  ;;  %3116 = vadd.xlane.f32.xlu1 %v3115_v35  ;;  %6700 = vmatpush3.bf16.msra.mxu0 %v3136_v1 }
0x1088   : > { %v2967_v63 = vsel %vm879_vm3, %v7279_v43, 0.0  ;;  %v2984_v6 = vpack.c.bf16 %v7279_v43, %v7271_v46  ;;  %6717 = vmatprep.subr.bf16.mxu0 %v7630_v42 }
0x108a   : > { %2968 = vadd.xlane.f32.xlu0 %v2967_v63  ;;  %6693 = vmatprep.mubr.msk.bf16.mxu1 %vm879_vm3, %v2984_v6 }
0x108b   : > { %6694 = vmatmul.mubr.msk.bf16.vlgmr.msra.gmra.mrb[52].mxu1 %vm879_vm3, %v2985_v7 }
0x108c   : > { %v7281_v18 = vpop.eup %7280  ;;  %6706 = vmatpush3.bf16.msra.mxu1 %v7032_v24 }
0x108d   : > { %v3130_v14 = vpack.c.bf16 %v7281_v18, %v7275_v0  ;;  %v3118_v11 = vsel %vm879_vm3, %v7281_v18, 0.0  ;;  %6707 = vmatprep.subr.bf16.mxu1 %v7033_v16 }
0x1090   : > { %v7283_v8 = vpop.eup %7282  ;;  %6708 = vmatpush3.bf16.msra.mxu1 %v7033_v16 }
0x1091   : > { %v3112_v2 = vsel %vm879_vm3, %v7283_v8, 0.0  ;;  %v3129_v10 = vpack.c.bf16 %v7283_v8, %v7273_v22  ;;  %6709 = vmatprep.subr.bf16.mxu1 %v7034_v21 }
0x1092   : > { %3113 = vadd.xlane.f32.xlu0 %v3112_v2  ;;  %v3202_v2 = vld [vmem:[#allocation10 + $0x24] ss:$0 sm:$0xff] }
0x1093   : > { %6701 = vmatprep.mubr.msk.bf16.mxu0 %vm879_vm3, %v3129_v10 }
0x1094   : > { %6702 = vmatmul.mubr.msk.bf16.vlgmr.msra.gmra.mrb[48].mxu0 %vm879_vm3, %v3130_v14  ;;  %6710 = vmatpush3.bf16.msra.mxu1 %v7034_v21 }
0x1095   : > { %6721 = vmatprep.mubr.msk.bf16.mxu0 %vm7631_vm1, %v7630_v42  ;;  %6711 = vmatprep.subr.bf16.mxu1 %v7035_v26 }
0x1096   : > { %3119 = vadd.xlane.f32.xlu0 %v3118_v11 }
0x1098   : > { %6712 = vmatpush3.bf16.msra.mxu1 %v7035_v26 }
0x1099   : > { %6880 = vmatprep.subr.msk.bf16.mxu1 %vm488_vm0, %v8444_v28 }
0x1108   : > { %v2972_v30 = vpop.xlane.xlu1 %2971 }
0x1109   : > { %7284 = vrcp.f32 %v2972_v30 }
0x110c   : > { %v2966_v36 = vpop.xlane.xlu1 %2965 }
0x110d   : > { %7286 = vrcp.f32 %v2966_v36 }
0x1110   : > { %v3111_v15 = vpop.xlane.xlu1 %3110 }
0x1111   : > { %7288 = vrcp.f32 %v3111_v15 }
0x1113   : > { %v2975_v5 = vpop.xlane.xlu0 %2974  ;;  %v7285_v46 = vpop.eup %7284 }
0x1114   : > { %v3117_v41 = vpop.xlane.xlu1 %3116  ;;  %7290 = vrcp.f32 %v2975_v5  ;;  %v2982_v0 = vmul.f32 0.5, %v7285_v46 }
0x1115   : > { %7292 = vrcp.f32 %v3117_v41 }
0x1117   : > { %v2969_v50 = vpop.xlane.xlu0 %2968  ;;  %v7287_v52 = vpop.eup %7286 }
0x1118   : > { %7294 = vrcp.f32 %v2969_v50  ;;  %v2980_v45 = vmul.f32 0.5, %v7287_v52 }
0x111b   : > { %v7289_v54 = vpop.eup %7288 }
0x111c   : > { %v3125_v1 = vmul.f32 0.5, %v7289_v54 }
0x111e   : > { %v7291_v22 = vpop.eup %7290 }
0x111f   : > { %v3114_v44 = vpop.xlane.xlu0 %3113  ;;  %v7293_v40 = vpop.eup %7292  ;;  %v2983_v43 = vmul.f32 0.5, %v7291_v22 }
0x1120   : > { %v3127_v51 = vmul.f32 0.5, %v7293_v40 }
0x1122   : > { %v7295_v32 = vpop.eup %7294 }
0x1123   : > { %v3120_v19 = vpop.xlane.xlu0 %3119  ;;  %v2981_v8 = vmul.f32 0.5, %v7295_v32 }
0x1124   : > { %7296 = vrcp.f32 %v3120_v19 }
0x1125   : > { %7298 = vrcp.f32 %v3114_v44 }
0x112e   : > { %v7297_v55 = vpop.eup %7296 }
0x112f   : > { %v7299_v4 = vpop.eup %7298  ;;  %v3128_v7 = vmul.f32 0.5, %v7297_v55 }
0x1130   : > { %v3126_v11 = vmul.f32 0.5, %v7299_v4 }
0x115e   : > { %v6695_v20 = vpop.f32.mrb[52].mxu1 }
0x115f   : > { %v3026_v48 = vpop.f32.mrb[53].mxu1  ;;  %v3043_v35 = vmul.f32 %v6695_v20, %v2982_v0 }
0x1160   : > { %v6696_v34 = vpop.f32.mrb[54].mxu1  ;;  %v3041_v18 = vmul.f32 %v3026_v48, %v2980_v45 }
0x1161   : > { %v3029_v31 = vpop.f32.mrb[55].mxu1  ;;  %v3044_v24 = vmul.f32 %v6696_v34, %v2983_v43  ;;  %v3358_v34 = vsel %vm488_vm0, %v8444_v28, 0 }
0x1162   : > { %v3042_v56 = vmul.f32 %v3029_v31, %v2981_v8 }
0x1167   : > { %v6703_v60 = vpop.f32.mrb[48].mxu0 }
0x1168   : > { %v3196_v63 = vmul.f32 %v6703_v60, %v3127_v51  ;;  %v3179_v6 = vpop.f32.mrb[49].mxu0 }
0x1169   : > { %v3194_v10 = vmul.f32 %v3179_v6, %v3125_v1  ;;  %v6704_v14 = vpop.f32.mrb[50].mxu0 }
0x116a   : > { %v3200_v16 = vadd.f32 %v3196_v63, %v3043_v35  ;;  %v3197_v21 = vmul.f32 %v6704_v14, %v3128_v7  ;;  %v3182_v26 = vpop.f32.mrb[51].mxu0 }
0x116b   : > { %v3198_v30 = vadd.f32 %v3194_v10, %v3041_v18  ;;  %v3195_v5 = vmul.f32 %v3182_v26, %v3126_v11 }
0x116c   : > { %v3205_v36 = vadd.f32 %v3202_v2, %v3200_v16  ;;  %v3201_v50 = vadd.f32 %v3197_v21, %v3044_v24 }
0x116d   : > { %v3203_v15 = vadd.f32 %v3202_v2, %v3198_v30  ;;  %v3199_v44 = vadd.f32 %v3195_v5, %v3042_v56 }
0x116e   : > { %v3206_v41 = vadd.f32 %v3202_v2, %v3201_v50  ;;  %v3209_v20 = vmax.f32 %v3205_v36, 0.0 }
0x116f   : > { %v3204_v19 = vadd.f32 %v3202_v2, %v3199_v44  ;;  %v3207_v48 = vmax.f32 %v3203_v15, 0.0 }
0x1170   : > { %v3210_v46 = vmax.f32 %v3206_v41, 0.0 }
0x1171   : > { %v3208_v52 = vmax.f32 %v3204_v19, 0.0 }
0x1172   : > { %v3212_v54 = vpack.c.bf16 %v3210_v46, %v3209_v20 }
0x1173   : > { %v3211_v22 = vpack.c.bf16 %v3208_v52, %v3207_v48 }
0x1174   : > { %v3250_v40 = vsel %vm488_vm0, %v3212_v54, 0 }
0x1175   : > { %6713 = vmatprep.mubr.msk.bf16.mxu1 %vm488_vm0, %v3211_v22  ;;  %v3247_v31 = vsel %vm488_vm0, %v3211_v22, 0 }
0x1176   : > { %6714 = vmatmul.mubr.msk.bf16.vlgmr.msra.gmra.mrb[56].mxu1 %vm488_vm0, %v3212_v54  ;;  %6718 = vmatpush3.bf16.xpose.msra.mxu0 %v3247_v31 }
0x1177   : > { %6726 = vmatpush3.bf16.xpose.msra.mxu1 %v3358_v34  ;;  %6727 = vmatprep.mubr.msk.bf16.mxu1 %vm488_vm0, %v3211_v22 }
0x1178   : > { %6719 = vmatprep.subr.bf16.mxu0 %v7630_v42 }
0x117e   : > { %6720 = vmatpush3.bf16.xpose.msra.mxu0 %v3250_v40  ;;  %6728 = vmatmul.mubr.msk.bf16.vlgmr.msra.gmra.mrb[60].mxu1 %vm488_vm0, %v3212_v54 }
0x1185   : > { %6722 = vmatmul.mubr.msk.bf16.vlgmr.msra.gmra.mrb[52].mxu0 %vm488_vm0, %v8440_v62 }
0x1249   : > { %v6715_v28 = vpop.f32.mrb[56].mxu1 }
0x124a   : > { %v3286_v32 = vpop.f32.mrb[57].mxu1 }
0x124b   : > { %v6716_v55 = vpop.f32.mrb[58].mxu1 }
0x124c   : > { %v8459_v4 = vpack.c.bf16 %v6716_v55, %v6715_v28  ;;  %v3289_v0 = vpop.f32.mrb[59].mxu1 }
0x124d   : > { %v8461_v51 = vpack.c.bf16 %v3289_v0, %v3286_v32 }
0x124f   : > { %6731 = vmatprep.subr.bf16.mxu0 %v8461_v51 }
0x1250   : > { %6732 = vmatpush3.bf16.msra.mxu0 %v8461_v51 }
0x1251   : > { %v6729_v45 = vpop.f32.mrb[60].mxu1  ;;  %6733 = vmatprep.subr.bf16.mxu0 %v8459_v4 }
0x1252   : > { %v3394_v60 = vpop.f32.mrb[61].mxu1 }
0x1253   : > { %3411 = vperm.xlu1 %6990, %v3394_v60   ;;  %v6730_v1 = vpop.f32.mrb[62].mxu1 }
0x1254   : > { %v3397_v35 = vpop.f32.mrb[63].mxu1  ;;  %6734 = vmatpush3.bf16.msra.mxu0 %v8459_v4 }
0x1255   : > { %3416 = vperm.xlu0 %6991, %v3397_v35  }
0x1257   : > { %6992 = vset.pattern.permute.xlu1 %v7633_v58 }
0x1258   : > { %3559 = vperm.xlu1 %6992, %v3394_v60   ;;  %v3342_v62 = vpop.f32.mrb[52].mxu0 }
0x1259   : > { %v6723_v43 = vpop.f32.mrb[53].mxu0  ;;  %v3432_v8 = vrot.slane %v3342_v62, %v7946_v9  ;;  %v3577_v21 = vrot.slane %v3342_v62, %v7956_v12 }
0x125a   : > { %v3345_v63 = vpop.f32.mrb[54].mxu0 }
0x125b   : > { %v6724_v6 = vpop.f32.mrb[55].mxu0 }
0x125c   : > { %6993 = vset.pattern.permute.xlu1 %v7632_v57 }
0x125d   : > { %3421 = vperm.xlu1 %6993, %v6729_v45  }
0x1261   : > { %3426 = vperm.xlu1 %6993, %v6730_v1  }
0x1265   : > { %6994 = vset.pattern.permute.xlu1 %v7633_v58 }
0x1266   : > { %3567 = vperm.xlu1 %6994, %v6729_v45  }
0x126a   : > { %3563 = vperm.xlu1 %6994, %v3397_v35  }
0x126e   : > { %3571 = vperm.xlu1 %6994, %v6730_v1  }
0x1272   : > { %6995 = vset.pattern.permute.xlu1 %v7632_v57 }
0x12d2   : > { %v3412_v7 = vpop.permute.xlu1 %3411 }
0x12d3   : > { %v3433_v26 = vadd.f32 %v3432_v8, %v3412_v7 }
0x12d4   : > { %v3417_v20 = vpop.permute.xlu0 %3416 }
0x12d5   : > { %v3441_v15 = vmul.f32 0.2, %v3433_v26  ;;  %vm3437_vm6 = vcmp.gt.f32.partialorder %v3433_v26, 0.0  ;;  %v3434_v54 = vadd.f32 %v3432_v8, %v3417_v20 }
0x12d7   : > { %v3560_v18 = vpop.permute.xlu1 %3559  ;;  %v3445_v31 = vsel %vm3437_vm6, %v3433_v26, %v3441_v15  ;;  %v3442_v0 = vmul.f32 0.2, %v3434_v54  ;;  %vm3438_vm9 = vcmp.gt.f32.partialorder %v3434_v54, 0.0 }
0x12d8   : > { %v3578_v44 = vadd.f32 %v3577_v21, %v3560_v18  ;;  %v3449_v55 = vadd.f32 %v8386_v13, %v3445_v31 }
0x12d9   : > { %v3446_v6 = vsel %vm3438_vm9, %v3434_v54, %v3442_v0 }
0x12da   : > { %v3586_v22 = vmul.f32 0.2, %v3578_v44  ;;  %vm3582_vm8 = vcmp.gt.f32.partialorder %v3578_v44, 0.0  ;;  %v3453_v62 = vsel %vm879_vm3, %v3449_v55, -inf }
0x12dc   : > { %v3422_v2 = vpop.permute.xlu1 %3421  ;;  %v3590_v1 = vsel %vm3582_vm8, %v3578_v44, %v3586_v22 }
0x12dd   : > { %v3435_v10 = vadd.f32 %v3432_v8, %v3422_v2  ;;  %v3594_v43 = vadd.f32 %v8386_v13, %v3590_v1  ;;  %v3450_v2 = vadd.f32 %v8401_v29, %v3446_v6 }
0x12df   : > { %vm3439_vm4 = vcmp.gt.f32.partialorder %v3435_v10, 0.0  ;;  %v3443_v14 = vmul.f32 0.2, %v3435_v10 }
0x12e0   : > { %v3427_v11 = vpop.permute.xlu1 %3426 }
0x12e1   : > { %v3436_v24 = vadd.f32 %v3432_v8, %v3427_v11  ;;  %v3447_v16 = vsel %vm3439_vm4, %v3435_v10, %v3443_v14  ;;  %v3598_v8 = vsel %vm879_vm3, %v3594_v43, -inf  ;;  %v3456_v14 = vsel %vm879_vm3, %v3450_v2, -inf }
0x12e2   : > { %v3451_v56 = vadd.f32 %v8382_v17, %v3447_v16 }
0x12e3   : > { %vm3440_vm5 = vcmp.gt.f32.partialorder %v3436_v24, 0.0  ;;  %v3444_v30 = vmul.f32 0.2, %v3436_v24 }
0x12e4   : > { %v3459_v5 = vsel %vm879_vm3, %v3451_v56, -inf }
0x12e5   : > { %v3568_v36 = vpop.permute.xlu1 %3567  ;;  %3460 = vmax.xlane.f32.xlu1 %v3459_v5  ;;  %v3448_v50 = vsel %vm3440_vm5, %v3436_v24, %v3444_v30 }
0x12e6   : > { %v3580_v41 = vadd.f32 %v3577_v21, %v3568_v36  ;;  %v3452_v19 = vadd.f32 %v8395_v23, %v3448_v50 }
0x12e8   : > { %vm3584_vm7 = vcmp.gt.f32.partialorder %v3580_v41, 0.0  ;;  %v3588_v46 = vmul.f32 0.2, %v3580_v41  ;;  %v3462_v48 = vsel %vm879_vm3, %v3452_v19, -inf }
0x12e9   : > { %v3564_v52 = vpop.permute.xlu1 %3563  ;;  %3463 = vmax.xlane.f32.xlu0 %v3462_v48 }
0x12ea   : > { %v3592_v34 = vsel %vm3584_vm7, %v3580_v41, %v3588_v46  ;;  %v3579_v45 = vadd.f32 %v3577_v21, %v3564_v52 }
0x12eb   : > { %v3596_v40 = vadd.f32 %v8382_v17, %v3592_v34 }
0x12ec   : > { %v3587_v63 = vmul.f32 0.2, %v3579_v45  ;;  %vm3583_vm11 = vcmp.gt.f32.partialorder %v3579_v45, 0.0 }
0x12ed   : > { %v3572_v28 = vpop.permute.xlu1 %3571  ;;  %v3604_v32 = vsel %vm879_vm3, %v3596_v40, -inf }
0x12ee   : > { %v3581_v60 = vadd.f32 %v3577_v21, %v3572_v28  ;;  %3605 = vmax.xlane.f32.xlu1 %v3604_v32  ;;  %v3591_v10 = vsel %vm3583_vm11, %v3579_v45, %v3587_v63 }
0x12ef   : > { %v3595_v13 = vadd.f32 %v8401_v29, %v3591_v10 }
0x12f0   : > { %vm3585_vm10 = vcmp.gt.f32.partialorder %v3581_v60, 0.0  ;;  %v3589_v35 = vmul.f32 0.2, %v3581_v60 }
0x12f1   : > { %v3601_v11 = vsel %vm879_vm3, %v3595_v13, -inf }
0x12f2   : > { %3454 = vmax.xlane.f32.xlu1 %v3453_v62  ;;  %v3593_v17 = vsel %vm3585_vm10, %v3581_v60, %v3589_v35 }
0x12f3   : > { %v3597_v7 = vadd.f32 %v8395_v23, %v3593_v17 }
0x12f5   : > { %v3607_v18 = vsel %vm879_vm3, %v3597_v7, -inf }
0x12f6   : > { %3608 = vmax.xlane.f32.xlu0 %v3607_v18  ;;  %3599 = vmax.xlane.f32.xlu1 %v3598_v8 }
0x12fa   : > { %3457 = vmax.xlane.f32.xlu0 %v3456_v14 }
0x12fe   : > { %3602 = vmax.xlane.f32.xlu0 %v3601_v11  ;;  %v7036_v11 = vld [vmem:[%s8805_s3 + $0xc0] sm:$0xff]  }
0x12ff   : > { %6747 = vmatprep.subr.bf16.mxu0 %v7036_v11 }
0x1307   : > { %3646 = vrot.lane.b32.xlu1 %v8461_v51, %s7634_s12 }
0x1314   : > { %3648 = vrot.lane.b32.xlu0 %v8459_v4, %s7634_s12 }
0x1372   : > { %v3461_v23 = vpop.xlane.xlu1 %3460 }
0x1373   : > { %v3467_v24 = vsub.f32 %v3451_v56, %v3461_v23  ;;  %v7037_v23 = vld [vmem:[%s8805_s3 + $0xc8] sm:$0xff]  }
0x1375   : > { %v3473_v16 = vmul.f32 1.442695, %v3467_v24  ;;  %v7038_v24 = vld [vmem:[%s8805_s3 + $0xd0] sm:$0xff]  }
0x1376   : > { %v3464_v21 = vpop.xlane.xlu0 %3463 }
0x1377   : > { %7300 = vpow2.f32 %v3473_v16  ;;  %v3468_v26 = vsub.f32 %v3452_v19, %v3464_v21  ;;  %v7039_v16 = vld [vmem:[%s8805_s3 + $0xd8] sm:$0xff]   ;;  %v8520_v21 = vld [vmem:[#allocation4 + $0xc] sm:$0x3] }
0x1379   : > { %v3475_v30 = vmul.f32 1.442695, %v3468_v26  ;;  %v3872_v26 = vrot.slane %v8520_v21, %v7901_v38 }
0x137b   : > { %7302 = vpow2.f32 %v3475_v30  ;;  %v3606_v5 = vpop.xlane.xlu1 %3605  ;;  %v8524_v30 = vrot.slane %v3872_v26, 1 }
0x137c   : > { %v3612_v41 = vsub.f32 %v3596_v40, %v3606_v5 }
0x137d   : > { %v3875_v33 = vsel %vm488_vm0, %v8524_v30, 0 }
0x137e   : > { %v3618_v19 = vmul.f32 1.442695, %v3612_v41 }
0x137f   : > { %v3455_v29 = vpop.xlane.xlu1 %3454 }
0x1380   : > { %v3465_v36 = vsub.f32 %v3449_v55, %v3455_v29 }
0x1381   : > { %v7301_v50 = vpop.eup %7300 }
0x1382   : > { %v3469_v15 = vmul.f32 1.442695, %v3465_v36  ;;  %v3483_v44 = vsel %vm879_vm3, %v7301_v50, 0.0 }
0x1383   : > { %v3609_v51 = vpop.xlane.xlu0 %3608  ;;  %3484 = vadd.xlane.f32.xlu1 %v3483_v44  ;;  %v3600_v20 = vpop.xlane.xlu1 %3599 }
0x1384   : > { %7304 = vpow2.f32 %v3469_v15  ;;  %v3610_v4 = vsub.f32 %v3594_v43, %v3600_v20  ;;  %v3613_v52 = vsub.f32 %v3597_v7, %v3609_v51 }
0x1385   : > { %v7303_v56 = vpop.eup %7302 }
0x1386   : > { %v3614_v46 = vmul.f32 1.442695, %v3610_v4  ;;  %v3486_v48 = vsel %vm879_vm3, %v7303_v56, 0.0  ;;  %v3620_v40 = vmul.f32 1.442695, %v3613_v52  ;;  %v3498_v7 = vpack.c.bf16 %v7303_v56, %v7301_v50 }
0x1387   : > { %3487 = vadd.xlane.f32.xlu0 %v3486_v48  ;;  %v3458_v54 = vpop.xlane.xlu0 %3457  ;;  %v3647_v22 = vpop.permute.xlu1 %3646 }
0x1388   : > { %v3466_v34 = vsub.f32 %v3450_v2, %v3458_v54  ;;  %6739 = vmatprep.subr.bf16.mxu1 %v3647_v22  ;;  %7306 = vpow2.f32 %v3614_v46 }
0x1389   : > { %6740 = vmatpush3.bf16.msra.mxu1 %v3647_v22  ;;  %7308 = vpow2.f32 %v3618_v19 }
0x138a   : > { %v3471_v31 = vmul.f32 1.442695, %v3466_v34 }
0x138b   : > { %v3603_v28 = vpop.xlane.xlu0 %3602 }
0x138c   : > { %7310 = vpow2.f32 %v3471_v31  ;;  %v3611_v32 = vsub.f32 %v3595_v13, %v3603_v28 }
0x138d   : > { %7312 = vpow2.f32 %v3620_v40 }
0x138e   : > { %v7305_v55 = vpop.eup %7304  ;;  %v3616_v0 = vmul.f32 1.442695, %v3611_v32 }
0x138f   : > { %v3649_v45 = vpop.permute.xlu0 %3648  ;;  %v3477_v60 = vsel %vm879_vm3, %v7305_v55, 0.0 }
0x1390   : > { %7314 = vpow2.f32 %v3616_v0  ;;  %3478 = vadd.xlane.f32.xlu1 %v3477_v60  ;;  %6741 = vmatprep.subr.bf16.mxu1 %v3649_v45 }
0x1391   : > { %6742 = vmatpush3.bf16.msra.mxu1 %v3649_v45 }
0x1392   : > { %6759 = vmatprep.subr.bf16.mxu1 %v7630_v42  ;;  %v7307_v1 = vpop.eup %7306 }
0x1393   : > { %v3622_v35 = vsel %vm879_vm3, %v7307_v1, 0.0  ;;  %v7309_v62 = vpop.eup %7308 }
0x1394   : > { %3623 = vadd.xlane.f32.xlu1 %v3622_v35  ;;  %v3628_v6 = vsel %vm879_vm3, %v7309_v62, 0.0 }
0x1396   : > { %v7311_v43 = vpop.eup %7310 }
0x1397   : > { %v3480_v63 = vsel %vm879_vm3, %v7311_v43, 0.0  ;;  %v3497_v17 = vpack.c.bf16 %v7311_v43, %v7305_v55  ;;  %v7313_v18 = vpop.eup %7312 }
0x1398   : > { %3481 = vadd.xlane.f32.xlu0 %v3480_v63  ;;  %3629 = vadd.xlane.f32.xlu1 %v3628_v6  ;;  %v3643_v14 = vpack.c.bf16 %v7313_v18, %v7309_v62  ;;  %v3631_v13 = vsel %vm879_vm3, %v7313_v18, 0.0  ;;  %v3715_v6 = vld [vmem:[#allocation10 + $0x25] ss:$0 sm:$0xff] }
0x1399   : > { %6735 = vmatprep.mubr.msk.bf16.mxu0 %vm879_vm3, %v3497_v17 }
0x139a   : > { %v7315_v8 = vpop.eup %7314  ;;  %6736 = vmatmul.mubr.msk.bf16.vlgmr.msra.gmra.mrb[56].mxu0 %vm879_vm3, %v3498_v7 }
0x139b   : > { %v3625_v2 = vsel %vm879_vm3, %v7315_v8, 0.0  ;;  %v3642_v10 = vpack.c.bf16 %v7315_v8, %v7307_v1  ;;  %6748 = vmatpush3.bf16.msra.mxu0 %v7036_v11 }
0x139c   : > { %3626 = vadd.xlane.f32.xlu0 %v3625_v2  ;;  %6749 = vmatprep.subr.bf16.mxu0 %v7037_v23 }
0x139d   : > { %6743 = vmatprep.mubr.msk.bf16.mxu1 %vm879_vm3, %v3642_v10 }
0x139e   : > { %6744 = vmatmul.mubr.msk.bf16.vlgmr.msra.gmra.mrb[64].mxu1 %vm879_vm3, %v3643_v14 }
0x139f   : > { %6763 = vmatprep.mubr.msk.bf16.mxu1 %vm7631_vm1, %v7630_v42  ;;  %6750 = vmatpush3.bf16.msra.mxu0 %v7037_v23 }
0x13a0   : > { %3632 = vadd.xlane.f32.xlu0 %v3631_v13  ;;  %6751 = vmatprep.subr.bf16.mxu0 %v7038_v24 }
0x13a3   : > { %6752 = vmatpush3.bf16.msra.mxu0 %v7038_v24 }
0x13a4   : > { %6753 = vmatprep.subr.bf16.mxu0 %v7039_v16 }
0x13a7   : > { %6754 = vmatpush3.bf16.msra.mxu0 %v7039_v16 }
0x13a8   : > { %6881 = vmatprep.subr.msk.bf16.mxu0 %vm488_vm0, %v8524_v30 }
0x1410   : > { %v3485_v5 = vpop.xlane.xlu1 %3484 }
0x1411   : > { %7316 = vrcp.f32 %v3485_v5 }
0x1414   : > { %v3488_v29 = vpop.xlane.xlu0 %3487 }
0x1415   : > { %7318 = vrcp.f32 %v3488_v29 }
0x141b   : > { %v7317_v20 = vpop.eup %7316 }
0x141c   : > { %v3495_v40 = vmul.f32 0.5, %v7317_v20 }
0x141d   : > { %v3479_v36 = vpop.xlane.xlu1 %3478 }
0x141e   : > { %7320 = vrcp.f32 %v3479_v36 }
0x141f   : > { %v7319_v4 = vpop.eup %7318 }
0x1420   : > { %v3496_v1 = vmul.f32 0.5, %v7319_v4 }
0x1421   : > { %v3624_v15 = vpop.xlane.xlu1 %3623 }
0x1422   : > { %7322 = vrcp.f32 %v3624_v15 }
0x1425   : > { %v3482_v50 = vpop.xlane.xlu0 %3481  ;;  %v3630_v41 = vpop.xlane.xlu1 %3629 }
0x1426   : > { %7324 = vrcp.f32 %v3630_v41 }
0x1427   : > { %7326 = vrcp.f32 %v3482_v50 }
0x1428   : > { %v7321_v56 = vpop.eup %7320 }
0x1429   : > { %v3627_v44 = vpop.xlane.xlu0 %3626  ;;  %v3493_v55 = vmul.f32 0.5, %v7321_v56 }
0x142c   : > { %v7323_v46 = vpop.eup %7322 }
0x142d   : > { %v3633_v51 = vpop.xlane.xlu0 %3632  ;;  %v3638_v45 = vmul.f32 0.5, %v7323_v46 }
0x142e   : > { %7328 = vrcp.f32 %v3633_v51 }
0x142f   : > { %7330 = vrcp.f32 %v3627_v44 }
0x1430   : > { %v7325_v48 = vpop.eup %7324 }
0x1431   : > { %v7327_v52 = vpop.eup %7326  ;;  %v3640_v32 = vmul.f32 0.5, %v7325_v48 }
0x1432   : > { %v3494_v17 = vmul.f32 0.5, %v7327_v52 }
0x1438   : > { %v7329_v22 = vpop.eup %7328 }
0x1439   : > { %v7331_v31 = vpop.eup %7330  ;;  %v3641_v43 = vmul.f32 0.5, %v7329_v22 }
0x143a   : > { %v3639_v8 = vmul.f32 0.5, %v7331_v31 }
0x146d   : > { %v6737_v19 = vpop.f32.mrb[56].mxu0 }
0x146e   : > { %v3539_v54 = vpop.f32.mrb[57].mxu0  ;;  %v3556_v60 = vmul.f32 %v6737_v19, %v3495_v40 }
0x146f   : > { %v6738_v34 = vpop.f32.mrb[58].mxu0  ;;  %v3554_v63 = vmul.f32 %v3539_v54, %v3493_v55 }
0x1470   : > { %v3542_v28 = vpop.f32.mrb[59].mxu0  ;;  %v3557_v2 = vmul.f32 %v6738_v34, %v3496_v1 }
0x1471   : > { %v6745_v0 = vpop.f32.mrb[64].mxu1  ;;  %v3555_v11 = vmul.f32 %v3542_v28, %v3494_v17 }
0x1472   : > { %v3709_v35 = vmul.f32 %v6745_v0, %v3640_v32  ;;  %v3692_v62 = vpop.f32.mrb[65].mxu1 }
0x1473   : > { %v3707_v7 = vmul.f32 %v3692_v62, %v3638_v45  ;;  %v6746_v18 = vpop.f32.mrb[66].mxu1 }
0x1474   : > { %v3713_v10 = vadd.f32 %v3709_v35, %v3556_v60  ;;  %v3710_v14 = vmul.f32 %v6746_v18, %v3641_v43  ;;  %v3695_v13 = vpop.f32.mrb[67].mxu1 }
0x1475   : > { %v3711_v23 = vadd.f32 %v3707_v7, %v3554_v63  ;;  %v3708_v24 = vmul.f32 %v3695_v13, %v3639_v8 }
0x1476   : > { %v3718_v16 = vadd.f32 %v3715_v6, %v3713_v10  ;;  %v3714_v26 = vadd.f32 %v3710_v14, %v3557_v2  ;;  %v8588_v2 = vld [vmem:[%s7953_s18] sm:$0xff] }
0x1477   : > { %v3716_v5 = vadd.f32 %v3715_v6, %v3711_v23  ;;  %v3712_v29 = vadd.f32 %v3708_v24, %v3555_v11 }
0x1478   : > { %v3719_v36 = vadd.f32 %v3715_v6, %v3714_v26  ;;  %v8534_v44 = vadd.f32 %v3718_v16, %v2696_v53 }
0x1479   : > { %v8530_v50 = vadd.f32 %v3716_v5, %v2694_v27  ;;  %v3717_v15 = vadd.f32 %v3715_v6, %v3712_v29  ;;  %v8584_v6 = vld [vmem:[%s7953_s18 + $0x10] sm:$0xff] }
0x147a   : > { %v8538_v41 = vadd.f32 %v3719_v36, %v2697_v25  ;;  %v3726_v27 = vmax.f32 %v8534_v44, 0.0  ;;  %v4892_v44 = vsub.s32 2, %v7898_v37 }
0x147b   : > { %v8542_v51 = vadd.f32 %v3717_v15, %v2695_v39  ;;  %v3724_v4 = vmax.f32 %v8530_v50, 0.0  ;;  %v4896_v50 = vsub.s32 3, %v7898_v37 }
0x147c   : > { %v3727_v20 = vmax.f32 %v8538_v41, 0.0 }
0x147d   : > { %v3725_v61 = vmax.f32 %v8542_v51, 0.0 }
0x147e   : > { %v3729_v59 = vpack.c.bf16 %v3727_v20, %v3726_v27 }
0x147f   : > { %v3728_v3 = vpack.c.bf16 %v3725_v61, %v3724_v4 }
0x1480   : > { %v3767_v39 = vsel %vm488_vm0, %v3729_v59, 0 }
0x1481   : > { %6755 = vmatprep.mubr.msk.bf16.mxu0 %vm488_vm0, %v3728_v3  ;;  %v3764_v25 = vsel %vm488_vm0, %v3728_v3, 0 }
0x1482   : > { %6756 = vmatmul.mubr.msk.bf16.vlgmr.msra.gmra.mrb[60].mxu0 %vm488_vm0, %v3729_v59  ;;  %6760 = vmatpush3.bf16.xpose.msra.mxu1 %v3764_v25 }
0x1483   : > { %6768 = vmatpush3.bf16.xpose.msra.mxu0 %v3875_v33  ;;  %6769 = vmatprep.mubr.msk.bf16.mxu0 %vm488_vm0, %v3728_v3 }
0x1484   : > { %6761 = vmatprep.subr.bf16.mxu1 %v7630_v42 }
0x148a   : > { %6762 = vmatpush3.bf16.xpose.msra.mxu1 %v3767_v39  ;;  %6770 = vmatmul.mubr.msk.bf16.vlgmr.msra.gmra.mrb[64].mxu0 %vm488_vm0, %v3729_v59 }
0x1491   : > { %6764 = vmatmul.mubr.msk.bf16.vlgmr.msra.gmra.mrb[68].mxu1 %vm488_vm0, %v8520_v21 }
0x1555   : > { %v6757_v53 = vpop.f32.mrb[60].mxu0 }
0x1556   : > { %v3803_v30 = vpop.f32.mrb[61].mxu0 }
0x1557   : > { %v6758_v56 = vpop.f32.mrb[62].mxu0 }
0x1558   : > { %v8567_v46 = vpack.c.bf16 %v6758_v56, %v6757_v53  ;;  %v3806_v48 = vpop.f32.mrb[63].mxu0  ;;  %v8596_v56 = vld [vmem:[%s7953_s18 + $0x18] sm:$0xff] }
0x1559   : > { %v8569_v19 = vpack.c.bf16 %v3806_v48, %v3803_v30 }
0x155b   : > { %6773 = vmatprep.subr.bf16.mxu1 %v8569_v19 }
0x155c   : > { %6774 = vmatpush3.bf16.msra.mxu1 %v8569_v19 }
0x155d   : > { %v6771_v52 = vpop.f32.mrb[64].mxu0  ;;  %6775 = vmatprep.subr.bf16.mxu1 %v8567_v46 }
0x155e   : > { %3938 = vperm.xlu0 %6991, %v6771_v52   ;;  %v3911_v54 = vpop.f32.mrb[65].mxu0 }
0x155f   : > { %3928 = vperm.xlu1 %6995, %v3911_v54   ;;  %v6772_v22 = vpop.f32.mrb[66].mxu0 }
0x1560   : > { %v3914_v21 = vpop.f32.mrb[67].mxu0  ;;  %6776 = vmatpush3.bf16.msra.mxu1 %v8567_v46 }
0x1562   : > { %3933 = vperm.xlu0 %6991, %v3914_v21  }
0x1563   : > { %6996 = vset.pattern.permute.xlu1 %v7633_v58 }
0x1564   : > { %4076 = vperm.xlu1 %6996, %v3911_v54   ;;  %v3859_v34 = vpop.f32.mrb[68].mxu1 }
0x1565   : > { %v6765_v31 = vpop.f32.mrb[69].mxu1  ;;  %v3949_v32 = vrot.slane %v3859_v34, %v7946_v9  ;;  %v4094_v1 = vrot.slane %v3859_v34, %v7956_v12 }
0x1566   : > { %6998 = vset.pattern.permute.xlu0 %v7633_v58  ;;  %v3862_v40 = vpop.f32.mrb[70].mxu1 }
0x1567   : > { %4084 = vperm.xlu0 %6998, %v6771_v52   ;;  %v6766_v28 = vpop.f32.mrb[71].mxu1 }
0x1568   : > { %6997 = vset.pattern.permute.xlu1 %v7632_v57  ;;  %v8603_v28 = vld [vmem:[%s7953_s18 + $0x8] sm:$0xff] }
0x1569   : > { %3943 = vperm.xlu1 %6997, %v6772_v22  }
0x156b   : > { %7000 = vset.pattern.permute.xlu0 %v7632_v57 }
0x156d   : > { %6999 = vset.pattern.permute.xlu1 %v7633_v58 }
0x156e   : > { %4080 = vperm.xlu1 %6999, %v3914_v21  }
0x1572   : > { %4088 = vperm.xlu1 %6999, %v6772_v22  }
0x1576   : > { %7001 = vset.pattern.permute.xlu1 %v7632_v57 }
0x15dd   : > { %v3939_v55 = vpop.permute.xlu0 %3938 }
0x15de   : > { %v3952_v0 = vadd.f32 %v3949_v32, %v3939_v55  ;;  %v3929_v45 = vpop.permute.xlu1 %3928 }
0x15df   : > { %v3950_v60 = vadd.f32 %v3949_v32, %v3929_v45 }
0x15e0   : > { %vm3956_vm12 = vcmp.gt.f32.partialorder %v3952_v0, 0.0  ;;  %v3960_v35 = vmul.f32 0.2, %v3952_v0 }
0x15e1   : > { %vm3954_vm13 = vcmp.gt.f32.partialorder %v3950_v60, 0.0  ;;  %v3958_v62 = vmul.f32 0.2, %v3950_v60  ;;  %v3934_v43 = vpop.permute.xlu0 %3933 }
0x15e2   : > { %v3964_v63 = vsel %vm3956_vm12, %v3952_v0, %v3960_v35  ;;  %v3951_v13 = vadd.f32 %v3949_v32, %v3934_v43 }
0x15e3   : > { %v4077_v17 = vpop.permute.xlu1 %4076  ;;  %v3968_v7 = vadd.f32 %v8584_v6, %v3964_v63  ;;  %v3962_v18 = vsel %vm3954_vm13, %v3950_v60, %v3958_v62 }
0x15e4   : > { %v4095_v8 = vadd.f32 %v4094_v1, %v4077_v17  ;;  %v3966_v10 = vadd.f32 %v8588_v2, %v3962_v18  ;;  %v3959_v36 = vmul.f32 0.2, %v3951_v13  ;;  %vm3955_vm4 = vcmp.gt.f32.partialorder %v3951_v13, 0.0 }
0x15e5   : > { %v3976_v14 = vsel %vm879_vm3, %v3968_v7, -inf }
0x15e6   : > { %v4085_v11 = vpop.permute.xlu0 %4084  ;;  %3977 = vmax.xlane.f32.xlu0 %v3976_v14  ;;  %v3970_v23 = vsel %vm879_vm3, %v3966_v10, -inf  ;;  %v4103_v24 = vmul.f32 0.2, %v4095_v8  ;;  %vm4099_vm14 = vcmp.gt.f32.partialorder %v4095_v8, 0.0  ;;  %v3963_v54 = vsel %vm3955_vm4, %v3951_v13, %v3959_v36 }
0x15e7   : > { %v4097_v16 = vadd.f32 %v4094_v1, %v4085_v11  ;;  %3971 = vmax.xlane.f32.xlu1 %v3970_v23 }
0x15e8   : > { %v3944_v26 = vpop.permute.xlu1 %3943  ;;  %v4107_v59 = vsel %vm4099_vm14, %v4095_v8, %v4103_v24 }
0x15e9   : > { %vm4101_vm15 = vcmp.gt.f32.partialorder %v4097_v16, 0.0  ;;  %v4105_v5 = vmul.f32 0.2, %v4097_v16  ;;  %v3953_v29 = vadd.f32 %v3949_v32, %v3944_v26  ;;  %v4111_v52 = vadd.f32 %v8588_v2, %v4107_v59 }
0x15ea   : > { %v3967_v32 = vadd.f32 %v8603_v28, %v3963_v54 }
0x15eb   : > { %vm3957_vm2 = vcmp.gt.f32.partialorder %v3953_v29, 0.0  ;;  %v3961_v15 = vmul.f32 0.2, %v3953_v29  ;;  %v4109_v3 = vsel %vm4101_vm15, %v4097_v16, %v4105_v5  ;;  %v4115_v40 = vsel %vm879_vm3, %v4111_v52, -inf }
0x15ec   : > { %v4113_v33 = vadd.f32 %v8584_v6, %v4109_v3  ;;  %v3973_v0 = vsel %vm879_vm3, %v3967_v32, -inf }
0x15ed   : > { %v4081_v25 = vpop.permute.xlu1 %4080  ;;  %v3965_v39 = vsel %vm3957_vm2, %v3953_v29, %v3961_v15 }
0x15ee   : > { %v4096_v53 = vadd.f32 %v4094_v1, %v4081_v25  ;;  %v4121_v30 = vsel %vm879_vm3, %v4113_v33, -inf  ;;  %v3969_v48 = vadd.f32 %v8596_v56, %v3965_v39 }
0x15ef   : > { %4122 = vmax.xlane.f32.xlu0 %v4121_v30 }
0x15f0   : > { %v3979_v22 = vsel %vm879_vm3, %v3969_v48, -inf  ;;  %v4104_v34 = vmul.f32 0.2, %v4096_v53  ;;  %vm4100_vm5 = vcmp.gt.f32.partialorder %v4096_v53, 0.0 }
0x15f1   : > { %v4089_v21 = vpop.permute.xlu1 %4088  ;;  %3980 = vmax.xlane.f32.xlu1 %v3979_v22 }
0x15f2   : > { %v4098_v31 = vadd.f32 %v4094_v1, %v4089_v21  ;;  %v4108_v60 = vsel %vm4100_vm5, %v4096_v53, %v4104_v34 }
0x15f3   : > { %4116 = vmax.xlane.f32.xlu0 %v4115_v40  ;;  %v4112_v1 = vadd.f32 %v8603_v28, %v4108_v60 }
0x15f4   : > { %vm4102_vm6 = vcmp.gt.f32.partialorder %v4098_v31, 0.0  ;;  %v4106_v55 = vmul.f32 0.2, %v4098_v31 }
0x15f5   : > { %v4118_v43 = vsel %vm879_vm3, %v4112_v1, -inf }
0x15f6   : > { %v4110_v45 = vsel %vm4102_vm6, %v4098_v31, %v4106_v55 }
0x15f7   : > { %3974 = vmax.xlane.f32.xlu0 %v3973_v0  ;;  %v4114_v35 = vadd.f32 %v8596_v56, %v4110_v45 }
0x15f9   : > { %v4124_v62 = vsel %vm879_vm3, %v4114_v35, -inf }
0x15fa   : > { %4125 = vmax.xlane.f32.xlu1 %v4124_v62 }
0x15fe   : > { %4119 = vmax.xlane.f32.xlu1 %v4118_v43 }
0x160d   : > { %4163 = vrot.lane.b32.xlu0 %v8569_v19, %s7634_s12 }
0x160f   : > { %4165 = vrot.lane.b32.xlu1 %v8567_v46, %s7634_s12 }
0x1673   : > { %v3978_v63 = vpop.xlane.xlu0 %3977 }
0x1674   : > { %v3984_v17 = vsub.f32 %v3968_v7, %v3978_v63  ;;  %v3972_v18 = vpop.xlane.xlu1 %3971 }
0x1675   : > { %v3982_v8 = vsub.f32 %v3966_v10, %v3972_v18 }
0x1676   : > { %v3990_v14 = vmul.f32 1.442695, %v3984_v17 }
0x1677   : > { %v3986_v13 = vmul.f32 1.442695, %v3982_v8  ;;  %v7040_v8 = vld [vmem:[%s8805_s3 + $0xe0] sm:$0xff]  }
0x1678   : > { %7332 = vpow2.f32 %v3990_v14  ;;  %6789 = vmatprep.subr.bf16.mxu1 %v7040_v8  ;;  %v7041_v14 = vld [vmem:[%s8805_s3 + $0xe8] sm:$0xff]  }
0x1679   : > { %7334 = vpow2.f32 %v3986_v13  ;;  %v7042_v13 = vld [vmem:[%s8805_s3 + $0xf0] sm:$0xff]  }
0x167c   : > { %v4123_v11 = vpop.xlane.xlu0 %4122 }
0x167d   : > { %v4129_v19 = vsub.f32 %v4113_v33, %v4123_v11  ;;  %v7043_v11 = vld [vmem:[%s8805_s3 + $0xf8] sm:$0xff]  }
0x167e   : > { %v3981_v23 = vpop.xlane.xlu1 %3980 }
0x167f   : > { %v3985_v24 = vsub.f32 %v3969_v48, %v3981_v23  ;;  %v4135_v59 = vmul.f32 1.442695, %v4129_v19  ;;  %v8642_v23 = vld [vmem:[#allocation4 + $0xe] sm:$0x3] }
0x1680   : > { %v4117_v16 = vpop.xlane.xlu0 %4116 }
0x1681   : > { %v3992_v26 = vmul.f32 1.442695, %v3985_v24  ;;  %v4127_v5 = vsub.f32 %v4111_v52, %v4117_v16  ;;  %v4385_v24 = vrot.slane %v8642_v23, %v7901_v38 }
0x1682   : > { %v7333_v29 = vpop.eup %7332 }
0x1683   : > { %v7335_v36 = vpop.eup %7334  ;;  %7336 = vpow2.f32 %v3992_v26  ;;  %v4131_v15 = vmul.f32 1.442695, %v4127_v5  ;;  %v4000_v46 = vsel %vm879_vm3, %v7333_v29, 0.0  ;;  %v8646_v16 = vrot.slane %v4385_v24, 1 }
0x1684   : > { %4001 = vadd.xlane.f32.xlu0 %v4000_v46  ;;  %v3975_v7 = vpop.xlane.xlu0 %3974  ;;  %v3994_v10 = vsel %vm879_vm3, %v7335_v36, 0.0 }
0x1685   : > { %7338 = vpow2.f32 %v4131_v15  ;;  %v3983_v3 = vsub.f32 %v3967_v32, %v3975_v7  ;;  %3995 = vadd.xlane.f32.xlu1 %v3994_v10 }
0x1687   : > { %v3988_v25 = vmul.f32 1.442695, %v3983_v3  ;;  %v4126_v39 = vpop.xlane.xlu1 %4125 }
0x1688   : > { %v4130_v53 = vsub.f32 %v4114_v35, %v4126_v39  ;;  %v4164_v30 = vpop.permute.xlu0 %4163 }
0x1689   : > { %7340 = vpow2.f32 %v3988_v25  ;;  %6781 = vmatprep.subr.bf16.mxu0 %v4164_v30 }
0x168a   : > { %6782 = vmatpush3.bf16.msra.mxu0 %v4164_v30  ;;  %7342 = vpow2.f32 %v4135_v59  ;;  %v4137_v33 = vmul.f32 1.442695, %v4130_v53 }
0x168b   : > { %v4120_v48 = vpop.xlane.xlu1 %4119 }
0x168c   : > { %v4128_v52 = vsub.f32 %v4112_v1, %v4120_v48  ;;  %7344 = vpow2.f32 %v4137_v33 }
0x168d   : > { %v7337_v54 = vpop.eup %7336 }
0x168e   : > { %v4133_v22 = vmul.f32 1.442695, %v4128_v52  ;;  %v4003_v21 = vsel %vm879_vm3, %v7337_v54, 0.0  ;;  %v4015_v60 = vpack.c.bf16 %v7337_v54, %v7333_v29 }
0x168f   : > { %v7339_v34 = vpop.eup %7338  ;;  %4004 = vadd.xlane.f32.xlu1 %v4003_v21  ;;  %v4166_v31 = vpop.permute.xlu1 %4165 }
0x1690   : > { %7346 = vpow2.f32 %v4133_v22  ;;  %6783 = vmatprep.subr.bf16.mxu0 %v4166_v31  ;;  %v4139_v40 = vsel %vm879_vm3, %v7339_v34, 0.0 }
0x1691   : > { %4140 = vadd.xlane.f32.xlu0 %v4139_v40  ;;  %6784 = vmatpush3.bf16.msra.mxu0 %v4166_v31 }
0x1692   : > { %6801 = vmatprep.subr.bf16.mxu0 %v7630_v42 }
0x1693   : > { %v7341_v32 = vpop.eup %7340 }
0x1694   : > { %v3997_v55 = vsel %vm879_vm3, %v7341_v32, 0.0  ;;  %v4014_v0 = vpack.c.bf16 %v7341_v32, %v7335_v36  ;;  %v7343_v45 = vpop.eup %7342 }
0x1695   : > { %3998 = vadd.xlane.f32.xlu0 %v3997_v55  ;;  %v4145_v35 = vsel %vm879_vm3, %v7343_v45, 0.0 }
0x1696   : > { %6777 = vmatprep.mubr.msk.bf16.mxu1 %vm879_vm3, %v4014_v0  ;;  %v7345_v62 = vpop.eup %7344 }
0x1697   : > { %6778 = vmatmul.mubr.msk.bf16.vlgmr.msra.gmra.mrb[72].mxu1 %vm879_vm3, %v4015_v60  ;;  %v4160_v17 = vpack.c.bf16 %v7345_v62, %v7343_v45  ;;  %v4148_v18 = vsel %vm879_vm3, %v7345_v62, 0.0 }
0x1698   : > { %6790 = vmatpush3.bf16.msra.mxu1 %v7040_v8 }
0x1699   : > { %4146 = vadd.xlane.f32.xlu0 %v4145_v35  ;;  %6791 = vmatprep.subr.bf16.mxu1 %v7041_v14 }
0x169a   : > { %v7347_v1 = vpop.eup %7346 }
0x169b   : > { %v4142_v43 = vsel %vm879_vm3, %v7347_v1, 0.0  ;;  %v4159_v63 = vpack.c.bf16 %v7347_v1, %v7339_v34  ;;  %v4232_v1 = vld [vmem:[#allocation10 + $0x26] ss:$0 sm:$0xff] }
0x169c   : > { %4143 = vadd.xlane.f32.xlu1 %v4142_v43  ;;  %6792 = vmatpush3.bf16.msra.mxu1 %v7041_v14 }
0x169d   : > { %6785 = vmatprep.mubr.msk.bf16.mxu0 %vm879_vm3, %v4159_v63  ;;  %6793 = vmatprep.subr.bf16.mxu1 %v7042_v13 }
0x169e   : > { %6786 = vmatmul.mubr.msk.bf16.vlgmr.msra.gmra.mrb[68].mxu0 %vm879_vm3, %v4160_v17 }
0x169f   : > { %6805 = vmatprep.mubr.msk.bf16.mxu0 %vm7631_vm1, %v7630_v42 }
0x16a0   : > { %4149 = vadd.xlane.f32.xlu1 %v4148_v18  ;;  %6794 = vmatpush3.bf16.msra.mxu1 %v7042_v13 }
0x16a1   : > { %6795 = vmatprep.subr.bf16.mxu1 %v7043_v11 }
0x16a4   : > { %6796 = vmatpush3.bf16.msra.mxu1 %v7043_v11 }
0x16a5   : > { %6882 = vmatprep.subr.msk.bf16.mxu1 %vm488_vm0, %v8646_v16 }
0x1711   : > { %v4002_v26 = vpop.xlane.xlu0 %4001 }
0x1712   : > { %v3996_v5 = vpop.xlane.xlu1 %3995  ;;  %7348 = vrcp.f32 %v4002_v26 }
0x1713   : > { %7350 = vrcp.f32 %v3996_v5 }
0x171c   : > { %v4005_v36 = vpop.xlane.xlu1 %4004  ;;  %v7349_v38 = vpop.eup %7348 }
0x171d   : > { %7352 = vrcp.f32 %v4005_v36  ;;  %v7351_v10 = vpop.eup %7350  ;;  %v4012_v22 = vmul.f32 0.5, %v7349_v38 }
0x171e   : > { %v4141_v29 = vpop.xlane.xlu0 %4140  ;;  %v4010_v34 = vmul.f32 0.5, %v7351_v10 }
0x171f   : > { %7354 = vrcp.f32 %v4141_v29 }
0x1722   : > { %v3999_v19 = vpop.xlane.xlu0 %3998 }
0x1726   : > { %v4147_v46 = vpop.xlane.xlu0 %4146 }
0x1727   : > { %7356 = vrcp.f32 %v4147_v46  ;;  %v7353_v59 = vpop.eup %7352 }
0x1728   : > { %7358 = vrcp.f32 %v3999_v19  ;;  %v4013_v55 = vmul.f32 0.5, %v7353_v59 }
0x1729   : > { %v4144_v15 = vpop.xlane.xlu1 %4143  ;;  %v7355_v39 = vpop.eup %7354 }
0x172a   : > { %v4155_v40 = vmul.f32 0.5, %v7355_v39  ;;  %v4388_v39 = vsel %vm488_vm0, %v8646_v16, 0 }
0x172d   : > { %v4150_v7 = vpop.xlane.xlu1 %4149 }
0x172e   : > { %7360 = vrcp.f32 %v4150_v7 }
0x172f   : > { %7362 = vrcp.f32 %v4144_v15 }
0x1731   : > { %v7357_v30 = vpop.eup %7356 }
0x1732   : > { %v7359_v48 = vpop.eup %7358  ;;  %v4157_v21 = vmul.f32 0.5, %v7357_v30 }
0x1733   : > { %v4011_v62 = vmul.f32 0.5, %v7359_v48 }
0x1738   : > { %v7361_v52 = vpop.eup %7360 }
0x1739   : > { %v7363_v54 = vpop.eup %7362  ;;  %v4158_v60 = vmul.f32 0.5, %v7361_v52 }
0x173a   : > { %v4156_v17 = vmul.f32 0.5, %v7363_v54 }
0x176a   : > { %v6779_v3 = vpop.f32.mrb[72].mxu1 }
0x176b   : > { %v4056_v25 = vpop.f32.mrb[73].mxu1  ;;  %v4073_v32 = vmul.f32 %v6779_v3, %v4012_v22 }
0x176c   : > { %v6780_v53 = vpop.f32.mrb[74].mxu1  ;;  %v4071_v35 = vmul.f32 %v4056_v25, %v4010_v34 }
0x176d   : > { %v4059_v33 = vpop.f32.mrb[75].mxu1  ;;  %v4074_v18 = vmul.f32 %v6780_v53, %v4013_v55 }
0x176e   : > { %v4072_v11 = vmul.f32 %v4059_v33, %v4011_v62 }
0x1771   : > { %v6787_v31 = vpop.f32.mrb[68].mxu0 }
0x1772   : > { %v4226_v0 = vmul.f32 %v6787_v31, %v4157_v21  ;;  %v4209_v45 = vpop.f32.mrb[69].mxu0 }
0x1773   : > { %v4224_v43 = vmul.f32 %v4209_v45, %v4155_v40  ;;  %v6788_v63 = vpop.f32.mrb[70].mxu0 }
0x1774   : > { %v4230_v8 = vadd.f32 %v4226_v0, %v4073_v32  ;;  %v4227_v14 = vmul.f32 %v6788_v63, %v4158_v60  ;;  %v4212_v13 = vpop.f32.mrb[71].mxu0 }
0x1775   : > { %v4228_v24 = vadd.f32 %v4224_v43, %v4071_v35  ;;  %v4225_v26 = vmul.f32 %v4212_v13, %v4156_v17 }
0x1776   : > { %v4235_v5 = vadd.f32 %v4232_v1, %v4230_v8  ;;  %v4231_v29 = vadd.f32 %v4227_v14, %v4074_v18 }
0x1777   : > { %v4233_v36 = vadd.f32 %v4232_v1, %v4228_v24  ;;  %v4229_v19 = vadd.f32 %v4225_v26, %v4072_v11 }
0x1778   : > { %v4236_v15 = vadd.f32 %v4232_v1, %v4231_v29  ;;  %v4239_v7 = vmax.f32 %v4235_v5, 0.0 }
0x1779   : > { %v4234_v46 = vadd.f32 %v4232_v1, %v4229_v19  ;;  %v4237_v10 = vmax.f32 %v4233_v36, 0.0 }
0x177a   : > { %v4240_v38 = vmax.f32 %v4236_v15, 0.0 }
0x177b   : > { %v4238_v3 = vmax.f32 %v4234_v46, 0.0 }
0x177c   : > { %v4242_v59 = vpack.c.bf16 %v4240_v38, %v4239_v7 }
0x177d   : > { %v4241_v25 = vpack.c.bf16 %v4238_v3, %v4237_v10  ;;  %v7044_v10 = vld [vmem:[%s8805_s3 + $0x100] sm:$0xff]  }
0x177e   : > { %v4280_v30 = vsel %vm488_vm0, %v4242_v59, 0 }
0x177f   : > { %6797 = vmatprep.mubr.msk.bf16.mxu1 %vm488_vm0, %v4241_v25  ;;  %v4277_v53 = vsel %vm488_vm0, %v4241_v25, 0 }
0x1780   : > { %6798 = vmatmul.mubr.msk.bf16.vlgmr.msra.gmra.mrb[76].mxu1 %vm488_vm0, %v4242_v59  ;;  %6802 = vmatpush3.bf16.xpose.msra.mxu0 %v4277_v53 }
0x1781   : > { %6810 = vmatpush3.bf16.xpose.msra.mxu1 %v4388_v39  ;;  %6811 = vmatprep.mubr.msk.bf16.mxu1 %vm488_vm0, %v4241_v25 }
0x1782   : > { %6803 = vmatprep.subr.bf16.mxu0 %v7630_v42 }
0x1788   : > { %6804 = vmatpush3.bf16.xpose.msra.mxu0 %v4280_v30  ;;  %6812 = vmatmul.mubr.msk.bf16.vlgmr.msra.gmra.mrb[80].mxu1 %vm488_vm0, %v4242_v59 }
0x178f   : > { %6806 = vmatmul.mubr.msk.bf16.vlgmr.msra.gmra.mrb[72].mxu0 %vm488_vm0, %v8642_v23 }
0x1853   : > { %v6799_v16 = vpop.f32.mrb[76].mxu1 }
0x1854   : > { %v4316_v33 = vpop.f32.mrb[77].mxu1 }
0x1855   : > { %v6800_v48 = vpop.f32.mrb[78].mxu1 }
0x1856   : > { %v8661_v52 = vpack.c.bf16 %v6800_v48, %v6799_v16  ;;  %v4319_v54 = vpop.f32.mrb[79].mxu1 }
0x1857   : > { %v8663_v22 = vpack.c.bf16 %v4319_v54, %v4316_v33 }
0x1859   : > { %6815 = vmatprep.subr.bf16.mxu0 %v8663_v22 }
0x185a   : > { %6816 = vmatpush3.bf16.msra.mxu0 %v8663_v22 }
0x185b   : > { %v6813_v42 = vpop.f32.mrb[80].mxu1  ;;  %6817 = vmatprep.subr.bf16.mxu0 %v8661_v52 }
0x185c   : > { %4451 = vperm.xlu1 %7001, %v6813_v42   ;;  %v4424_v21 = vpop.f32.mrb[81].mxu1 }
0x185d   : > { %4441 = vperm.xlu0 %7000, %v4424_v21   ;;  %v6814_v34 = vpop.f32.mrb[82].mxu1 }
0x185e   : > { %v4427_v23 = vpop.f32.mrb[83].mxu1  ;;  %6818 = vmatpush3.bf16.msra.mxu0 %v8661_v52 }
0x185f   : > { %6831 = vmatprep.subr.bf16.mxu0 %v7044_v10 }
0x1860   : > { %4446 = vperm.xlu1 %7001, %v4427_v23  }
0x1861   : > { %7003 = vset.pattern.permute.xlu0 %v7633_v58 }
0x1862   : > { %v4372_v31 = vpop.f32.mrb[72].mxu0 }
0x1863   : > { %v6807_v40 = vpop.f32.mrb[73].mxu0  ;;  %v4462_v0 = vrot.slane %v4372_v31, %v7946_v9 }
0x1864   : > { %4456 = vperm.xlu1 %7001, %v6814_v34   ;;  %v4375_v32 = vpop.f32.mrb[74].mxu0 }
0x1865   : > { %v6808_v55 = vpop.f32.mrb[75].mxu0 }
0x1868   : > { %7002 = vset.pattern.permute.xlu1 %v7633_v58 }
0x18db   : > { %v4452_v45 = vpop.permute.xlu1 %4451 }
0x18dc   : > { %v4465_v60 = vadd.f32 %v4462_v0, %v4452_v45  ;;  %v4442_v35 = vpop.permute.xlu0 %4441 }
0x18dd   : > { %v4463_v62 = vadd.f32 %v4462_v0, %v4442_v35 }
0x18de   : > { %vm4469_vm1 = vcmp.gt.f32.partialorder %v4465_v60, 0.0  ;;  %v4473_v1 = vmul.f32 0.2, %v4465_v60 }
0x18df   : > { %vm4467_vm7 = vcmp.gt.f32.partialorder %v4463_v62, 0.0  ;;  %v4471_v43 = vmul.f32 0.2, %v4463_v62  ;;  %v4447_v63 = vpop.permute.xlu1 %4446 }
0x18e0   : > { %v4464_v17 = vadd.f32 %v4462_v0, %v4447_v63  ;;  %v4477_v8 = vsel %vm4469_vm1, %v4465_v60, %v4473_v1 }
0x18e1   : > { %v4475_v18 = vsel %vm4467_vm7, %v4463_v62, %v4471_v43  ;;  %v4481_v5 = vadd.f32 %v8584_v6, %v4477_v8 }
0x18e2   : > { %vm4468_vm8 = vcmp.gt.f32.partialorder %v4464_v17, 0.0  ;;  %v4472_v14 = vmul.f32 0.2, %v4464_v17  ;;  %v4479_v13 = vadd.f32 %v8588_v2, %v4475_v18 }
0x18e3   : > { %v4457_v11 = vpop.permute.xlu1 %4456  ;;  %v4489_v15 = vsel %vm879_vm3, %v4481_v5, -inf }
0x18e4   : > { %v4466_v58 = vadd.f32 %v4462_v0, %v4457_v11  ;;  %v4483_v24 = vsel %vm879_vm3, %v4479_v13, -inf  ;;  %v4476_v26 = vsel %vm4468_vm8, %v4464_v17, %v4472_v14 }
0x18e5   : > { %4484 = vmax.xlane.f32.xlu1 %v4483_v24  ;;  %v4480_v29 = vadd.f32 %v8603_v28, %v4476_v26 }
0x18e6   : > { %vm4470_vm9 = vcmp.gt.f32.partialorder %v4466_v58, 0.0  ;;  %v4474_v36 = vmul.f32 0.2, %v4466_v58 }
0x18e7   : > { %v4486_v19 = vsel %vm879_vm3, %v4480_v29, -inf }
0x18e8   : > { %4487 = vmax.xlane.f32.xlu0 %v4486_v19  ;;  %v4478_v46 = vsel %vm4470_vm9, %v4466_v58, %v4474_v36  ;;  %v7045_v19 = vld [vmem:[%s8805_s3 + $0x108] sm:$0xff]  }
0x18e9   : > { %4490 = vmax.xlane.f32.xlu1 %v4489_v15  ;;  %v4482_v7 = vadd.f32 %v8596_v56, %v4478_v46 }
0x18eb   : > { %v4492_v38 = vsel %vm879_vm3, %v4482_v7, -inf }
0x18ed   : > { %4493 = vmax.xlane.f32.xlu1 %v4492_v38 }
0x18fe   : > { %4593 = vperm.xlu0 %7003, %v4427_v23   ;;  %4589 = vperm.xlu1 %7002, %v4424_v21  }
0x1902   : > { %4597 = vperm.xlu1 %7002, %v6813_v42   ;;  %v4607_v42 = vrot.slane %v4372_v31, %v7956_v12 }
0x1906   : > { %4601 = vperm.xlu1 %7002, %v6814_v34  }
0x1972   : > { %v4485_v3 = vpop.xlane.xlu1 %4484 }
0x1973   : > { %v4495_v59 = vsub.f32 %v4479_v13, %v4485_v3 }
0x1975   : > { %v4499_v25 = vmul.f32 1.442695, %v4495_v59  ;;  %v4488_v39 = vpop.xlane.xlu0 %4487  ;;  %v7053_v59 = vld [vmem:[#allocation6 + $0xc] ss:$16 sps:$4 sm:$0xff]  }
0x1976   : > { %v4496_v53 = vsub.f32 %v4480_v29, %v4488_v39  ;;  %v4491_v30 = vpop.xlane.xlu1 %4490  ;;  %v7063_v39 = vld [vmem:[#allocation6 + $0x48] ss:$16 sps:$4 sm:$0xff]  }
0x1977   : > { %v4497_v16 = vsub.f32 %v4481_v5, %v4491_v30  ;;  %7364 = vpow2.f32 %v4499_v25  ;;  %v7057_v25 = vld [vmem:[#allocation6 + $0x28] ss:$16 sps:$4 sm:$0xff]   ;;  %v7071_v30 = vld [vmem:[#allocation6 + $0x6c] ss:$16 sps:$4 sm:$0xff]  }
0x1978   : > { %v4501_v33 = vmul.f32 1.442695, %v4496_v53  ;;  %v7069_v53 = vld [vmem:[#allocation6 + $0x68] ss:$16 sps:$4 sm:$0xff]  }
0x1979   : > { %v4503_v48 = vmul.f32 1.442695, %v4497_v16  ;;  %v7077_v16 = vld [vmem:[#allocation6 + $0x8c] ss:$16 sps:$4 sm:$0xff]  }
0x197a   : > { %7366 = vpow2.f32 %v4501_v33  ;;  %v4494_v54 = vpop.xlane.xlu1 %4493  ;;  %v7075_v33 = vld [vmem:[#allocation6 + $0x88] ss:$16 sps:$4 sm:$0xff]  }
0x197b   : > { %v4498_v21 = vsub.f32 %v4482_v7, %v4494_v54  ;;  %7368 = vpow2.f32 %v4503_v48  ;;  %v7046_v7 = vld [vmem:[%s8805_s3 + $0x110] sm:$0xff]   ;;  %v7083_v48 = vld [vmem:[#allocation6 + $0xac] ss:$16 sps:$4 sm:$0xff]   ;;  %v7081_v54 = vld [vmem:[#allocation6 + $0xa8] ss:$16 sps:$4 sm:$0xff]  }
0x197d   : > { %v4505_v34 = vmul.f32 1.442695, %v4498_v21  ;;  %v4594_v23 = vpop.permute.xlu0 %4593  ;;  %v7089_v21 = vld [vmem:[#allocation6 + $0xcc] ss:$16 sps:$4 sm:$0xff]  }
0x197e   : > { %v4609_v40 = vadd.f32 %v4607_v42, %v4594_v23  ;;  %v4590_v32 = vpop.permute.xlu1 %4589  ;;  %v7093_v23 = vld [vmem:[#allocation6 + $0xe8] ss:$16 sps:$4 sm:$0xff]  }
0x197f   : > { %7370 = vpow2.f32 %v4505_v34  ;;  %v4608_v55 = vadd.f32 %v4607_v42, %v4590_v32  ;;  %v7095_v34 = vld [vmem:[#allocation6 + $0xec] ss:$16 sps:$4 sm:$0xff]  }
0x1980   : > { %vm4613_vm10 = vcmp.gt.f32.partialorder %v4609_v40, 0.0  ;;  %v4617_v0 = vmul.f32 0.2, %v4609_v40 }
0x1981   : > { %vm4612_vm11 = vcmp.gt.f32.partialorder %v4608_v55, 0.0  ;;  %v4616_v45 = vmul.f32 0.2, %v4608_v55  ;;  %v7365_v62 = vpop.eup %7364 }
0x1982   : > { %v4598_v60 = vpop.permute.xlu1 %4597  ;;  %v4621_v35 = vsel %vm4613_vm10, %v4609_v40, %v4617_v0  ;;  %v4507_v3 = vsel %vm879_vm3, %v7365_v62, 0.0 }
0x1983   : > { %v4610_v1 = vadd.f32 %v4607_v42, %v4598_v60  ;;  %v8685_v43 = vadd.f32 %v8603_v28, %v4621_v35  ;;  %v4620_v63 = vsel %vm4612_vm11, %v4608_v55, %v4616_v45 }
0x1984   : > { %v7367_v31 = vpop.eup %7366  ;;  %v8688_v17 = vadd.f32 %v8588_v2, %v4620_v63 }
0x1985   : > { %vm4614_vm12 = vcmp.gt.f32.partialorder %v4610_v1, 0.0  ;;  %v4618_v18 = vmul.f32 0.2, %v4610_v1  ;;  %v4631_v8 = vsel %vm879_vm3, %v8685_v43, -inf  ;;  %v4527_v14 = vpack.c.bf16 %v7367_v31, %v7365_v62  ;;  %v7369_v24 = vpop.eup %7368 }
0x1986   : > { %4632 = vmax.xlane.f32.xlu0 %v4631_v8  ;;  %v4602_v13 = vpop.permute.xlu1 %4601  ;;  %v4628_v11 = vsel %vm879_vm3, %v8688_v17, -inf  ;;  %v4510_v38 = vsel %vm879_vm3, %v7367_v31, 0.0 }
0x1987   : > { %v4611_v58 = vadd.f32 %v4607_v42, %v4602_v13  ;;  %6819 = vmatprep.mubr.msk.bf16.mxu0 %vm879_vm3, %v4527_v14  ;;  %4629 = vmax.xlane.f32.xlu1 %v4628_v11  ;;  %v4622_v28 = vsel %vm4614_vm12, %v4610_v1, %v4618_v18  ;;  %v7087_v42 = vld [vmem:[#allocation6 + $0xc8] ss:$16 sps:$4 sm:$0xff]   ;;  %v7050_v13 = vld [vmem:[#allocation6 + $0x4] ss:$16 sps:$4 sm:$0xff]  }
0x1988   : > { %v8696_v2 = vadd.f32 %v8584_v6, %v4622_v28 }
0x1989   : > { %v7371_v26 = vpop.eup %7370  ;;  %vm4615_vm13 = vcmp.gt.f32.partialorder %v4611_v58, 0.0  ;;  %v4619_v5 = vmul.f32 0.2, %v4611_v58 }
0x198a   : > { %v4634_v29 = vsel %vm879_vm3, %v8696_v2, -inf  ;;  %v4528_v36 = vpack.c.bf16 %v7371_v26, %v7369_v24 }
0x198b   : > { %4635 = vmax.xlane.f32.xlu1 %v4634_v29  ;;  %v4623_v15 = vsel %vm4615_vm13, %v4611_v58, %v4619_v5 }
0x198c   : > { %6820 = vmatmul.mubr.msk.bf16.vlgmr.msra.gmra.mrb[76].mxu0 %vm879_vm3, %v4528_v36  ;;  %v8705_v46 = vadd.f32 %v8596_v56, %v4623_v15  ;;  %v7047_v56 = vld [vmem:[%s8805_s3 + $0x118] sm:$0xff]   ;;  %v7054_v15 = vld [vmem:[#allocation6 + $0x20] ss:$16 sps:$4 sm:$0xff]  }
0x198d   : > { %6832 = vmatpush3.bf16.msra.mxu0 %v7044_v10  ;;  %6839 = vmatprep.mubr.msk.bf16.mxu0 %vm488_vm0, %v8134_v49  ;;  %v4516_v49 = vsel %vm879_vm3, %v7371_v26, 0.0  ;;  %v4513_v10 = vsel %vm879_vm3, %v7369_v24, 0.0  ;;  %v7048_v26 = vld [vmem:[#allocation6] ss:$16 sps:$4 sm:$0xff]  }
0x198e   : > { %6833 = vmatprep.subr.bf16.mxu0 %v7045_v19  ;;  %v4637_v6 = vsel %vm879_vm3, %v8705_v46, -inf }
0x198f   : > { %4638 = vmax.xlane.f32.xlu1 %v4637_v6  ;;  %v7060_v6 = vld [vmem:[#allocation6 + $0x40] ss:$16 sps:$4 sm:$0xff]  }
0x1991   : > { %6834 = vmatpush3.bf16.msra.mxu0 %v7045_v19  ;;  %v7056_v19 = vld [vmem:[#allocation6 + $0x24] ss:$16 sps:$4 sm:$0xff]  }
0x1992   : > { %6835 = vmatprep.subr.bf16.mxu0 %v7046_v7 }
0x1995   : > { %6836 = vmatpush3.bf16.msra.mxu0 %v7046_v7  ;;  %v7068_v7 = vld [vmem:[#allocation6 + $0x64] ss:$16 sps:$4 sm:$0xff]  }
0x1996   : > { %6837 = vmatprep.subr.bf16.mxu0 %v7047_v56 }
0x1999   : > { %6838 = vmatpush3.bf16.msra.mxu0 %v7047_v56  ;;  %v7066_v56 = vld [vmem:[#allocation6 + $0x60] ss:$16 sps:$4 sm:$0xff]  }
0x199a   : > { %5115 = vmatprep.subr.bf16.mxu0 %v7053_v59  ;;  %v7084_v59 = vld [vmem:[#allocation6 + $0xc0] ss:$16 sps:$4 sm:$0xff]  }
0x199c   : > { %6840 = vmatmul.mubr.msk.bf16.vlgmr.msra.gmra.mrb[80].mxu0 %vm488_vm0, %v8140_v47  ;;  %4678 = vrot.lane.b32.xlu0 %v8661_v52, %s7634_s12  ;;  %v7051_v47 = vld [vmem:[#allocation6 + $0x8] ss:$16 sps:$4 sm:$0xff]   ;;  %v7059_v52 = vld [vmem:[#allocation6 + $0x2c] ss:$16 sps:$4 sm:$0xff]  }
0x199d   : > { %5147 = vmatprep.mubr.bf16.mxu0 %v7632_v57  ;;  %5116 = vmatpush1.bf16.msra.mxu0 %v7051_v47  ;;  %v7086_v47 = vld [vmem:[#allocation6 + $0xc4] ss:$16 sps:$4 sm:$0xff]  }
0x199e   : > { %5117 = vmatprep.subr.bf16.mxu0 %v7059_v52  ;;  %v7092_v52 = vld [vmem:[#allocation6 + $0xe4] ss:$16 sps:$4 sm:$0xff]  }
0x19a0   : > { %4676 = vrot.lane.b32.xlu1 %v8663_v22, %s7634_s12  ;;  %v7065_v22 = vld [vmem:[#allocation6 + $0x4c] ss:$16 sps:$4 sm:$0xff]  }
0x19a1   : > { %5118 = vmatpush1.bf16.msra.mxu0 %v7057_v25  ;;  %v7090_v25 = vld [vmem:[#allocation6 + $0xe0] ss:$16 sps:$4 sm:$0xff]  }
0x19a2   : > { %5119 = vmatprep.subr.bf16.mxu0 %v7065_v22 }
0x19a5   : > { %5120 = vmatpush1.bf16.msra.mxu0 %v7063_v39 }
0x19a6   : > { %5121 = vmatprep.subr.bf16.mxu0 %v7071_v30 }
0x19a9   : > { %5122 = vmatpush1.bf16.msra.mxu0 %v7069_v53 }
0x19aa   : > { %5123 = vmatprep.subr.bf16.mxu0 %v7077_v16  ;;  %v4767_v16 = vld [vmem:[#allocation10 + $0x2] ss:$0 sm:$0xff] }
0x19ad   : > { %5124 = vmatpush1.bf16.msra.mxu0 %v7075_v33 }
0x19ae   : > { %5125 = vmatprep.subr.bf16.mxu0 %v7083_v48 }
0x19b1   : > { %5126 = vmatpush1.bf16.msra.mxu0 %v7081_v54 }
0x19b2   : > { %5127 = vmatprep.subr.bf16.mxu0 %v7089_v21 }
0x19b5   : > { %5128 = vmatpush1.bf16.msra.mxu0 %v7087_v42 }
0x19b6   : > { %5129 = vmatprep.subr.bf16.mxu0 %v7095_v34 }
0x19b9   : > { %5130 = vmatpush1.bf16.msra.mxu0 %v7093_v23 }
0x19bb   : > { %4517 = vadd.xlane.f32.xlu0 %v4516_v49  ;;  %v7074_v49 = vld [vmem:[#allocation6 + $0x84] ss:$16 sps:$4 sm:$0xff]  }
0x19bf   : > { %4511 = vadd.xlane.f32.xlu0 %v4510_v38  ;;  %v7072_v38 = vld [vmem:[#allocation6 + $0x80] ss:$16 sps:$4 sm:$0xff]  }
0x19c4   : > { %4514 = vadd.xlane.f32.xlu1 %v4513_v10  ;;  %v7080_v10 = vld [vmem:[#allocation6 + $0xa4] ss:$16 sps:$4 sm:$0xff]  }
0x19c8   : > { %4508 = vadd.xlane.f32.xlu1 %v4507_v3  ;;  %v7078_v3 = vld [vmem:[#allocation6 + $0xa0] ss:$16 sps:$4 sm:$0xff]  }
0x1a13   : > { %v4633_v40 = vpop.xlane.xlu0 %4632 }
0x1a14   : > { %v4641_v32 = vsub.f32 %v8685_v43, %v4633_v40  ;;  %v4630_v55 = vpop.xlane.xlu1 %4629 }
0x1a15   : > { %v4640_v0 = vsub.f32 %v8688_v17, %v4630_v55 }
0x1a16   : > { %v4646_v45 = vmul.f32 1.442695, %v4641_v32 }
0x1a17   : > { %v4644_v60 = vmul.f32 1.442695, %v4640_v0  ;;  %v4679_v14 = vpop.permute.xlu0 %4678 }
0x1a18   : > { %7372 = vpow2.f32 %v4646_v45  ;;  %v4636_v35 = vpop.xlane.xlu1 %4635 }
0x1a19   : > { %7374 = vpow2.f32 %v4644_v60  ;;  %v4642_v62 = vsub.f32 %v8696_v2, %v4636_v35 }
0x1a1b   : > { %v4648_v1 = vmul.f32 1.442695, %v4642_v62  ;;  %v7096_v62 = vld [vmem:[#allocation7 + $0x40] sm:$0xff]  }
0x1a1c   : > { %v4639_v63 = vpop.xlane.xlu1 %4638 }
0x1a1d   : > { %v4643_v31 = vsub.f32 %v8705_v46, %v4639_v63  ;;  %7376 = vpow2.f32 %v4648_v1  ;;  %v7062_v46 = vld [vmem:[#allocation6 + $0x44] ss:$16 sps:$4 sm:$0xff]  }
0x1a1e   : > { %v7097_v1 = vld [vmem:[#allocation7] sm:$0xff]  }
0x1a1f   : > { %v4650_v18 = vmul.f32 1.442695, %v4643_v31  ;;  %v7098_v63 = vld [vmem:[#allocation7 + $0xc0] sm:$0xff]  }
0x1a20   : > { %v4677_v8 = vpop.permute.xlu1 %4676  ;;  %6433 = vmatprep.subr.bf16.mxu0 %v7098_v63  ;;  %v7099_v31 = vld [vmem:[#allocation7 + $0x80] sm:$0xff]  }
0x1a21   : > { %7378 = vpow2.f32 %v4650_v18  ;;  %6823 = vmatprep.subr.bf16.mxu1 %v4677_v8  ;;  %v7100_v18 = vld [vmem:[#allocation7 + $0x48] sm:$0xff]  }
0x1a22   : > { %v7373_v43 = vpop.eup %7372  ;;  %6824 = vmatpush3.bf16.msra.mxu1 %v4677_v8  ;;  %v7101_v8 = vld [vmem:[#allocation7 + $0x8] sm:$0xff]  }
0x1a23   : > { %v7375_v17 = vpop.eup %7374  ;;  %6825 = vmatprep.subr.bf16.mxu1 %v4679_v14  ;;  %v4655_v28 = vsel %vm879_vm3, %v7373_v43, 0.0 }
0x1a24   : > { %v4652_v11 = vsel %vm879_vm3, %v7375_v17, 0.0  ;;  %v4672_v58 = vpack.c.bf16 %v7373_v43, %v7375_v17  ;;  %v7102_v43 = vld [vmem:[#allocation7 + $0xc8] sm:$0xff]   ;;  %v7104_v17 = vld [vmem:[#allocation7 + $0x50] sm:$0xff]  }
0x1a25   : > { %4653 = vadd.xlane.f32.xlu1 %v4652_v11  ;;  %v7107_v11 = vld [vmem:[#allocation7 + $0x90] sm:$0xff]  }
0x1a26   : > { %6826 = vmatpush3.bf16.msra.mxu1 %v4679_v14  ;;  %6827 = vmatprep.mubr.msk.bf16.mxu1 %vm879_vm3, %v4672_v58  ;;  %v7103_v14 = vld [vmem:[#allocation7 + $0x88] sm:$0xff]   ;;  %v7108_v58 = vld [vmem:[#allocation7 + $0x58] sm:$0xff]  }
0x1a27   : > { %5062 = vmatprep.subr.bf16.mxu1 %v7050_v13  ;;  %v7377_v24 = vpop.eup %7376  ;;  %v7106_v13 = vld [vmem:[#allocation7 + $0xd0] sm:$0xff]  }
0x1a28   : > { %v4658_v5 = vsel %vm879_vm3, %v7377_v24, 0.0 }
0x1a29   : > { %4656 = vadd.xlane.f32.xlu1 %v4655_v28  ;;  %v7109_v28 = vld [vmem:[#allocation7 + $0x18] sm:$0xff]  }
0x1a2b   : > { %v7379_v2 = vpop.eup %7378 }
0x1a2c   : > { %v4661_v29 = vsel %vm879_vm3, %v7379_v2, 0.0  ;;  %v4673_v36 = vpack.c.bf16 %v7379_v2, %v7377_v24  ;;  %v7110_v24 = vld [vmem:[#allocation7 + $0xd8] sm:$0xff]  }
0x1a2d   : > { %4659 = vadd.xlane.f32.xlu1 %v4658_v5  ;;  %4662 = vadd.xlane.f32.xlu0 %v4661_v29  ;;  %v7111_v2 = vld [vmem:[#allocation7 + $0x98] sm:$0xff]   ;;  %v7113_v5 = vld [vmem:[#allocation7 + $0x20] sm:$0xff]  }
0x1a2e   : > { %6828 = vmatmul.mubr.msk.bf16.vlgmr.msra.gmra.mrb[84].mxu1 %vm879_vm3, %v4673_v36  ;;  %v7114_v29 = vld [vmem:[#allocation7 + $0xe0] sm:$0xff]  }
0x1a2f   : > { %5063 = vmatpush1.bf16.msra.mxu1 %v7048_v26  ;;  %5094 = vmatprep.mubr.bf16.mxu1 %v7632_v57  ;;  %v7112_v26 = vld [vmem:[#allocation7 + $0x60] sm:$0xff]  }
0x1a30   : > { %5064 = vmatprep.subr.bf16.mxu1 %v7056_v19  ;;  %v7115_v19 = vld [vmem:[#allocation7 + $0xa0] sm:$0xff]  }
0x1a33   : > { %5065 = vmatpush1.bf16.msra.mxu1 %v7054_v15  ;;  %v7116_v15 = vld [vmem:[#allocation7 + $0x68] sm:$0xff]  }
0x1a34   : > { %5066 = vmatprep.subr.bf16.mxu1 %v7062_v46  ;;  %v7117_v46 = vld [vmem:[#allocation7 + $0x28] sm:$0xff]  }
0x1a37   : > { %5067 = vmatpush1.bf16.msra.mxu1 %v7060_v6  ;;  %v7118_v6 = vld [vmem:[#allocation7 + $0xe8] sm:$0xff]  }
0x1a38   : > { %5068 = vmatprep.subr.bf16.mxu1 %v7068_v7  ;;  %v7119_v7 = vld [vmem:[#allocation7 + $0xa8] sm:$0xff]  }
0x1a3b   : > { %5069 = vmatpush1.bf16.msra.mxu1 %v7066_v56 }
0x1a3c   : > { %5070 = vmatprep.subr.bf16.mxu1 %v7074_v49  ;;  %v7120_v49 = vld [vmem:[#allocation7 + $0x70] sm:$0xff]  }
0x1a3f   : > { %5071 = vmatpush1.bf16.msra.mxu1 %v7072_v38  ;;  %v7121_v38 = vld [vmem:[#allocation7 + $0x30] sm:$0xff]  }
0x1a40   : > { %5072 = vmatprep.subr.bf16.mxu1 %v7080_v10  ;;  %v7122_v10 = vld [vmem:[#allocation7 + $0xf0] sm:$0xff]  }
0x1a43   : > { %5073 = vmatpush1.bf16.msra.mxu1 %v7078_v3  ;;  %v7123_v3 = vld [vmem:[#allocation7 + $0xb0] sm:$0xff]  }
0x1a44   : > { %5074 = vmatprep.subr.bf16.mxu1 %v7086_v47 }
0x1a47   : > { %5075 = vmatpush1.bf16.msra.mxu1 %v7084_v59  ;;  %v7124_v59 = vld [vmem:[#allocation7 + $0x78] sm:$0xff]  }
0x1a48   : > { %5076 = vmatprep.subr.bf16.mxu1 %v7092_v52  ;;  %v7125_v52 = vld [vmem:[#allocation7 + $0x38] sm:$0xff]  }
0x1a4b   : > { %5077 = vmatpush1.bf16.msra.mxu1 %v7090_v25  ;;  %v7126_v25 = vld [vmem:[#allocation7 + $0xf8] sm:$0xff]  }
0x1a4c   : > { %6411 = vmatprep.subr.bf16.mxu1 %v7096_v62 }
0x1a51   : > { %v4515_v36 = vpop.xlane.xlu1 %4514 }
0x1a55   : > { %v4509_v56 = vpop.xlane.xlu1 %4508 }
0x1a5f   : > { %v8739_v22 = vpop.f32.mrb[76].mxu0 }
0x1a60   : > { %v8741_v39 = vpop.f32.mrb[77].mxu0 }
0x1a61   : > { %v8743_v53 = vpop.f32.mrb[78].mxu0 }
0x1a62   : > { %v8745_v30 = vpop.f32.mrb[79].mxu0 }
0x1a6f   : > { %v6841_v33 = vpop.f32.mrb[80].mxu0 }
0x1a70   : > { %v4835_v48 = vadd.f32 %v6841_v33, %v4767_v16  ;;  %v4826_v54 = vpop.f32.mrb[81].mxu0  ;;  %v4518_v33 = vpop.xlane.xlu0 %4517 }
0x1a71   : > { %v4827_v21 = vadd.f32 %v4826_v54, %v4767_v16  ;;  %v6842_v42 = vpop.f32.mrb[82].mxu0  ;;  %7380 = vrcp.f32 %v4518_v33 }
0x1a72   : > { %v4838_v34 = vadd.f32 %v6842_v42, %v4767_v16  ;;  %v4829_v23 = vpop.f32.mrb[83].mxu0  ;;  %v4843_v32 = vmax.f32 %v4835_v48, 0.0  ;;  %v8752_v48 = vld [vmem:[%s8805_s3 + $0x120] sm:$0xff]  }
0x1a73   : > { %v4830_v40 = vadd.f32 %v4829_v23, %v4767_v16  ;;  %v4841_v0 = vmax.f32 %v4827_v21, 0.0  ;;  %v7127_v16 = vld [vmem:[#allocation7 + $0xb8] sm:$0xff]  }
0x1a74   : > { %v4844_v55 = vmax.f32 %v4838_v34, 0.0  ;;  %v4512_v21 = vpop.xlane.xlu0 %4511 }
0x1a75   : > { %v4842_v45 = vmax.f32 %v4830_v40, 0.0  ;;  %7382 = vrcp.f32 %v4512_v21 }
0x1a76   : > { %v4846_v60 = vpack.c.bf16 %v4844_v55, %v4843_v32  ;;  %7384 = vrcp.f32 %v4515_v36  ;;  %v8755_v55 = vld [vmem:[#allocation9] sm:$0xff]  }
0x1a77   : > { %v4845_v35 = vpack.c.bf16 %v4842_v45, %v4841_v0  ;;  %7386 = vrcp.f32 %v4509_v56 }
0x1a79   : > { %5095 = vmatmul.mubr.bf16.vlgmr.msra.gmra.mrb[88].mxu1 %v4845_v35  ;;  %5148 = vmatmul.mubr.bf16.vlgmr.msra.gmra.mrb[84].mxu0 %v4845_v35 }
0x1a7a   : > { %5104 = vmatprep.mubr.bf16.mxu1 %v7632_v57  ;;  %5157 = vmatprep.mubr.bf16.mxu0 %v7632_v57  ;;  %v7105_v57 = vld [vmem:[#allocation7 + $0x10] sm:$0xff]  }
0x1a7b   : > { %6412 = vmatpush3.bf16.msra.mxu1 %v7097_v1  ;;  %6434 = vmatpush3.bf16.msra.mxu0 %v7099_v31  ;;  %v7381_v23 = vpop.eup %7380 }
0x1a7c   : > { %6413 = vmatprep.subr.bf16.mxu1 %v7100_v18  ;;  %6435 = vmatprep.subr.bf16.mxu0 %v7102_v43 }
0x1a7f   : > { %6414 = vmatpush3.bf16.msra.mxu1 %v7101_v8  ;;  %6436 = vmatpush3.bf16.msra.mxu0 %v7103_v14  ;;  %v7383_v40 = vpop.eup %7382  ;;  %v4526_v14 = vmul.f32 0.5, %v7381_v23 }
0x1a80   : > { %6415 = vmatprep.subr.bf16.mxu1 %v7104_v17  ;;  %6437 = vmatprep.subr.bf16.mxu0 %v7106_v13  ;;  %v7385_v32 = vpop.eup %7384 }
0x1a81   : > { %5105 = vmatmul.mubr.bf16.gmra.mrb[92].mxu1 %v4846_v60  ;;  %5158 = vmatmul.mubr.bf16.gmra.mrb[88].mxu0 %v4846_v60  ;;  %v7387_v0 = vpop.eup %7386  ;;  %v4525_v35 = vmul.f32 0.5, %v7385_v32 }
0x1a82   : > { %v4523_v1 = vmul.f32 0.5, %v7387_v0 }
0x1a83   : > { %6416 = vmatpush3.bf16.msra.mxu1 %v7105_v57  ;;  %6438 = vmatpush3.bf16.msra.mxu0 %v7107_v11  ;;  %v4586_v43 = vmul.f32 %v8739_v22, %v4525_v35 }
0x1a84   : > { %6417 = vmatprep.subr.bf16.mxu1 %v7108_v58  ;;  %6439 = vmatprep.subr.bf16.mxu0 %v7110_v24  ;;  %v4584_v11 = vmul.f32 %v8741_v39, %v4523_v1  ;;  %v4524_v58 = vmul.f32 0.5, %v7383_v40 }
0x1a87   : > { %6418 = vmatpush3.bf16.msra.mxu1 %v7109_v28  ;;  %6440 = vmatpush3.bf16.msra.mxu0 %v7111_v2  ;;  %v4745_v28 = vld [vmem:[#allocation10 + $0x27] ss:$0 sm:$0xff] }
0x1a88   : > { %6419 = vmatprep.subr.bf16.mxu1 %v7112_v26  ;;  %6441 = vmatprep.subr.bf16.mxu0 %v7114_v29 }
0x1a8b   : > { %6420 = vmatpush3.bf16.msra.mxu1 %v7113_v5  ;;  %6442 = vmatpush3.bf16.msra.mxu0 %v7115_v19  ;;  %v4587_v5 = vmul.f32 %v8743_v53, %v4526_v14 }
0x1a8c   : > { %6421 = vmatprep.subr.bf16.mxu1 %v7116_v15  ;;  %6443 = vmatprep.subr.bf16.mxu0 %v7118_v6  ;;  %v4585_v15 = vmul.f32 %v8745_v30, %v4524_v58 }
0x1a8f   : > { %6422 = vmatpush3.bf16.msra.mxu1 %v7117_v46  ;;  %6444 = vmatpush3.bf16.msra.mxu0 %v7119_v7 }
0x1a90   : > { %6423 = vmatprep.subr.bf16.mxu1 %v7120_v49  ;;  %6445 = vmatprep.subr.bf16.mxu0 %v7122_v10 }
0x1a93   : > { %6424 = vmatpush3.bf16.msra.mxu1 %v7121_v38  ;;  %6446 = vmatpush3.bf16.msra.mxu0 %v7123_v3 }
0x1a94   : > { %6425 = vmatprep.subr.bf16.mxu1 %v7124_v59  ;;  %6447 = vmatprep.subr.bf16.mxu0 %v7126_v25 }
0x1a97   : > { %6426 = vmatpush3.bf16.msra.mxu1 %v7125_v52  ;;  %6448 = vmatpush3.bf16.msra.mxu0 %v7127_v16 }
0x1a98   : > { %6843 = vmatprep.subr.bf16.mxu1 %v8752_v48  ;;  %6855 = vmatprep.subr.bf16.mxu0 %v8755_v55 }
0x1ab2   : > { %v4654_v47 = vpop.xlane.xlu1 %4653 }
0x1ab6   : > { %v4657_v54 = vpop.xlane.xlu1 %4656 }
0x1aba   : > { %v4660_v42 = vpop.xlane.xlu1 %4659  ;;  %v4663_v34 = vpop.xlane.xlu0 %4662 }
0x1abb   : > { %7388 = vrcp.f32 %v4660_v42 }
0x1abc   : > { %7390 = vrcp.f32 %v4654_v47 }
0x1abd   : > { %7392 = vrcp.f32 %v4663_v34 }
0x1abe   : > { %7394 = vrcp.f32 %v4657_v54 }
0x1ac5   : > { %v7389_v45 = vpop.eup %7388 }
0x1ac6   : > { %v7391_v60 = vpop.eup %7390  ;;  %v4670_v31 = vmul.f32 0.5, %v7389_v45 }
0x1ac7   : > { %v7393_v62 = vpop.eup %7392  ;;  %v4668_v8 = vmul.f32 0.5, %v7391_v60 }
0x1ac8   : > { %v7395_v63 = vpop.eup %7394  ;;  %v4671_v13 = vmul.f32 0.5, %v7393_v62 }
0x1ac9   : > { %v4669_v26 = vmul.f32 0.5, %v7395_v63 }
0x1b01   : > { %v6829_v18 = vpop.f32.mrb[84].mxu1 }
0x1b02   : > { %v4739_v17 = vmul.f32 %v6829_v18, %v4670_v31  ;;  %v4722_v57 = vpop.f32.mrb[85].mxu1 }
0x1b03   : > { %v4737_v24 = vmul.f32 %v4722_v57, %v4668_v8  ;;  %v6830_v2 = vpop.f32.mrb[86].mxu1 }
0x1b04   : > { %v4743_v29 = vadd.f32 %v4739_v17, %v4586_v43  ;;  %v4740_v36 = vmul.f32 %v6830_v2, %v4671_v13  ;;  %v4725_v19 = vpop.f32.mrb[87].mxu1 }
0x1b05   : > { %v4741_v46 = vadd.f32 %v4737_v24, %v4584_v11  ;;  %v4738_v22 = vmul.f32 %v4725_v19, %v4669_v26 }
0x1b06   : > { %v4748_v6 = vadd.f32 %v4745_v28, %v4743_v29  ;;  %v4744_v7 = vadd.f32 %v4740_v36, %v4587_v5 }
0x1b07   : > { %v4746_v56 = vadd.f32 %v4745_v28, %v4741_v46  ;;  %v4742_v49 = vadd.f32 %v4738_v22, %v4585_v15 }
0x1b08   : > { %v4752_v39 = vadd.f32 %v4748_v6, %v3726_v27  ;;  %v4749_v38 = vadd.f32 %v4745_v28, %v4744_v7  ;;  %v4880_v27 = vld [vmem:[#allocation10 + $0x3] ss:$8 sm:$0xf] }
0x1b09   : > { %v4750_v10 = vadd.f32 %v4746_v56, %v3724_v4  ;;  %v4747_v3 = vadd.f32 %v4745_v28, %v4742_v49  ;;  %v4885_v4 = vrot.slane %v4880_v27, %v7946_v9  ;;  %v4893_v41 = vrot.slane %v4880_v27, %v4892_v44 }
0x1b0a   : > { %v4753_v53 = vadd.f32 %v4749_v38, %v3727_v20  ;;  %v4756_v47 = vmax.f32 %v4752_v39, 0.0  ;;  %v4889_v51 = vrot.slane %v4880_v27, %v7956_v12 }
0x1b0b   : > { %v4751_v30 = vadd.f32 %v4747_v3, %v3725_v61  ;;  %v4754_v52 = vmax.f32 %v4750_v10, 0.0  ;;  %v4897_v61 = vrot.slane %v4880_v27, %v4896_v50 }
0x1b0c   : > { %v4757_v59 = vmax.f32 %v4753_v53, 0.0 }
0x1b0d   : > { %v4755_v25 = vmax.f32 %v4751_v30, 0.0 }
0x1b0e   : > { %v8770_v16 = vpack.c.bf16 %v4757_v59, %v4756_v47 }
0x1b0f   : > { %v8772_v33 = vpack.c.bf16 %v4755_v25, %v4754_v52 }
0x1b4c   : > { %v5096_v20 = vpop.f32.mrb[88].mxu1  ;;  %v5149_v54 = vpop.f32.mrb[84].mxu0 }
0x1b4d   : > { %v5098_v21 = vpop.f32.mrb[89].mxu1  ;;  %v5151_v42 = vpop.f32.mrb[85].mxu0  ;;  %v5097_v40 = vadd.f32 %v5096_v20, %v4885_v4  ;;  %v5150_v32 = vadd.f32 %v5149_v54, %v4893_v41 }
0x1b4e   : > { %v5100_v34 = vpop.f32.mrb[90].mxu1  ;;  %v5153_v23 = vpop.f32.mrb[86].mxu0  ;;  %v5099_v62 = vadd.f32 %v5098_v21, %v4889_v51  ;;  %v5152_v37 = vadd.f32 %v5151_v42, %v4897_v61 }
0x1b4f   : > { %v5101_v0 = vadd.f32 %v5100_v34, %v4885_v4  ;;  %v5154_v45 = vadd.f32 %v5153_v23, %v4893_v41  ;;  %v5102_v60 = vpop.f32.mrb[91].mxu1  ;;  %v5155_v35 = vpop.f32.mrb[87].mxu0 }
0x1b50   : > { %v5103_v1 = vadd.f32 %v5102_v60, %v4889_v51  ;;  %v5156_v63 = vadd.f32 %v5155_v35, %v4897_v61 }
0x1b51   : > { %v5168_v31 = vmax.f32 %v5097_v40, %v5101_v0  ;;  %v5186_v18 = vmax.f32 %v5150_v32, %v5154_v45 }
0x1b52   : > { %v5177_v8 = vmax.f32 %v5099_v62, %v5103_v1  ;;  %v5195_v43 = vmax.f32 %v5152_v37, %v5156_v63  ;;  %v7129_v37 = vld [vmem:[%s8805_s3 + $0x128] sm:$0xff]   ;;  %v7130_v1 = vld [vmem:[%s8805_s3 + $0x130] sm:$0xff]   ;;  %v7131_v63 = vld [vmem:[%s8805_s3 + $0x138] sm:$0xff]  }
0x1b54   : > { %v5106_v12 = vpop.f32.mrb[92].mxu1  ;;  %v5159_v14 = vpop.f32.mrb[88].mxu0 }
0x1b55   : > { %v5107_v17 = vadd.f32 %v5106_v12, %v4885_v4  ;;  %v5160_v57 = vadd.f32 %v5159_v14, %v4893_v41  ;;  %v5108_v13 = vpop.f32.mrb[93].mxu1  ;;  %v5161_v11 = vpop.f32.mrb[89].mxu0 }
0x1b56   : > { %v5109_v58 = vadd.f32 %v5108_v13, %v4889_v51  ;;  %v5162_v28 = vadd.f32 %v5161_v11, %v4897_v61  ;;  %v5110_v24 = vpop.f32.mrb[94].mxu1  ;;  %v5163_v2 = vpop.f32.mrb[90].mxu0 }
0x1b57   : > { %v5169_v26 = vmax.f32 %v5168_v31, %v5107_v17  ;;  %v5187_v5 = vmax.f32 %v5186_v18, %v5160_v57  ;;  %v5111_v29 = vadd.f32 %v5110_v24, %v4885_v4  ;;  %v5164_v36 = vadd.f32 %v5163_v2, %v4893_v41  ;;  %v5112_v19 = vpop.f32.mrb[95].mxu1  ;;  %v5165_v15 = vpop.f32.mrb[91].mxu0  ;;  %v7135_v31 = vld [vmem:[#allocation9 + $0x18] sm:$0xff]   ;;  %v7137_v18 = vld [vmem:[#allocation9 + $0x28] sm:$0xff]  }
0x1b58   : > { %v5178_v46 = vmax.f32 %v5177_v8, %v5109_v58  ;;  %v5196_v22 = vmax.f32 %v5195_v43, %v5162_v28  ;;  %v5113_v6 = vadd.f32 %v5112_v19, %v4889_v51  ;;  %v5166_v7 = vadd.f32 %v5165_v15, %v4897_v61  ;;  %v7138_v8 = vld [vmem:[#allocation9 + $0x30] sm:$0xff]   ;;  %v7139_v43 = vld [vmem:[#allocation9 + $0x38] sm:$0xff]  }
0x1b59   : > { %v5170_v56 = vmax.f32 %v5169_v26, %v5111_v29  ;;  %v5188_v49 = vmax.f32 %v5187_v5, %v5164_v36  ;;  %v5638_v29 = vld [vmem:[#allocation10 + $0x4] ss:$0 sm:$0xff] }
0x1b5a   : > { %v5179_v39 = vmax.f32 %v5178_v46, %v5113_v6  ;;  %v5197_v38 = vmax.f32 %v5196_v22, %v5166_v7 }
0x1b5b   : > { %v5171_v10 = vrot.slane %v5170_v56, 4  ;;  %v5189_v3 = vrot.slane %v5188_v49, 4 }
0x1b5c   : > { %v5180_v53 = vrot.slane %v5179_v39, 4  ;;  %v5198_v30 = vrot.slane %v5197_v38, 4 }
0x1b5d   : > { %v5172_v47 = vmax.f32 %v5170_v56, %v5171_v10  ;;  %v5190_v59 = vmax.f32 %v5188_v49, %v5189_v3 }
0x1b5e   : > { %v5181_v52 = vmax.f32 %v5179_v39, %v5180_v53  ;;  %v5199_v25 = vmax.f32 %v5197_v38, %v5198_v30 }
0x1b5f   : > { %v5173_v44 = vrot.slane %v5172_v47, 2  ;;  %v5191_v27 = vrot.slane %v5190_v59, 2 }
0x1b60   : > { %v5182_v50 = vrot.slane %v5181_v52, 2  ;;  %v5200_v4 = vrot.slane %v5199_v25, 2 }
0x1b61   : > { %v5174_v41 = vmax.f32 %v5172_v47, %v5173_v44  ;;  %v5192_v20 = vmax.f32 %v5190_v59, %v5191_v27 }
0x1b62   : > { %v5183_v54 = vmax.f32 %v5181_v52, %v5182_v50  ;;  %v5201_v51 = vmax.f32 %v5199_v25, %v5200_v4 }
0x1b63   : > { %v5175_v61 = vrot.slane %v5174_v41, 1  ;;  %v5193_v21 = vrot.slane %v5192_v20, 1 }
0x1b64   : > { %v5184_v42 = vrot.slane %v5183_v54, 1  ;;  %v5202_v34 = vrot.slane %v5201_v51, 1 }
0x1b65   : > { %v5176_v23 = vmax.f32 %v5174_v41, %v5175_v61  ;;  %v5194_v40 = vmax.f32 %v5192_v20, %v5193_v21 }
0x1b66   : > { %v5185_v32 = vmax.f32 %v5183_v54, %v5184_v42  ;;  %v5203_v0 = vmax.f32 %v5201_v51, %v5202_v34 }
0x1b67   : > { %v5204_v35 = vpack.c.bf16 %v5176_v23, %v5176_v23  ;;  %v5206_v62 = vpack.c.bf16 %v5194_v40, %v5194_v40 }
0x1b68   : > { %v5205_v45 = vpack.c.bf16 %v5185_v32, %v5185_v32  ;;  %v5207_v60 = vpack.c.bf16 %v5203_v0, %v5203_v0 }
0x1b6a   : > { %5496 = vmatprep.mubr.bf16.mxu1 %v5205_v45  ;;  %5536 = vmatprep.mubr.bf16.mxu0 %v5207_v60 }
0x1b6b   : > { %5497 = vmatmul.mubr.bf16.vlgmr.msra.gmra.mrb[96].mxu1 %v5204_v35  ;;  %5537 = vmatmul.mubr.bf16.vlgmr.msra.gmra.mrb[92].mxu0 %v5206_v62 }
0x1b6c   : > { %6844 = vmatpush3.bf16.msra.mxu1 %v8752_v48  ;;  %6851 = vmatprep.mubr.msk.bf16.mxu1 %vm488_vm0, %v8772_v33  ;;  %v7133_v48 = vld [vmem:[#allocation9 + $0x8] sm:$0xff]   ;;  %v7134_v33 = vld [vmem:[#allocation9 + $0x10] sm:$0xff]  }
0x1b6d   : > { %6845 = vmatprep.subr.bf16.mxu1 %v7129_v37  ;;  %6856 = vmatpush3.bf16.msra.mxu0 %v8755_v55  ;;  %v7136_v55 = vld [vmem:[#allocation9 + $0x20] sm:$0xff]  }
0x1b6e   : > { %6857 = vmatprep.subr.bf16.mxu0 %v7133_v48 }
0x1b70   : > { %6846 = vmatpush3.bf16.msra.mxu1 %v7129_v37 }
0x1b71   : > { %6847 = vmatprep.subr.bf16.mxu1 %v7130_v1  ;;  %6858 = vmatpush3.bf16.msra.mxu0 %v7133_v48 }
0x1b72   : > { %6859 = vmatprep.subr.bf16.mxu0 %v7134_v33 }
0x1b74   : > { %6848 = vmatpush3.bf16.msra.mxu1 %v7130_v1 }
0x1b75   : > { %6849 = vmatprep.subr.bf16.mxu1 %v7131_v63  ;;  %6860 = vmatpush3.bf16.msra.mxu0 %v7134_v33 }
0x1b76   : > { %6861 = vmatprep.subr.bf16.mxu0 %v7135_v31 }
0x1b78   : > { %6850 = vmatpush3.bf16.msra.mxu1 %v7131_v63 }
0x1b79   : > { %6862 = vmatpush3.bf16.msra.mxu0 %v7135_v31 }
0x1b7a   : > { %6863 = vmatprep.subr.bf16.mxu0 %v7136_v55 }
0x1b7b   : > { %6852 = vmatmul.mubr.msk.bf16.vlgmr.msra.gmra.mrb[100].mxu1 %vm488_vm0, %v8770_v16 }
0x1b7d   : > { %6864 = vmatpush3.bf16.msra.mxu0 %v7136_v55 }
0x1b7e   : > { %6865 = vmatprep.subr.bf16.mxu0 %v7137_v18 }
0x1b81   : > { %6866 = vmatpush3.bf16.msra.mxu0 %v7137_v18 }
0x1b82   : > { %6867 = vmatprep.subr.bf16.mxu0 %v7138_v8 }
0x1b85   : > { %6868 = vmatpush3.bf16.msra.mxu0 %v7138_v8 }
0x1b86   : > { %6869 = vmatprep.subr.bf16.mxu0 %v7139_v43 }
0x1b89   : > { %6870 = vmatpush3.bf16.msra.mxu0 %v7139_v43 }
0x1c3e   : > { %v6427_v16 = vpop.f32.mrb[96].mxu1  ;;  %v6449_v12 = vpop.f32.mrb[92].mxu0 }
0x1c3f   : > { %v6428_v14 = vpop.f32.mrb[97].mxu1  ;;  %v6450_v17 = vpop.f32.mrb[93].mxu0 }
0x1c40   : > { %v6429_v57 = vadd.f32 %v6428_v14, %v6427_v16  ;;  %v6451_v13 = vadd.f32 %v6450_v17, %v6449_v12  ;;  %v6430_v11 = vpop.f32.mrb[98].mxu1  ;;  %v6452_v58 = vpop.f32.mrb[94].mxu0 }
0x1c41   : > { %v6431_v28 = vpop.f32.mrb[99].mxu1  ;;  %v6453_v24 = vpop.f32.mrb[95].mxu0 }
0x1c42   : > { %v5539_v2 = vadd.f32 %v6451_v13, %v6429_v57 }
0x1c44   : > { %v5558_v26 = vrot.slane %v5539_v2, %v7946_v9  ;;  %v5665_v9 = vld [vmem:[#allocation10 + $0x5] ss:$0 sm:$0xff] }
0x1c4e   : > { %v6853_v5 = vpop.f32.mrb[100].mxu1 }
0x1c4f   : > { %v5632_v36 = vadd.f32 %v6853_v5, %v5558_v26  ;;  %v5623_v19 = vpop.f32.mrb[101].mxu1 }
0x1c50   : > { %v5624_v15 = vadd.f32 %v5623_v19, %v5558_v26  ;;  %v6854_v46 = vpop.f32.mrb[102].mxu1 }
0x1c51   : > { %v5641_v22 = vadd.f32 %v5638_v29, %v5632_v36  ;;  %v5635_v6 = vadd.f32 %v6854_v46, %v5558_v26  ;;  %v5626_v7 = vpop.f32.mrb[103].mxu1 }
0x1c52   : > { %v5639_v56 = vadd.f32 %v5638_v29, %v5624_v15  ;;  %v5627_v49 = vadd.f32 %v5626_v7, %v5558_v26 }
0x1c53   : > { %v5642_v39 = vadd.f32 %v5638_v29, %v5635_v6  ;;  %v5645_v10 = vmax.f32 %v5641_v22, 0.0 }
0x1c54   : > { %v5640_v38 = vadd.f32 %v5638_v29, %v5627_v49  ;;  %v5643_v53 = vmax.f32 %v5639_v56, 0.0 }
0x1c55   : > { %v5646_v3 = vmax.f32 %v5642_v39, 0.0 }
0x1c56   : > { %v5644_v30 = vmax.f32 %v5640_v38, 0.0 }
0x1c57   : > { %v5648_v47 = vpack.c.bf16 %v5646_v3, %v5645_v10 }
0x1c58   : > { %v5647_v59 = vpack.c.bf16 %v5644_v30, %v5643_v53 }
0x1c5a   : > { %6871 = vmatprep.mubr.bf16.mxu0 %v5647_v59 }
0x1c5b   : > { %6872 = vmatmul.mubr.bf16.vlgmr.msra.gmra.mrb[96].mxu0 %v5648_v47 }
0x1d2e   : > { %v6873_v52 = vpop.f32.mrb[96].mxu0 }
0x1d2f   : > { %v5748_v25 = vpop.f32.mrb[97].mxu0  ;;  %v5757_v41 = vadd.f32 %v6873_v52, %v5665_v9 }
0x1d30   : > { %v5749_v44 = vadd.f32 %v5748_v25, %v5665_v9  ;;  %v6874_v27 = vpop.f32.mrb[98].mxu0 }
0x1d31   : > { %v5751_v50 = vpop.f32.mrb[99].mxu0  ;;  %v5760_v20 = vadd.f32 %v6874_v27, %v5665_v9 }
0x1d32   : > { %v5752_v4 = vadd.f32 %v5751_v50, %v5665_v9  ;;  %5763 = vmax.xlane.f32.xlu1 %v5749_v44 }
0x1d34   : > { %5765 = vmax.xlane.f32.xlu0 %v5752_v4 }
0x1d36   : > { %5767 = vmax.xlane.f32.xlu1 %v5757_v41 }
0x1d38   : > { %5769 = vmax.xlane.f32.xlu0 %v5760_v20 }
0x1dbf   : > { %v5764_v54 = vpop.xlane.xlu1 %5763 }
0x1dc0   : > { %v5771_v51 = vsub.f32 %v5749_v44, %v5764_v54 }
0x1dc1   : > { %v5766_v61 = vpop.xlane.xlu0 %5765 }
0x1dc2   : > { %v5775_v21 = vmul.f32 1.442695, %v5771_v51  ;;  %v5772_v42 = vsub.f32 %v5752_v4, %v5766_v61 }
0x1dc3   : > { %v5768_v34 = vpop.xlane.xlu1 %5767 }
0x1dc4   : > { %7396 = vpow2.f32 %v5775_v21  ;;  %v5777_v23 = vmul.f32 1.442695, %v5772_v42  ;;  %v5773_v40 = vsub.f32 %v5757_v41, %v5768_v34 }
0x1dc5   : > { %v5770_v32 = vpop.xlane.xlu0 %5769 }
0x1dc6   : > { %7398 = vpow2.f32 %v5777_v23  ;;  %v5779_v0 = vmul.f32 1.442695, %v5773_v40  ;;  %v5774_v45 = vsub.f32 %v5760_v20, %v5770_v32 }
0x1dc8   : > { %7400 = vpow2.f32 %v5779_v0  ;;  %v5781_v60 = vmul.f32 1.442695, %v5774_v45 }
0x1dca   : > { %7402 = vpow2.f32 %v5781_v60 }
0x1dce   : > { %v7397_v35 = vpop.eup %7396 }
0x1dcf   : > { %5783 = vadd.xlane.f32.xlu1 %v7397_v35 }
0x1dd0   : > { %v7399_v62 = vpop.eup %7398 }
0x1dd1   : > { %5785 = vadd.xlane.f32.xlu0 %v7399_v62 }
0x1dd2   : > { %v7401_v37 = vpop.eup %7400 }
0x1dd3   : > { %5787 = vadd.xlane.f32.xlu1 %v7401_v37 }
0x1dd4   : > { %v7403_v1 = vpop.eup %7402 }
0x1dd5   : > { %5789 = vadd.xlane.f32.xlu0 %v7403_v1 }
0x1e5c   : > { %v5784_v63 = vpop.xlane.xlu1 %5783 }
0x1e5d   : > { %7404 = vrcp.f32 %v5784_v63 }
0x1e5e   : > { %v5786_v48 = vpop.xlane.xlu0 %5785 }
0x1e5f   : > { %7406 = vrcp.f32 %v5786_v48 }
0x1e60   : > { %v5788_v33 = vpop.xlane.xlu1 %5787 }
0x1e61   : > { %7408 = vrcp.f32 %v5788_v33 }
0x1e62   : > { %v5790_v31 = vpop.xlane.xlu0 %5789 }
0x1e63   : > { %7410 = vrcp.f32 %v5790_v31 }
0x1e67   : > { %v7405_v55 = vpop.eup %7404 }
0x1e68   : > { %v5799_v18 = vmul.f32 %v7405_v55, %v7397_v35 }
0x1e69   : > { %v7407_v8 = vpop.eup %7406 }
0x1e6a   : > { %5803 = vst [vmem:[%s442_s25] sm:$0xff] %v5799_v18  ;;  %v5800_v43 = vmul.f32 %v7407_v8, %v7399_v62 }
0x1e6b   : > { %v7409_v16 = vpop.eup %7408 }
0x1e6c   : > { %5804 = vst [vmem:[%s442_s25 + $0x8] sm:$0xff] %v5800_v43  ;;  %v5801_v12 = vmul.f32 %v7409_v16, %v7401_v37 }
0x1e6d   : > { %v7411_v14 = vpop.eup %7410 }
0x1e6e   : > { %5805 = vst [vmem:[%s442_s25 + $0x10] sm:$0xff] %v5801_v12  ;;  %v5802_v17 = vmul.f32 %v7411_v14, %v7403_v1 }
0x1e70   : > { %5806 = vst [vmem:[%s442_s25 + $0x18] sm:$0xff] %v5802_v17 }
0x1e71 PF: > { %s23_s30 = sadd.s32 1, %s7614_s30  }
0x1e72   : > { %p20_p10 = scmp.ge.s32.totalorder %s23_s30, 4  }
0x1e74   :  { %22 = sbr.rel (!%p20_p10) target bundleno = 4 (0x4), region = 132 }
0x1e7b   :  { %5829 = vsyncpa [#allocation3], 1 }
0x1e7c   :  { %5831 = vsyncpa [#allocation3 + $0x1], 1 }
0x1e7d   :  { %5832 = vsyncpa [#allocation5], 1 }
0x1e7e   :  { %5833 = vsyncpa [#allocation8], 1 }
0x1e7f   :  { %5834 = vsyncpa [#allocation11], 1 }

</bundles_post_ra>
